<compile_context>
chip_gen: v5e
topology: v5e:2x2
jax: 0.10.0
libtpu: 0.0.40
codegen_flags: <defaults>
</compile_context>

<pallas_src>
import functools
import numpy as np
import jax
import jax.numpy as jnp
from jax import lax
from jax.experimental import pallas as pl
from jax.experimental.pallas import tpu as pltpu

_EPS = 1e-5  # nn.GroupNorm default eps


def _gn(x, w, b):
    """GroupNorm(1, C) on channel-last rows, single-pass statistics (one data sweep
    for both sum and sum-of-squares), fused affine."""
    inv_c = 1.0 / x.shape[-1]
    s1 = jnp.sum(x, axis=-1, keepdims=True)
    s2 = jnp.sum(x * x, axis=-1, keepdims=True)
    mu = s1 * inv_c
    var = jnp.maximum(s2 * inv_c - mu * mu, 0.0)
    inv = lax.rsqrt(var + _EPS)
    return (x - mu) * (inv * w) + b


def att_kernel(tbl_ref,
               actors_ref, a_aux_ref, nodes_ref, n_aux_ref, n_auxt_ref,
               wd1_ref, wd2_ref, wq_ref, wc1_ref, wout_ref, vctx_ref, vagt_ref,
               out_ref, acc_ref, aq_ref, alin_ref, *, dist_th, mxu_dtype):
    f32 = jnp.float32

    def dot(a, b):
        return jnp.dot(a.astype(mxu_dtype), b.astype(mxu_dtype),
                       preferred_element_type=f32)

    ta, n_agt = actors_ref.shape
    tn, n_ctx = nodes_ref.shape
    ai = pl.program_id(0)
    nj = pl.program_id(1)

    actors = actors_ref[...]                # (ta, n_agt)
    a_aux = a_aux_ref[...]                  # (ta, 3): ctr_x, ctr_y, batch_id
    wd1 = wd1_ref[...]                      # (2, n_ctx)

    # Stacked GN affine / bias rows (static slices, zero-cost views of small tiles).
    vctx = vctx_ref[...]                    # (5, n_ctx)
    vagt = vagt_ref[...]                    # (6, n_agt)
    bd1 = vctx[0:1, :]
    gd2w = vctx[1:2, :]
    gd2b = vctx[2:3, :]
    gqw = vctx[3:4, :]
    gqb = vctx[4:5, :]
    gc1w = vagt[0:1, :]
    gc1b = vagt[1:2, :]
    gnw = vagt[2:3, :]
    gnb = vagt[3:4, :]
    glinw = vagt[4:5, :]
    glinb = vagt[5:6, :]

    # ---- once per actor tile: zero accumulator and precompute actor-only terms ----
    @pl.when(nj == 0)
    def _init():
        acc_ref[...] = jnp.zeros_like(acc_ref)
        # query path: relu(GN(actors @ Wq)) @ Wc1[query row-block]
        q = jnp.maximum(_gn(dot(actors, wq_ref[...]), gqw, gqb), 0.0)
        aq_ref[...] = dot(q, wc1_ref[n_ctx:2 * n_ctx, :])
        # actor-only half of dist Linear-1 (hoisted out of the node loop):
        #   (a_xy - n_xy) @ Wd1 + b == (a_xy @ Wd1 + b) - n_xy @ Wd1
        alin_ref[...] = (a_aux[:, 0:1] * wd1[0:1, :]
                         + a_aux[:, 1:2] * wd1[1:2, :] + bd1)

    # ---- per-edge work only for node tiles that actually contain in-range edges ----
    @pl.when(tbl_ref[ai, nj] > 0)
    def _edges():
        nodes = nodes_ref[...]              # (tn, n_ctx)
        n_aux = n_aux_ref[...]              # (tn, 3)
        n_t = n_auxt_ref[0]                 # (3, tn) lane-dense node aux

        # edge mask, fully 2-D / lane-dense: (ta, tn), sqrt-free, no padded temporaries
        dx = a_aux[:, 0:1] - n_t[0:1, :]
        dy = a_aux[:, 1:2] - n_t[1:2, :]
        same_b = a_aux[:, 2:3] == n_t[2:3, :]
        in_rng = dx * dx + dy * dy <= dist_th * dist_th
        maskf = jnp.logical_and(in_rng, same_b).astype(f32)        # (ta, tn)

        # dist Linear-1, node-only half; combine with the hoisted actor-only half
        n_lin = n_aux[:, 0:1] * wd1[0:1, :] + n_aux[:, 1:2] * wd1[1:2, :]   # (tn, n_ctx)
        h = jnp.maximum(alin_ref[...][:, None, :] - n_lin[None, :, :], 0.0)  # (ta,tn,n_ctx)

        # per-edge chain (flattened to 2-D for the MXU matmuls)
        hf = h.reshape(ta * tn, n_ctx)
        df = jnp.maximum(_gn(dot(hf, wd2_ref[...]), gd2w, gd2b), 0.0)
        cf = dot(df, wc1_ref[0:n_ctx, :])                          # dist row-block of ctx L1

        # query / lane-node row-blocks of ctx Linear-1 are edge-independent -> broadcast
        nc = dot(nodes, wc1_ref[2 * n_ctx:3 * n_ctx, :])           # (tn, n_agt)
        c3 = cf.reshape(ta, tn, n_agt) + aq_ref[...][:, None, :] + nc[None, :, :]
        c3 = jnp.maximum(_gn(c3, gc1w, gc1b), 0.0)                 # (ta, tn, n_agt)

        # masked scatter-add over this node tile (replaces index_add_); the 2-D mask is
        # expanded only here, at the point of use.  Edge-independent ctx Linear-2 (Wc2)
        # is hoisted after the sum into the finalize step.
        acc_ref[...] += jnp.sum(c3 * maskf[:, :, None], axis=1)    # (ta, n_agt)

    # ---- finalize once per actor tile: agt matmul, GN, ReLU, linear, residual, ReLU ----
    @pl.when(nj == pl.num_programs(1) - 1)
    def _finalize():
        wagt = wout_ref[0:n_agt, :]
        wc2 = wout_ref[n_agt:2 * n_agt, :]
        wlin = wout_ref[2 * n_agt:3 * n_agt, :]
        agts = dot(actors, wagt) + dot(acc_ref[...], wc2)
        agts = jnp.maximum(_gn(agts, gnw, gnb), 0.0)
        agts = _gn(dot(agts, wlin), glinw, glinb)
        out_ref[...] = jnp.maximum(agts + actors, 0.0)


def _pick_tile(n, cap):
    """Largest tile <= cap that divides n and is a multiple of 8 (or n itself)."""
    if n <= cap:
        return n
    for t in range(min(cap, n), 7, -1):
        if n % t == 0 and t % 8 == 0:
            return t
    return n


def _tile_edge_table(a_aux, n_aux, dist_th, ta, tn):
    """Per-(actor_tile, node_tile) edge-presence table, int32, slightly conservative so
    it can never drop an edge that the kernel's own f32 test would keep."""
    n_a, n_n = a_aux.shape[0], n_aux.shape[0]
    dx = a_aux[:, 0:1] - n_aux[:, 0][None, :]
    dy = a_aux[:, 1:2] - n_aux[:, 1][None, :]
    same = a_aux[:, 2:3] == n_aux[:, 2][None, :]
    th2 = dist_th * dist_th
    m = jnp.logical_and(dx * dx + dy * dy <= th2 * (1.0 + 1e-5) + 1e-4, same)
    tbl = m.reshape(n_a // ta, ta, n_n // tn, tn).any(axis=(1, 3))
    return tbl.astype(jnp.int32)


def att_pallas(params, actors, a_aux, nodes, n_aux, dist_th, *,
               ta=None, tn=None, tile_tbl=None, mxu_dtype=jnp.float32):
    n_a, c_a = actors.shape
    n_n, c_n = nodes.shape
    # Tile defaults sized against the PADDED (128-lane) per-edge footprint and the
    # 48 MiB VMEM budget below; actor cap 64 keeps >=2 parallel tiles when n_a >= 128.
    if ta is None:
        ta = _pick_tile(n_a, 64)
    if tn is None:
        tn = _pick_tile(n_n, 128)
    assert n_a % ta == 0 and n_n % tn == 0, "tile sizes must divide the row counts"
    assert (ta % 8 == 0) or (ta == n_a)
    assert (tn % 8 == 0) or (tn == n_n)
    n_at, n_nt = n_a // ta, n_n // tn

    if tile_tbl is None:
        tile_tbl = _tile_edge_table(a_aux, n_aux, dist_th, ta, tn)   # (n_at, n_nt) i32

    # Node aux in per-tile transposed form -> lane-dense (3, tn) view for the 2-D mask.
    n_aux_t = n_aux.reshape(n_nt, tn, 3).transpose(0, 2, 1)          # (n_nt, 3, tn)

    # Consolidated weights: 20 arrays -> 7 BlockSpecs (fewer DMA slots / index_maps).
    wc1 = jnp.concatenate([params['wc1d'], params['wc1q'], params['wc1c']], axis=0)
    wout = jnp.concatenate([params['wagt'], params['wc2'], params['wlin']], axis=0)
    vctx = jnp.concatenate([params['bd1'], params['gd2w'], params['gd2b'],
                            params['gqw'], params['gqb']], axis=0)
    vagt = jnp.concatenate([params['gc1w'], params['gc1b'], params['gnw'],
                            params['gnb'], params['glinw'], params['glinb']], axis=0)
    weights = [params['wd1'], params['wd2'], params['wq'], wc1, wout, vctx, vagt]

    in_specs = (
        [pl.BlockSpec((ta, c_a), lambda ai, nj, tbl: (ai, 0)),    # actors (actor tile)
         pl.BlockSpec((ta, 3),   lambda ai, nj, tbl: (ai, 0)),    # actor aux
         pl.BlockSpec((tn, c_n), lambda ai, nj, tbl: (nj, 0)),    # nodes (node tile)
         pl.BlockSpec((tn, 3),   lambda ai, nj, tbl: (nj, 0)),    # node aux (rows)
         pl.BlockSpec((1, 3, tn), lambda ai, nj, tbl: (nj, 0, 0))]  # node aux (lane-dense)
        + [pl.BlockSpec(w.shape, lambda ai, nj, tbl: (0, 0)) for w in weights])

    e = n_a * n_n
    cost = pl.CostEstimate(
        flops=int(e * (2 * c_n * c_n + 2 * c_n * c_a + 12 * (c_n + c_a))
                  + n_a * (6 * c_a * c_a + 2 * c_a * c_n)),
        transcendentals=int(2 * e + 4 * n_a),
        bytes_accessed=int(4 * (2 * actors.size + a_aux.size
                                + n_at * (nodes.size + n_aux.size)
                                + sum(w.size for w in weights))))

    kernel = functools.partial(att_kernel, dist_th=float(dist_th), mxu_dtype=mxu_dtype)
    grid_spec = pltpu.PrefetchScalarGridSpec(
        num_scalar_prefetch=1,
        grid=(n_at, n_nt),
        in_specs=in_specs,
        out_specs=pl.BlockSpec((ta, c_a), lambda ai, nj, tbl: (ai, 0)),
        scratch_shapes=[pltpu.VMEM((ta, c_a), jnp.float32),   # acc : masked edge sum
                        pltpu.VMEM((ta, c_a), jnp.float32),   # aq  : query-path term
                        pltpu.VMEM((ta, c_n), jnp.float32)])  # alin: actor dist L1 term
    return pl.pallas_call(
        kernel,
        out_shape=jax.ShapeDtypeStruct((n_a, c_a), jnp.float32),
        grid_spec=grid_spec,
        compiler_params=pltpu.CompilerParams(
            dimension_semantics=("parallel", "arbitrary"),
            vmem_limit_bytes=48 * 1024 * 1024),
        cost_estimate=cost,
    )(tile_tbl, actors, a_aux, nodes, n_aux, n_aux_t, *weights)


def ls2actor_forward(blocks, actors, actor_idcs, actor_ctrs,
                     nodes, node_idcs, node_ctrs, dist_th, *,
                     ta=None, tn=None, mxu_dtype=jnp.float32):
    """Glue: flatten per-batch lists into flat tensors + (ctr_x, ctr_y, batch_id) aux
    columns, build the block-sparse tile table once, run the Att blocks."""
    a_ctrs = jnp.concatenate([jnp.asarray(c, jnp.float32) for c in actor_ctrs], axis=0)
    n_ctrs = jnp.concatenate([jnp.asarray(c, jnp.float32) for c in node_ctrs], axis=0)
    a_bid = jnp.concatenate(
        [jnp.full((len(idcs), 1), float(i), jnp.float32) for i, idcs in enumerate(actor_idcs)], 0)
    n_bid = jnp.concatenate(
        [jnp.full((len(idcs), 1), float(i), jnp.float32) for i, idcs in enumerate(node_idcs)], 0)
    a_aux = jnp.concatenate([a_ctrs, a_bid], axis=1)
    n_aux = jnp.concatenate([n_ctrs, n_bid], axis=1)

    n_a, n_n = actors.shape[0], nodes.shape[0]
    if ta is None:
        ta = _pick_tile(n_a, 64)
    if tn is None:
        tn = _pick_tile(n_n, 128)
    tbl = _tile_edge_table(a_aux, n_aux, dist_th, ta, tn)
    for params in blocks:
        actors = att_pallas(params, actors, a_aux, nodes, n_aux, dist_th,
                            ta=ta, tn=tn, tile_tbl=tbl, mxu_dtype=mxu_dtype)
    return actors


def init_att_params(key, n_agt, n_ctx):
    ks = jax.random.split(key, 20)

    def lin(k, fan_in, fan_out):
        return (jax.random.normal(k, (fan_in, fan_out), jnp.float32)
                / np.sqrt(fan_in)).astype(jnp.float32)

    def gaff(k, c):
        kw, kb = jax.random.split(k)
        return (1.0 + 0.1 * jax.random.normal(kw, (1, c), jnp.float32),
                0.1 * jax.random.normal(kb, (1, c), jnp.float32))

    p = {}
    p['wd1'] = lin(ks[0], 2, n_ctx)
    p['bd1'] = 0.1 * jax.random.normal(ks[1], (1, n_ctx), jnp.float32)
    p['wd2'] = lin(ks[2], n_ctx, n_ctx)
    p['gd2w'], p['gd2b'] = gaff(ks[3], n_ctx)
    p['wq'] = lin(ks[4], n_agt, n_ctx)
    p['gqw'], p['gqb'] = gaff(ks[5], n_ctx)
    # Row-blocks of ctx Linear-1's (3*n_ctx, n_agt) weight: dist / query / lane-node.
    p['wc1d'] = lin(ks[6], n_ctx, n_agt)
    p['wc1q'] = lin(ks[7], n_ctx, n_agt)
    p['wc1c'] = lin(ks[8], n_ctx, n_agt)
    p['gc1w'], p['gc1b'] = gaff(ks[9], n_agt)
    p['wc2'] = lin(ks[10], n_agt, n_agt)
    p['wagt'] = lin(ks[11], n_agt, n_agt)
    p['gnw'], p['gnb'] = gaff(ks[12], n_agt)
    p['wlin'] = lin(ks[13], n_agt, n_agt)
    p['glinw'], p['glinb'] = gaff(ks[14], n_agt)
    return p


def att_reference(params, actors, actor_ctrs, nodes, node_ctrs, dist_th):
    """Numpy reference following the PyTorch Att.forward sparse-edge path (eval mode)."""
    p = {k: np.asarray(v, np.float64) for k, v in params.items()}
    actors = np.asarray(actors, np.float64)
    nodes64 = np.asarray(nodes, np.float64)

    hi, wi = [], []
    hi_count = wi_count = 0
    for ac, nc in zip(actor_ctrs, node_ctrs):
        ac32 = np.asarray(ac, np.float32)
        nc32 = np.asarray(nc, np.float32)
        d = ac32[:, None, :] - nc32[None, :, :]
        d = np.sqrt((d ** 2).sum(-1))
        idcs = np.argwhere(d <= dist_th)
        if len(idcs):
            hi.append(idcs[:, 0] + hi_count)
            wi.append(idcs[:, 1] + wi_count)
        hi_count += len(ac32)
        wi_count += len(nc32)
    hi = np.concatenate(hi)
    wi = np.concatenate(wi)
    a_ctrs = np.concatenate([np.asarray(x, np.float64) for x in actor_ctrs], 0)
    n_ctrs = np.concatenate([np.asarray(x, np.float64) for x in node_ctrs], 0)

    def gn(x, w, b):
        mu = x.mean(1, keepdims=True)
        v = ((x - mu) ** 2).mean(1, keepdims=True)
        return (x - mu) / np.sqrt(v + _EPS) * w + b

    dvec = a_ctrs[hi] - n_ctrs[wi]
    h = np.maximum(dvec @ p['wd1'] + p['bd1'], 0.0)
    h = np.maximum(gn(h @ p['wd2'], p['gd2w'], p['gd2b']), 0.0)
    q = np.maximum(gn(actors @ p['wq'], p['gqw'], p['gqb']), 0.0)[hi]
    ctx_sel = nodes64[wi]
    wc1 = np.concatenate([p['wc1d'], p['wc1q'], p['wc1c']], 0)
    feat = np.concatenate([h, q, ctx_sel], 1)
    c = np.maximum(gn(feat @ wc1, p['gc1w'], p['gc1b']), 0.0)
    c = c @ p['wc2']
    agts = actors @ p['wagt']
    np.add.at(agts, hi, c)
    agts = np.maximum(gn(agts, p['gnw'], p['gnb']), 0.0)
    agts = gn(agts @ p['wlin'], p['glinw'], p['glinb'])
    agts = np.maximum(agts + actors, 0.0)
    return agts


if __name__ == "__main__":
    config = {'n_actor': 32, 'n_ls': 32, 'p_dropout': 0.0, 'map2actor_dist': 6.0}
    n_blk = 2

    key = jax.random.PRNGKey(0)
    k_act, k_nod, k_actr, k_nctr, k_p = jax.random.split(key, 5)

    # 2 batches: 8 + 8 actors, 16 + 16 lane nodes  ->  grid (2 actor tiles, 2 node tiles);
    # cross-batch tiles are skipped via the prefetched edge-presence table.
    actor_idcs = [jnp.arange(0, 8), jnp.arange(8, 16)]
    node_idcs = [jnp.arange(0, 16), jnp.arange(16, 32)]
    n_a, n_n = 16, 32

    actors = jax.random.normal(k_act, (n_a, config['n_actor']), jnp.float32)
    nodes = jax.random.normal(k_nod, (n_n, config['n_ls']), jnp.float32)
    a_ctrs_all = jax.random.uniform(k_actr, (n_a, 2), jnp.float32, 0.0, 10.0)
    n_ctrs_all = jax.random.uniform(k_nctr, (n_n, 2), jnp.float32, 0.0, 10.0)
    actor_ctrs = [a_ctrs_all[:8], a_ctrs_all[8:]]
    node_ctrs = [n_ctrs_all[:16], n_ctrs_all[16:]]

    pkeys = jax.random.split(k_p, n_blk)
    blocks = [init_att_params(pkeys[i], config['n_actor'], config['n_ls'])
              for i in range(n_blk)]

    out = ls2actor_forward(blocks, actors, actor_idcs, actor_ctrs,
                           nodes, node_idcs, node_ctrs, config['map2actor_dist'],
                           ta=8, tn=16)
    out = jax.block_until_ready(out)

    # numpy reference following the PyTorch sparse-edge code path
    ref = np.asarray(actors, np.float64)
    for params in blocks:
        ref = att_reference(params, ref, actor_ctrs, np.asarray(nodes), node_ctrs,
                            config['map2actor_dist'])

    np.testing.assert_allclose(np.asarray(out), ref, rtol=2e-3, atol=2e-3)
    print("KERNEL_OK")
</pallas_src>

<mosaic_0001>
module attributes {stable_mosaic.version = 11 : i64} {
  func.func @att_kernel(%arg0: i32, %arg1: i32, %arg2: memref<2x2xi32, #tpu.memory_space<smem>>, %arg3: memref<8x32xf32, #tpu.memory_space<vmem>>, %arg4: memref<8x3xf32, #tpu.memory_space<vmem>>, %arg5: memref<16x32xf32, #tpu.memory_space<vmem>>, %arg6: memref<16x3xf32, #tpu.memory_space<vmem>>, %arg7: memref<1x3x16xf32, #tpu.memory_space<vmem>>, %arg8: memref<2x32xf32, #tpu.memory_space<vmem>>, %arg9: memref<32x32xf32, #tpu.memory_space<vmem>>, %arg10: memref<32x32xf32, #tpu.memory_space<vmem>>, %arg11: memref<96x32xf32, #tpu.memory_space<vmem>>, %arg12: memref<96x32xf32, #tpu.memory_space<vmem>>, %arg13: memref<5x32xf32, #tpu.memory_space<vmem>>, %arg14: memref<6x32xf32, #tpu.memory_space<vmem>>, %arg15: memref<8x32xf32, #tpu.memory_space<vmem>>, %arg16: memref<8x32xf32, #tpu.memory_space<vmem>>, %arg17: memref<8x32xf32, #tpu.memory_space<vmem>>, %arg18: memref<8x32xf32, #tpu.memory_space<vmem>>) attributes {dimension_semantics = [#tpu.dimension_semantics<parallel>, #tpu.dimension_semantics<arbitrary>], iteration_bounds = array<i64: 2, 2>, scalar_prefetch = 1 : i64, scratch_operands = 3 : i64, tpu.core_type = #tpu.core_type<tc>, window_params = [{transform_indices = @transform_0, window_bounds = array<i64: 8, 32>}, {transform_indices = @transform_1, window_bounds = array<i64: 8, 3>}, {transform_indices = @transform_2, window_bounds = array<i64: 16, 32>}, {transform_indices = @transform_3, window_bounds = array<i64: 16, 3>}, {transform_indices = @transform_4, window_bounds = array<i64: 1, 3, 16>}, {pipeline_mode = #tpu.pipeline_mode<synchronous>, transform_indices = @transform_5, window_bounds = array<i64: 2, 32>}, {pipeline_mode = #tpu.pipeline_mode<synchronous>, transform_indices = @transform_6, window_bounds = array<i64: 32, 32>}, {pipeline_mode = #tpu.pipeline_mode<synchronous>, transform_indices = @transform_7, window_bounds = array<i64: 32, 32>}, {pipeline_mode = #tpu.pipeline_mode<synchronous>, transform_indices = @transform_8, window_bounds = array<i64: 96, 32>}, {pipeline_mode = #tpu.pipeline_mode<synchronous>, transform_indices = @transform_9, window_bounds = array<i64: 96, 32>}, {pipeline_mode = #tpu.pipeline_mode<synchronous>, transform_indices = @transform_10, window_bounds = array<i64: 5, 32>}, {pipeline_mode = #tpu.pipeline_mode<synchronous>, transform_indices = @transform_11, window_bounds = array<i64: 6, 32>}, {transform_indices = @transform_12, window_bounds = array<i64: 8, 32>}]} {
    %c0 = arith.constant 0 : index
    %c0_0 = arith.constant 0 : index
    %0 = vector.load %arg3[%c0, %c0_0] : memref<8x32xf32, #tpu.memory_space<vmem>>, vector<8x32xf32>
    %c0_1 = arith.constant 0 : index
    %c0_2 = arith.constant 0 : index
    %1 = vector.load %arg4[%c0_1, %c0_2] : memref<8x3xf32, #tpu.memory_space<vmem>>, vector<8x3xf32>
    %c0_3 = arith.constant 0 : index
    %c0_4 = arith.constant 0 : index
    %2 = vector.load %arg8[%c0_3, %c0_4] : memref<2x32xf32, #tpu.memory_space<vmem>>, vector<2x32xf32>
    %c0_5 = arith.constant 0 : index
    %c0_6 = arith.constant 0 : index
    %3 = vector.load %arg13[%c0_5, %c0_6] : memref<5x32xf32, #tpu.memory_space<vmem>>, vector<5x32xf32>
    %c0_7 = arith.constant 0 : index
    %c0_8 = arith.constant 0 : index
    %4 = vector.load %arg14[%c0_7, %c0_8] : memref<6x32xf32, #tpu.memory_space<vmem>>, vector<6x32xf32>
    %5 = vector.extract_strided_slice %3 {offsets = [0, 0], sizes = [1, 32], strides = [1, 1]} : vector<5x32xf32> to vector<1x32xf32>
    %6 = vector.extract_strided_slice %3 {offsets = [1, 0], sizes = [1, 32], strides = [1, 1]} : vector<5x32xf32> to vector<1x32xf32>
    %7 = vector.extract_strided_slice %3 {offsets = [2, 0], sizes = [1, 32], strides = [1, 1]} : vector<5x32xf32> to vector<1x32xf32>
    %8 = vector.extract_strided_slice %3 {offsets = [3, 0], sizes = [1, 32], strides = [1, 1]} : vector<5x32xf32> to vector<1x32xf32>
    %9 = vector.extract_strided_slice %3 {offsets = [4, 0], sizes = [1, 32], strides = [1, 1]} : vector<5x32xf32> to vector<1x32xf32>
    %10 = vector.extract_strided_slice %4 {offsets = [0, 0], sizes = [1, 32], strides = [1, 1]} : vector<6x32xf32> to vector<1x32xf32>
    %11 = vector.extract_strided_slice %4 {offsets = [1, 0], sizes = [1, 32], strides = [1, 1]} : vector<6x32xf32> to vector<1x32xf32>
    %12 = vector.extract_strided_slice %4 {offsets = [2, 0], sizes = [1, 32], strides = [1, 1]} : vector<6x32xf32> to vector<1x32xf32>
    %13 = vector.extract_strided_slice %4 {offsets = [3, 0], sizes = [1, 32], strides = [1, 1]} : vector<6x32xf32> to vector<1x32xf32>
    %14 = vector.extract_strided_slice %4 {offsets = [4, 0], sizes = [1, 32], strides = [1, 1]} : vector<6x32xf32> to vector<1x32xf32>
    %15 = vector.extract_strided_slice %4 {offsets = [5, 0], sizes = [1, 32], strides = [1, 1]} : vector<6x32xf32> to vector<1x32xf32>
    %c0_i32 = arith.constant 0 : i32
    %16 = arith.cmpi eq, %arg1, %c0_i32 : i32
    %17 = arith.extui %16 : i1 to i32
    %c0_i32_9 = arith.constant 0 : i32
    %18 = arith.cmpi ne, %17, %c0_i32_9 : i32
    scf.if %18 {
      %cst = arith.constant 0.000000e+00 : f32
      %28 = vector.broadcast %cst : f32 to vector<8x32xf32>
      %c0_13 = arith.constant 0 : index
      %c0_14 = arith.constant 0 : index
      %29 = vector.load %arg16[%c0_13, %c0_14] : memref<8x32xf32, #tpu.memory_space<vmem>>, vector<8x32xf32>
      tpu.vector_store %arg16[%c0_13, %c0_14], %28 {strides = array<i32>} : memref<8x32xf32, #tpu.memory_space<vmem>>, vector<8x32xf32>,
      %c0_15 = arith.constant 0 : index
      %c0_16 = arith.constant 0 : index
      %30 = vector.load %arg10[%c0_15, %c0_16] : memref<32x32xf32, #tpu.memory_space<vmem>>, vector<32x32xf32>
      %cst_17 = arith.constant dense<0.000000e+00> : vector<8x32xf32>
      %31 = tpu.matmul %0, %30, %cst_17 {dimension_numbers = #tpu.dot_dimension_numbers<[1], [0], [0], [1], [0, 0, 1, 1], [], []>} : vector<8x32xf32>, vector<32x32xf32>, vector<8x32xf32> -> vector<8x32xf32>
      %cst_18 = arith.constant dense<0.000000e+00> : vector<8xf32>
      %32 = vector.multi_reduction <add>, %31, %cst_18 [1] : vector<8x32xf32> to vector<8xf32>
      %33 = vector.shape_cast %32 : vector<8xf32> to vector<8x1xf32>
      %34 = arith.mulf %31, %31 : vector<8x32xf32>
      %cst_19 = arith.constant dense<0.000000e+00> : vector<8xf32>
      %35 = vector.multi_reduction <add>, %34, %cst_19 [1] : vector<8x32xf32> to vector<8xf32>
      %36 = vector.shape_cast %35 : vector<8xf32> to vector<8x1xf32>
      %cst_20 = arith.constant 3.125000e-02 : f32
      %37 = vector.broadcast %cst_20 : f32 to vector<8x1xf32>
      %38 = arith.mulf %33, %37 : vector<8x1xf32>
      %cst_21 = arith.constant 3.125000e-02 : f32
      %39 = vector.broadcast %cst_21 : f32 to vector<8x1xf32>
      %40 = arith.mulf %36, %39 : vector<8x1xf32>
      %41 = arith.mulf %38, %38 : vector<8x1xf32>
      %42 = arith.subf %40, %41 : vector<8x1xf32>
      %cst_22 = arith.constant 0.000000e+00 : f32
      %43 = vector.broadcast %cst_22 : f32 to vector<8x1xf32>
      %44 = arith.maximumf %42, %43 : vector<8x1xf32>
      %cst_23 = arith.constant 9.99999974E-6 : f32
      %45 = vector.broadcast %cst_23 : f32 to vector<8x1xf32>
      %46 = arith.addf %44, %45 : vector<8x1xf32>
      %47 = math.rsqrt %46 : vector<8x1xf32>
      %48 = vector.broadcast %38 : vector<8x1xf32> to vector<8x32xf32>
      %49 = arith.subf %31, %48 : vector<8x32xf32>
      %50 = vector.broadcast %47 : vector<8x1xf32> to vector<8x32xf32>
      %51 = vector.broadcast %8 : vector<1x32xf32> to vector<8x32xf32>
      %52 = arith.mulf %50, %51 : vector<8x32xf32>
      %53 = arith.mulf %49, %52 : vector<8x32xf32>
      %54 = vector.broadcast %9 : vector<1x32xf32> to vector<8x32xf32>
      %55 = arith.addf %53, %54 : vector<8x32xf32>
      %cst_24 = arith.constant 0.000000e+00 : f32
      %56 = vector.broadcast %cst_24 : f32 to vector<8x32xf32>
      %57 = arith.maximumf %55, %56 : vector<8x32xf32>
      %c32 = arith.constant 32 : index
      %c0_25 = arith.constant 0 : index
      %58 = vector.load %arg11[%c32, %c0_25] : memref<96x32xf32, #tpu.memory_space<vmem>>, vector<32x32xf32>
      %cst_26 = arith.constant dense<0.000000e+00> : vector<8x32xf32>
      %59 = tpu.matmul %57, %58, %cst_26 {dimension_numbers = #tpu.dot_dimension_numbers<[1], [0], [0], [1], [0, 0, 1, 1], [], []>} : vector<8x32xf32>, vector<32x32xf32>, vector<8x32xf32> -> vector<8x32xf32>
      %c0_27 = arith.constant 0 : index
      %c0_28 = arith.constant 0 : index
      %60 = vector.load %arg17[%c0_27, %c0_28] : memref<8x32xf32, #tpu.memory_space<vmem>>, vector<8x32xf32>
      tpu.vector_store %arg17[%c0_27, %c0_28], %59 {strides = array<i32>} : memref<8x32xf32, #tpu.memory_space<vmem>>, vector<8x32xf32>,
      %61 = vector.extract_strided_slice %1 {offsets = [0, 0], sizes = [8, 1], strides = [1, 1]} : vector<8x3xf32> to vector<8x1xf32>
      %62 = vector.extract_strided_slice %2 {offsets = [0, 0], sizes = [1, 32], strides = [1, 1]} : vector<2x32xf32> to vector<1x32xf32>
      %63 = vector.broadcast %61 : vector<8x1xf32> to vector<8x32xf32>
      %64 = vector.broadcast %62 : vector<1x32xf32> to vector<8x32xf32>
      %65 = arith.mulf %63, %64 : vector<8x32xf32>
      %66 = vector.extract_strided_slice %1 {offsets = [0, 1], sizes = [8, 1], strides = [1, 1]} : vector<8x3xf32> to vector<8x1xf32>
      %67 = vector.extract_strided_slice %2 {offsets = [1, 0], sizes = [1, 32], strides = [1, 1]} : vector<2x32xf32> to vector<1x32xf32>
      %68 = vector.broadcast %66 : vector<8x1xf32> to vector<8x32xf32>
      %69 = vector.broadcast %67 : vector<1x32xf32> to vector<8x32xf32>
      %70 = arith.mulf %68, %69 : vector<8x32xf32>
      %71 = arith.addf %65, %70 : vector<8x32xf32>
      %72 = vector.broadcast %5 : vector<1x32xf32> to vector<8x32xf32>
      %73 = arith.addf %71, %72 : vector<8x32xf32>
      %c0_29 = arith.constant 0 : index
      %c0_30 = arith.constant 0 : index
      %74 = vector.load %arg18[%c0_29, %c0_30] : memref<8x32xf32, #tpu.memory_space<vmem>>, vector<8x32xf32>
      tpu.vector_store %arg18[%c0_29, %c0_30], %73 {strides = array<i32>} : memref<8x32xf32, #tpu.memory_space<vmem>>, vector<8x32xf32>,
    } else {
    }
    %19 = arith.index_cast %arg0 : i32 to index
    %20 = arith.index_cast %arg1 : i32 to index
    %21 = memref.load %arg2[%19, %20] : memref<2x2xi32, #tpu.memory_space<smem>>
    %c0_i32_10 = arith.constant 0 : i32
    %22 = arith.cmpi sgt, %21, %c0_i32_10 : i32
    %23 = arith.extui %22 : i1 to i32
    %c0_i32_11 = arith.constant 0 : i32
    %24 = arith.cmpi ne, %23, %c0_i32_11 : i32
    scf.if %24 {
      %c0_13 = arith.constant 0 : index
      %c0_14 = arith.constant 0 : index
      %28 = vector.load %arg5[%c0_13, %c0_14] : memref<16x32xf32, #tpu.memory_space<vmem>>, vector<16x32xf32>
      %c0_15 = arith.constant 0 : index
      %c0_16 = arith.constant 0 : index
      %29 = vector.load %arg6[%c0_15, %c0_16] : memref<16x3xf32, #tpu.memory_space<vmem>>, vector<16x3xf32>
      %c0_17 = arith.constant 0 : index
      %c0_18 = arith.constant 0 : index
      %c0_19 = arith.constant 0 : index
      %30 = vector.load %arg7[%c0_17, %c0_18, %c0_19] : memref<1x3x16xf32, #tpu.memory_space<vmem>>, vector<1x3x16xf32>
      %31 = vector.shape_cast %30 : vector<1x3x16xf32> to vector<3x16xf32>
      %32 = vector.extract_strided_slice %1 {offsets = [0, 0], sizes = [8, 1], strides = [1, 1]} : vector<8x3xf32> to vector<8x1xf32>
      %33 = vector.extract_strided_slice %31 {offsets = [0, 0], sizes = [1, 16], strides = [1, 1]} : vector<3x16xf32> to vector<1x16xf32>
      %34 = vector.broadcast %32 : vector<8x1xf32> to vector<8x16xf32>
      %35 = vector.broadcast %33 : vector<1x16xf32> to vector<8x16xf32>
      %36 = arith.subf %34, %35 : vector<8x16xf32>
      %37 = vector.extract_strided_slice %1 {offsets = [0, 1], sizes = [8, 1], strides = [1, 1]} : vector<8x3xf32> to vector<8x1xf32>
      %38 = vector.extract_strided_slice %31 {offsets = [1, 0], sizes = [1, 16], strides = [1, 1]} : vector<3x16xf32> to vector<1x16xf32>
      %39 = vector.broadcast %37 : vector<8x1xf32> to vector<8x16xf32>
      %40 = vector.broadcast %38 : vector<1x16xf32> to vector<8x16xf32>
      %41 = arith.subf %39, %40 : vector<8x16xf32>
      %42 = vector.extract_strided_slice %1 {offsets = [0, 2], sizes = [8, 1], strides = [1, 1]} : vector<8x3xf32> to vector<8x1xf32>
      %43 = vector.extract_strided_slice %31 {offsets = [2, 0], sizes = [1, 16], strides = [1, 1]} : vector<3x16xf32> to vector<1x16xf32>
      %44 = vector.broadcast %42 : vector<8x1xf32> to vector<8x16xf32>
      %45 = vector.broadcast %43 : vector<1x16xf32> to vector<8x16xf32>
      %46 = arith.cmpf oeq, %44, %45 : vector<8x16xf32>
      %47 = arith.mulf %36, %36 : vector<8x16xf32>
      %48 = arith.mulf %41, %41 : vector<8x16xf32>
      %49 = arith.addf %47, %48 : vector<8x16xf32>
      %cst = arith.constant 3.600000e+01 : f32
      %50 = vector.broadcast %cst : f32 to vector<8x16xf32>
      %51 = arith.cmpf ole, %49, %50 : vector<8x16xf32>
      %52 = arith.andi %51, %46 : vector<8x16xi1>
      %53 = arith.extui %52 : vector<8x16xi1> to vector<8x16xi32>
      %54 = arith.sitofp %53 : vector<8x16xi32> to vector<8x16xf32>
      %55 = vector.extract_strided_slice %29 {offsets = [0, 0], sizes = [16, 1], strides = [1, 1]} : vector<16x3xf32> to vector<16x1xf32>
      %56 = vector.extract_strided_slice %2 {offsets = [0, 0], sizes = [1, 32], strides = [1, 1]} : vector<2x32xf32> to vector<1x32xf32>
      %57 = vector.broadcast %55 : vector<16x1xf32> to vector<16x32xf32>
      %58 = vector.broadcast %56 : vector<1x32xf32> to vector<16x32xf32>
      %59 = arith.mulf %57, %58 : vector<16x32xf32>
      %60 = vector.extract_strided_slice %29 {offsets = [0, 1], sizes = [16, 1], strides = [1, 1]} : vector<16x3xf32> to vector<16x1xf32>
      %61 = vector.extract_strided_slice %2 {offsets = [1, 0], sizes = [1, 32], strides = [1, 1]} : vector<2x32xf32> to vector<1x32xf32>
      %62 = vector.broadcast %60 : vector<16x1xf32> to vector<16x32xf32>
      %63 = vector.broadcast %61 : vector<1x32xf32> to vector<16x32xf32>
      %64 = arith.mulf %62, %63 : vector<16x32xf32>
      %65 = arith.addf %59, %64 : vector<16x32xf32>
      %c0_20 = arith.constant 0 : index
      %c0_21 = arith.constant 0 : index
      %66 = vector.load %arg18[%c0_20, %c0_21] : memref<8x32xf32, #tpu.memory_space<vmem>>, vector<8x32xf32>
      %67 = vector.shape_cast %66 : vector<8x32xf32> to vector<8x1x32xf32>
      %68 = vector.shape_cast %65 : vector<16x32xf32> to vector<1x16x32xf32>
      %69 = vector.broadcast %67 : vector<8x1x32xf32> to vector<8x16x32xf32>
      %70 = vector.broadcast %68 : vector<1x16x32xf32> to vector<8x16x32xf32>
      %71 = arith.subf %69, %70 : vector<8x16x32xf32>
      %cst_22 = arith.constant 0.000000e+00 : f32
      %72 = vector.broadcast %cst_22 : f32 to vector<8x16x32xf32>
      %73 = arith.maximumf %71, %72 : vector<8x16x32xf32>
      %74 = vector.shape_cast %73 : vector<8x16x32xf32> to vector<128x32xf32>
      %c0_23 = arith.constant 0 : index
      %c0_24 = arith.constant 0 : index
      %75 = vector.load %arg9[%c0_23, %c0_24] : memref<32x32xf32, #tpu.memory_space<vmem>>, vector<32x32xf32>
      %cst_25 = arith.constant dense<0.000000e+00> : vector<128x32xf32>
      %76 = tpu.matmul %74, %75, %cst_25 {dimension_numbers = #tpu.dot_dimension_numbers<[1], [0], [0], [1], [0, 0, 1, 1], [], []>} : vector<128x32xf32>, vector<32x32xf32>, vector<128x32xf32> -> vector<128x32xf32>
      %cst_26 = arith.constant dense<0.000000e+00> : vector<128xf32>
      %77 = vector.multi_reduction <add>, %76, %cst_26 [1] : vector<128x32xf32> to vector<128xf32>
      %78 = vector.shape_cast %77 : vector<128xf32> to vector<128x1xf32>
      %79 = arith.mulf %76, %76 : vector<128x32xf32>
      %cst_27 = arith.constant dense<0.000000e+00> : vector<128xf32>
      %80 = vector.multi_reduction <add>, %79, %cst_27 [1] : vector<128x32xf32> to vector<128xf32>
      %81 = vector.shape_cast %80 : vector<128xf32> to vector<128x1xf32>
      %cst_28 = arith.constant 3.125000e-02 : f32
      %82 = vector.broadcast %cst_28 : f32 to vector<128x1xf32>
      %83 = arith.mulf %78, %82 : vector<128x1xf32>
      %cst_29 = arith.constant 3.125000e-02 : f32
      %84 = vector.broadcast %cst_29 : f32 to vector<128x1xf32>
      %85 = arith.mulf %81, %84 : vector<128x1xf32>
      %86 = arith.mulf %83, %83 : vector<128x1xf32>
      %87 = arith.subf %85, %86 : vector<128x1xf32>
      %cst_30 = arith.constant 0.000000e+00 : f32
      %88 = vector.broadcast %cst_30 : f32 to vector<128x1xf32>
      %89 = arith.maximumf %87, %88 : vector<128x1xf32>
      %cst_31 = arith.constant 9.99999974E-6 : f32
      %90 = vector.broadcast %cst_31 : f32 to vector<128x1xf32>
      %91 = arith.addf %89, %90 : vector<128x1xf32>
      %92 = math.rsqrt %91 : vector<128x1xf32>
      %93 = vector.broadcast %83 : vector<128x1xf32> to vector<128x32xf32>
      %94 = arith.subf %76, %93 : vector<128x32xf32>
      %95 = vector.broadcast %92 : vector<128x1xf32> to vector<128x32xf32>
      %96 = vector.broadcast %6 : vector<1x32xf32> to vector<128x32xf32>
      %97 = arith.mulf %95, %96 : vector<128x32xf32>
      %98 = arith.mulf %94, %97 : vector<128x32xf32>
      %99 = vector.broadcast %7 : vector<1x32xf32> to vector<128x32xf32>
      %100 = arith.addf %98, %99 : vector<128x32xf32>
      %cst_32 = arith.constant 0.000000e+00 : f32
      %101 = vector.broadcast %cst_32 : f32 to vector<128x32xf32>
      %102 = arith.maximumf %100, %101 : vector<128x32xf32>
      %c0_33 = arith.constant 0 : index
      %c0_34 = arith.constant 0 : index
      %103 = vector.load %arg11[%c0_33, %c0_34] : memref<96x32xf32, #tpu.memory_space<vmem>>, vector<32x32xf32>
      %cst_35 = arith.constant dense<0.000000e+00> : vector<128x32xf32>
      %104 = tpu.matmul %102, %103, %cst_35 {dimension_numbers = #tpu.dot_dimension_numbers<[1], [0], [0], [1], [0, 0, 1, 1], [], []>} : vector<128x32xf32>, vector<32x32xf32>, vector<128x32xf32> -> vector<128x32xf32>
      %c64 = arith.constant 64 : index
      %c0_36 = arith.constant 0 : index
      %105 = vector.load %arg11[%c64, %c0_36] : memref<96x32xf32, #tpu.memory_space<vmem>>, vector<32x32xf32>
      %cst_37 = arith.constant dense<0.000000e+00> : vector<16x32xf32>
      %106 = tpu.matmul %28, %105, %cst_37 {dimension_numbers = #tpu.dot_dimension_numbers<[1], [0], [0], [1], [0, 0, 1, 1], [], []>} : vector<16x32xf32>, vector<32x32xf32>, vector<16x32xf32> -> vector<16x32xf32>
      %107 = vector.shape_cast %104 : vector<128x32xf32> to vector<8x16x32xf32>
      %c0_38 = arith.constant 0 : index
      %c0_39 = arith.constant 0 : index
      %108 = vector.load %arg17[%c0_38, %c0_39] : memref<8x32xf32, #tpu.memory_space<vmem>>, vector<8x32xf32>
      %109 = vector.shape_cast %108 : vector<8x32xf32> to vector<8x1x32xf32>
      %110 = vector.broadcast %109 : vector<8x1x32xf32> to vector<8x16x32xf32>
      %111 = arith.addf %107, %110 : vector<8x16x32xf32>
      %112 = vector.shape_cast %106 : vector<16x32xf32> to vector<1x16x32xf32>
      %113 = vector.broadcast %112 : vector<1x16x32xf32> to vector<8x16x32xf32>
      %114 = arith.addf %111, %113 : vector<8x16x32xf32>
      %cst_40 = arith.constant dense<0.000000e+00> : vector<8x16xf32>
      %115 = vector.multi_reduction <add>, %114, %cst_40 [2] : vector<8x16x32xf32> to vector<8x16xf32>
      %116 = vector.shape_cast %115 : vector<8x16xf32> to vector<8x16x1xf32>
      %117 = arith.mulf %114, %114 : vector<8x16x32xf32>
      %cst_41 = arith.constant dense<0.000000e+00> : vector<8x16xf32>
      %118 = vector.multi_reduction <add>, %117, %cst_41 [2] : vector<8x16x32xf32> to vector<8x16xf32>
      %119 = vector.shape_cast %118 : vector<8x16xf32> to vector<8x16x1xf32>
      %cst_42 = arith.constant 3.125000e-02 : f32
      %120 = vector.broadcast %cst_42 : f32 to vector<8x16x1xf32>
      %121 = arith.mulf %116, %120 : vector<8x16x1xf32>
      %cst_43 = arith.constant 3.125000e-02 : f32
      %122 = vector.broadcast %cst_43 : f32 to vector<8x16x1xf32>
      %123 = arith.mulf %119, %122 : vector<8x16x1xf32>
      %124 = arith.mulf %121, %121 : vector<8x16x1xf32>
      %125 = arith.subf %123, %124 : vector<8x16x1xf32>
      %cst_44 = arith.constant 0.000000e+00 : f32
      %126 = vector.broadcast %cst_44 : f32 to vector<8x16x1xf32>
      %127 = arith.maximumf %125, %126 : vector<8x16x1xf32>
      %cst_45 = arith.constant 9.99999974E-6 : f32
      %128 = vector.broadcast %cst_45 : f32 to vector<8x16x1xf32>
      %129 = arith.addf %127, %128 : vector<8x16x1xf32>
      %130 = math.rsqrt %129 : vector<8x16x1xf32>
      %131 = vector.broadcast %121 : vector<8x16x1xf32> to vector<8x16x32xf32>
      %132 = arith.subf %114, %131 : vector<8x16x32xf32>
      %133 = vector.shape_cast %10 : vector<1x32xf32> to vector<1x1x32xf32>
      %134 = vector.broadcast %130 : vector<8x16x1xf32> to vector<8x16x32xf32>
      %135 = vector.broadcast %133 : vector<1x1x32xf32> to vector<8x16x32xf32>
      %136 = arith.mulf %134, %135 : vector<8x16x32xf32>
      %137 = arith.mulf %132, %136 : vector<8x16x32xf32>
      %138 = vector.shape_cast %11 : vector<1x32xf32> to vector<1x1x32xf32>
      %139 = vector.broadcast %138 : vector<1x1x32xf32> to vector<8x16x32xf32>
      %140 = arith.addf %137, %139 : vector<8x16x32xf32>
      %cst_46 = arith.constant 0.000000e+00 : f32
      %141 = vector.broadcast %cst_46 : f32 to vector<8x16x32xf32>
      %142 = arith.maximumf %140, %141 : vector<8x16x32xf32>
      %c0_47 = arith.constant 0 : index
      %c0_48 = arith.constant 0 : index
      %143 = vector.load %arg16[%c0_47, %c0_48] : memref<8x32xf32, #tpu.memory_space<vmem>>, vector<8x32xf32>
      %144 = vector.shape_cast %54 : vector<8x16xf32> to vector<8x16x1xf32>
      %145 = vector.broadcast %144 : vector<8x16x1xf32> to vector<8x16x32xf32>
      %146 = arith.mulf %142, %145 : vector<8x16x32xf32>
      %cst_49 = arith.constant dense<0.000000e+00> : vector<8x32xf32>
      %147 = vector.multi_reduction <add>, %146, %cst_49 [1] : vector<8x16x32xf32> to vector<8x32xf32>
      %148 = arith.addf %143, %147 : vector<8x32xf32>
      %c0_50 = arith.constant 0 : index
      %c0_51 = arith.constant 0 : index
      %149 = vector.load %arg16[%c0_50, %c0_51] : memref<8x32xf32, #tpu.memory_space<vmem>>, vector<8x32xf32>
      tpu.vector_store %arg16[%c0_50, %c0_51], %148 {strides = array<i32>} : memref<8x32xf32, #tpu.memory_space<vmem>>, vector<8x32xf32>,
    } else {
    }
    %c1_i32 = arith.constant 1 : i32
    %25 = arith.cmpi eq, %arg1, %c1_i32 : i32
    %26 = arith.extui %25 : i1 to i32
    %c0_i32_12 = arith.constant 0 : i32
    %27 = arith.cmpi ne, %26, %c0_i32_12 : i32
    scf.if %27 {
      %c0_13 = arith.constant 0 : index
      %c0_14 = arith.constant 0 : index
      %28 = vector.load %arg12[%c0_13, %c0_14] : memref<96x32xf32, #tpu.memory_space<vmem>>, vector<32x32xf32>
      %c32 = arith.constant 32 : index
      %c0_15 = arith.constant 0 : index
      %29 = vector.load %arg12[%c32, %c0_15] : memref<96x32xf32, #tpu.memory_space<vmem>>, vector<32x32xf32>
      %c64 = arith.constant 64 : index
      %c0_16 = arith.constant 0 : index
      %30 = vector.load %arg12[%c64, %c0_16] : memref<96x32xf32, #tpu.memory_space<vmem>>, vector<32x32xf32>
      %cst = arith.constant dense<0.000000e+00> : vector<8x32xf32>
      %31 = tpu.matmul %0, %28, %cst {dimension_numbers = #tpu.dot_dimension_numbers<[1], [0], [0], [1], [0, 0, 1, 1], [], []>} : vector<8x32xf32>, vector<32x32xf32>, vector<8x32xf32> -> vector<8x32xf32>
      %c0_17 = arith.constant 0 : index
      %c0_18 = arith.constant 0 : index
      %32 = vector.load %arg16[%c0_17, %c0_18] : memref<8x32xf32, #tpu.memory_space<vmem>>, vector<8x32xf32>
      %cst_19 = arith.constant dense<0.000000e+00> : vector<8x32xf32>
      %33 = tpu.matmul %32, %29, %cst_19 {dimension_numbers = #tpu.dot_dimension_numbers<[1], [0], [0], [1], [0, 0, 1, 1], [], []>} : vector<8x32xf32>, vector<32x32xf32>, vector<8x32xf32> -> vector<8x32xf32>
      %34 = arith.addf %31, %33 : vector<8x32xf32>
      %cst_20 = arith.constant dense<0.000000e+00> : vector<8xf32>
      %35 = vector.multi_reduction <add>, %34, %cst_20 [1] : vector<8x32xf32> to vector<8xf32>
      %36 = vector.shape_cast %35 : vector<8xf32> to vector<8x1xf32>
      %37 = arith.mulf %34, %34 : vector<8x32xf32>
      %cst_21 = arith.constant dense<0.000000e+00> : vector<8xf32>
      %38 = vector.multi_reduction <add>, %37, %cst_21 [1] : vector<8x32xf32> to vector<8xf32>
      %39 = vector.shape_cast %38 : vector<8xf32> to vector<8x1xf32>
      %cst_22 = arith.constant 3.125000e-02 : f32
      %40 = vector.broadcast %cst_22 : f32 to vector<8x1xf32>
      %41 = arith.mulf %36, %40 : vector<8x1xf32>
      %cst_23 = arith.constant 3.125000e-02 : f32
      %42 = vector.broadcast %cst_23 : f32 to vector<8x1xf32>
      %43 = arith.mulf %39, %42 : vector<8x1xf32>
      %44 = arith.mulf %41, %41 : vector<8x1xf32>
      %45 = arith.subf %43, %44 : vector<8x1xf32>
      %cst_24 = arith.constant 0.000000e+00 : f32
      %46 = vector.broadcast %cst_24 : f32 to vector<8x1xf32>
      %47 = arith.maximumf %45, %46 : vector<8x1xf32>
      %cst_25 = arith.constant 9.99999974E-6 : f32
      %48 = vector.broadcast %cst_25 : f32 to vector<8x1xf32>
      %49 = arith.addf %47, %48 : vector<8x1xf32>
      %50 = math.rsqrt %49 : vector<8x1xf32>
      %51 = vector.broadcast %41 : vector<8x1xf32> to vector<8x32xf32>
      %52 = arith.subf %34, %51 : vector<8x32xf32>
      %53 = vector.broadcast %50 : vector<8x1xf32> to vector<8x32xf32>
      %54 = vector.broadcast %12 : vector<1x32xf32> to vector<8x32xf32>
      %55 = arith.mulf %53, %54 : vector<8x32xf32>
      %56 = arith.mulf %52, %55 : vector<8x32xf32>
      %57 = vector.broadcast %13 : vector<1x32xf32> to vector<8x32xf32>
      %58 = arith.addf %56, %57 : vector<8x32xf32>
      %cst_26 = arith.constant 0.000000e+00 : f32
      %59 = vector.broadcast %cst_26 : f32 to vector<8x32xf32>
      %60 = arith.maximumf %58, %59 : vector<8x32xf32>
      %cst_27 = arith.constant dense<0.000000e+00> : vector<8x32xf32>
      %61 = tpu.matmul %60, %30, %cst_27 {dimension_numbers = #tpu.dot_dimension_numbers<[1], [0], [0], [1], [0, 0, 1, 1], [], []>} : vector<8x32xf32>, vector<32x32xf32>, vector<8x32xf32> -> vector<8x32xf32>
      %cst_28 = arith.constant dense<0.000000e+00> : vector<8xf32>
      %62 = vector.multi_reduction <add>, %61, %cst_28 [1] : vector<8x32xf32> to vector<8xf32>
      %63 = vector.shape_cast %62 : vector<8xf32> to vector<8x1xf32>
      %64 = arith.mulf %61, %61 : vector<8x32xf32>
      %cst_29 = arith.constant dense<0.000000e+00> : vector<8xf32>
      %65 = vector.multi_reduction <add>, %64, %cst_29 [1] : vector<8x32xf32> to vector<8xf32>
      %66 = vector.shape_cast %65 : vector<8xf32> to vector<8x1xf32>
      %cst_30 = arith.constant 3.125000e-02 : f32
      %67 = vector.broadcast %cst_30 : f32 to vector<8x1xf32>
      %68 = arith.mulf %63, %67 : vector<8x1xf32>
      %cst_31 = arith.constant 3.125000e-02 : f32
      %69 = vector.broadcast %cst_31 : f32 to vector<8x1xf32>
      %70 = arith.mulf %66, %69 : vector<8x1xf32>
      %71 = arith.mulf %68, %68 : vector<8x1xf32>
      %72 = arith.subf %70, %71 : vector<8x1xf32>
      %cst_32 = arith.constant 0.000000e+00 : f32
      %73 = vector.broadcast %cst_32 : f32 to vector<8x1xf32>
      %74 = arith.maximumf %72, %73 : vector<8x1xf32>
      %cst_33 = arith.constant 9.99999974E-6 : f32
      %75 = vector.broadcast %cst_33 : f32 to vector<8x1xf32>
      %76 = arith.addf %74, %75 : vector<8x1xf32>
      %77 = math.rsqrt %76 : vector<8x1xf32>
      %78 = vector.broadcast %68 : vector<8x1xf32> to vector<8x32xf32>
      %79 = arith.subf %61, %78 : vector<8x32xf32>
      %80 = vector.broadcast %77 : vector<8x1xf32> to vector<8x32xf32>
      %81 = vector.broadcast %14 : vector<1x32xf32> to vector<8x32xf32>
      %82 = arith.mulf %80, %81 : vector<8x32xf32>
      %83 = arith.mulf %79, %82 : vector<8x32xf32>
      %84 = vector.broadcast %15 : vector<1x32xf32> to vector<8x32xf32>
      %85 = arith.addf %83, %84 : vector<8x32xf32>
      %86 = arith.addf %85, %0 : vector<8x32xf32>
      %cst_34 = arith.constant 0.000000e+00 : f32
      %87 = vector.broadcast %cst_34 : f32 to vector<8x32xf32>
      %88 = arith.maximumf %86, %87 : vector<8x32xf32>
      %c0_35 = arith.constant 0 : index
      %c0_36 = arith.constant 0 : index
      %89 = vector.load %arg15[%c0_35, %c0_36] : memref<8x32xf32, #tpu.memory_space<vmem>>, vector<8x32xf32>
      tpu.vector_store %arg15[%c0_35, %c0_36], %88 {strides = array<i32>} : memref<8x32xf32, #tpu.memory_space<vmem>>, vector<8x32xf32>,
    } else {
    }
    return
  }
  func.func @transform_0(%arg0: i32, %arg1: i32, %arg2: memref<2x2xi32, #tpu.memory_space<smem>>) -> (i32, i32) {
    %c0_i32 = arith.constant 0 : i32
    %c0_i32_0 = arith.constant 0 : i32
    return %arg0, %c0_i32 : i32, i32
  }
  func.func @transform_1(%arg0: i32, %arg1: i32, %arg2: memref<2x2xi32, #tpu.memory_space<smem>>) -> (i32, i32) {
    %c0_i32 = arith.constant 0 : i32
    %c0_i32_0 = arith.constant 0 : i32
    return %arg0, %c0_i32 : i32, i32
  }
  func.func @transform_2(%arg0: i32, %arg1: i32, %arg2: memref<2x2xi32, #tpu.memory_space<smem>>) -> (i32, i32) {
    %c0_i32 = arith.constant 0 : i32
    %c0_i32_0 = arith.constant 0 : i32
    return %arg1, %c0_i32 : i32, i32
  }
  func.func @transform_3(%arg0: i32, %arg1: i32, %arg2: memref<2x2xi32, #tpu.memory_space<smem>>) -> (i32, i32) {
    %c0_i32 = arith.constant 0 : i32
    %c0_i32_0 = arith.constant 0 : i32
    return %arg1, %c0_i32 : i32, i32
  }
  func.func @transform_4(%arg0: i32, %arg1: i32, %arg2: memref<2x2xi32, #tpu.memory_space<smem>>) -> (i32, i32, i32) {
    %c0_i32 = arith.constant 0 : i32
    %c0_i32_0 = arith.constant 0 : i32
    %c0_i32_1 = arith.constant 0 : i32
    return %arg1, %c0_i32, %c0_i32_0 : i32, i32, i32
  }
  func.func @transform_5(%arg0: i32, %arg1: i32, %arg2: memref<2x2xi32, #tpu.memory_space<smem>>) -> (i32, i32) {
    %c0_i32 = arith.constant 0 : i32
    %c0_i32_0 = arith.constant 0 : i32
    %c0_i32_1 = arith.constant 0 : i32
    return %c0_i32, %c0_i32_0 : i32, i32
  }
  func.func @transform_6(%arg0: i32, %arg1: i32, %arg2: memref<2x2xi32, #tpu.memory_space<smem>>) -> (i32, i32) {
    %c0_i32 = arith.constant 0 : i32
    %c0_i32_0 = arith.constant 0 : i32
    %c0_i32_1 = arith.constant 0 : i32
    return %c0_i32, %c0_i32_0 : i32, i32
  }
  func.func @transform_7(%arg0: i32, %arg1: i32, %arg2: memref<2x2xi32, #tpu.memory_space<smem>>) -> (i32, i32) {
    %c0_i32 = arith.constant 0 : i32
    %c0_i32_0 = arith.constant 0 : i32
    %c0_i32_1 = arith.constant 0 : i32
    return %c0_i32, %c0_i32_0 : i32, i32
  }
  func.func @transform_8(%arg0: i32, %arg1: i32, %arg2: memref<2x2xi32, #tpu.memory_space<smem>>) -> (i32, i32) {
    %c0_i32 = arith.constant 0 : i32
    %c0_i32_0 = arith.constant 0 : i32
    %c0_i32_1 = arith.constant 0 : i32
    return %c0_i32, %c0_i32_0 : i32, i32
  }
  func.func @transform_9(%arg0: i32, %arg1: i32, %arg2: memref<2x2xi32, #tpu.memory_space<smem>>) -> (i32, i32) {
    %c0_i32 = arith.constant 0 : i32
    %c0_i32_0 = arith.constant 0 : i32
    %c0_i32_1 = arith.constant 0 : i32
    return %c0_i32, %c0_i32_0 : i32, i32
  }
  func.func @transform_10(%arg0: i32, %arg1: i32, %arg2: memref<2x2xi32, #tpu.memory_space<smem>>) -> (i32, i32) {
    %c0_i32 = arith.constant 0 : i32
    %c0_i32_0 = arith.constant 0 : i32
    %c0_i32_1 = arith.constant 0 : i32
    return %c0_i32, %c0_i32_0 : i32, i32
  }
  func.func @transform_11(%arg0: i32, %arg1: i32, %arg2: memref<2x2xi32, #tpu.memory_space<smem>>) -> (i32, i32) {
    %c0_i32 = arith.constant 0 : i32
    %c0_i32_0 = arith.constant 0 : i32
    %c0_i32_1 = arith.constant 0 : i32
    return %c0_i32, %c0_i32_0 : i32, i32
  }
  func.func @transform_12(%arg0: i32, %arg1: i32, %arg2: memref<2x2xi32, #tpu.memory_space<smem>>) -> (i32, i32) {
    %c0_i32 = arith.constant 0 : i32
    %c0_i32_0 = arith.constant 0 : i32
    return %arg0, %c0_i32 : i32, i32
  }
}

</mosaic_0001>

<bundles_post_ra>
// kernel: tpu_custom_call.1
= control target key start
LH: loop header
LB: loop body
LE: loop exit
PB: predicated region body
PF: predicated region fallthrough
CT: control target
= control target key end

     0   :  { %s2854_s28 = smov [#allocation6]   ;;  %s4237_s0 = inlined_call_operand.vmem [shape: s32[2,2], index: 0, kind: input, shape index: {}]   ;;  %s4238_s1 = inlined_call_operand.vmem [shape: f32[16,32], index: 1, kind: input, shape index: {}]   ;;  %s4239_s2 = inlined_call_operand.vmem [shape: f32[16,3], index: 2, kind: input, shape index: {}]   ;;  %s4240_s3 = inlined_call_operand.vmem [shape: f32[32,32], index: 3, kind: input, shape index: {}]   ;;  %s4241_s4 = inlined_call_operand.vmem [shape: f32[32,3], index: 4, kind: input, shape index: {}]   ;;  %s4242_s5 = inlined_call_operand.vmem [shape: f32[2,3,16], index: 5, kind: input, shape index: {}]   ;;  %s4243_s6 = inlined_call_operand.vmem [shape: f32[2,32], index: 6, kind: input, shape index: {}]   ;;  %s4244_s7 = inlined_call_operand.vmem [shape: f32[32,32], index: 7, kind: input, shape index: {}]   ;;  %s4245_s8 = inlined_call_operand.vmem [shape: f32[32,32], index: 8, kind: input, shape index: {}]   ;;  %s4246_s9 = inlined_call_operand.vmem [shape: f32[96,32], index: 9, kind: input, shape index: {}]   ;;  %s4247_s10 = inlined_call_operand.vmem [shape: f32[96,32], index: 10, kind: input, shape index: {}]   ;;  %s4248_s11 = inlined_call_operand.vmem [shape: f32[5,32], index: 11, kind: input, shape index: {}]   ;;  %s4249_s12 = inlined_call_operand.vmem [shape: f32[6,32], index: 12, kind: input, shape index: {}]   ;;  %s4250_s13 = inlined_call_operand.hbm [shape: f32[16,32], index: 13, kind: output, shape index: {}]  }
   0x1   :  { %4258 = sst [smem:[#allocation19_spill]] %s4238_s1  ;;  %s19_s27 = sshll.u32 %s4237_s0, 4  ;;  %s20_s27 = int_to_ptr.vmem [resolvable:$true] %s19_s27 }
   0x2   :  { %4259 = sst [smem:[#allocation20_spill]] %s4243_s6 }
   0x3   :  { %4260 = sst [smem:[#allocation21_spill]] %s4248_s11 }
   0x4   :  { %4261 = sst [smem:[#allocation22_spill]] %s4249_s12 }
   0x5   :  { %22 = dma.vmem_to_smem %s20_s27, 32, %s2854_s28, [#allocation5] }
   0x6   :  { %2816 = dma.done.wait [#allocation5], 32 }
   0x7   :  { %2817 = vsyncadd [#allocation5], 4294967264 }
   0x8   :  { %25 = sfence }
   0x9   :  { %26 = vsyncpa [#allocation8], 0 }
   0xa   :  { %28 = vsyncpa [#allocation8 + $0x1], 0  ;;  %s2935_s29 = smov 0   ;;  %s2937_s30 = smov 0  }
   0xb   :  { %s2939_s14 = smov 0   ;;  %s2941_s15 = smov 0  }
   0xc   :  { %s2943_s16 = smov 0   ;;  %s2945_s17 = smov 0  }
   0xd   :  { %s2947_s0 = smov 0   ;;  %s2949_s18 = smov 0  }
   0xe LB: > { %4262 = sst [smem:[#allocation11_spill]] %s2824_s29  ;;  %s2473_s19 = sadd.s32 4294967295, %s2852_s18   ;;  %s2852_s18 = sphi %s2949_s18, %s34_s18   ;;  %s2848_s0 = sphi %s2947_s0, %s4307_s0   ;;  %s2844_s17 = sphi %s2945_s17, %s4306_s17   ;;  %s2840_s16 = sphi %s2943_s16, %s4305_s16   ;;  %s2836_s15 = sphi %s2941_s15, %s4310_s15   ;;  %s2832_s14 = sphi %s2939_s14, %s4303_s14   ;;  %s2828_s30 = sphi %s2937_s30, %s4309_s30   ;;  %s2824_s29 = sphi %s2935_s29, %s4308_s29  }
   0xf   : > { %4263 = sst [smem:[#allocation12_spill]] %s2832_s14  ;;  %s2474_s20 = sadd.s32 4294967294, %s2852_s18  }
  0x10   : > { %4264 = sst [smem:[#allocation13_spill]] %s2844_s17  ;;  %s43_s21 = sadd.s32 1, %s2844_s17 }
  0x11   : > { %4265 = sst [smem:[#allocation14_spill]] %s2848_s0  ;;  %p44_p0 = scmp.ge.s32.totalorder %s43_s21, 2 }
  0x12   : > { %s46_s22 = sadd.s32 1, %s2848_s0  ;;  %p340_p1 = scmp.ne.s32.totalorder %s2832_s14, %s2828_s30 }
  0x13   : > { %p341_p2 = scmp.eq.s32.totalorder %s2473_s19, 3  ;;  %s4312_s21 = smov (%p44_p0, %s43_s21), 0 }
  0x14   : > { %4266 = sst [smem:[#allocation15_spill]] %s4312_s21  ;;  %s4314_s22 = smov (!%p44_p0, %s46_s22), %s2848_s0 }
  0x15   : > { %p2984_p3 = por %p341_p2, %p340_p1  ;;  %p346_p4 = scmp.ne.s32.totalorder %s2828_s30, %s2824_s29 }
  0x16   : > { %p48_p5 = scmp.ge.s32.totalorder %s4314_s22, 2  ;;  %p347_p6 = scmp.eq.s32.totalorder %s2474_s20, 3 }
  0x17   : > { %p2477_p7 = scmp.ge.s32.totalorder %s2852_s18, 1  ;;  %p425_p8 = scmp.lt.s32.totalorder %s2852_s18, 5 }
  0x18   : > { %s4316_s22 = smov (%p48_p5, %s4314_s22), 0  ;;  %p2994_p9 = por %p347_p6, %p346_p4 }
  0x19   : > { %4268 = sst [smem:[#allocation16_spill]] %s4316_s22  ;;  %p426_p10 = pnand %p2477_p7, %p425_p8 }
  0x1a   : > { %s4269_s24 = scalar_select %p2994_p9, 1, 0 }
  0x1b   : > { %s327_s25 = ssub.s32 %s2848_s0, %s4316_s22  ;;  %s330_s26 = sadd.s32 1, %s2832_s14 }
  0x1c   : > { %4270 = sst [smem:[#allocation17_spill]] %s4269_s24  ;;  %p328_p11 = scmp.eq.s32.totalorder %s327_s25, 0 }
  0x1d   : > { %429 = sbr.rel (%p426_p10) target bundleno = 2074 (0x81a), region = 68  ;;  %s4254_s28 = sand.u32 (!%p426_p10), 1, %s2828_s30  }
  0x1e   : > { %s3002_s27 = scalar_select %p328_p11, %s2832_s14, %s330_s26  }
  0x1f   : > { %p484_p12 = scmp.lt.s32.totalorder (!%p426_p10), %s2840_s16, 1  ;;  %s4272_s6 = sld [smem:[#allocation20_spill]] (!%p426_p10) }
  0x20   : > { %4271 = sst [smem:[#allocation18_spill]] %s3002_s27  ;;  %s3018_s25 = sshll.u32 (!%p426_p10), %s4254_s28, 3 }
  0x21   : > { %s4273_s11 = sld [smem:[#allocation21_spill]] (!%p426_p10)  ;;  %s2481_s26 = sshll.u32 (!%p426_p10), %s2836_s15, 1 }
  0x22   : > { %s4274_s12 = sld [smem:[#allocation22_spill]]  ;;  %p493_p13 = scmp.lt.s32.totalorder %s2481_s26, 3 }
  0x23   : > { %s485_s19 = scalar_select %p484_p12, %s2840_s16, 1 }
  0x24   : > { %s4318_s26 = smov (!%p493_p13, %s2481_s26), 3  ;;  %p504_p0 = scmp.lt.s32.totalorder %s2836_s15, 1 }
  0x25   : > { %v3009_v0 = vld [vmem:[%s4272_s6] sm:$0x3]  ;;  %s2479_s20 = sshll.u32 %s485_s19, 3  ;;  %s4275_s1 = sld [smem:[#allocation19_spill]] }
  0x26   : > { %s491_s28 = scalar_lea.vmem %s4239_s2, %s2479_s20  ;;  %s2482_s14 = sshll.u32 %s4318_s26, 3 }
  0x27   : > { %v3014_v1 = vld [vmem:[%s4273_s11] sm:$0x1f]  ;;  %s3046_s29 = scalar_lea.vmem %s4241_s4, %s2482_s14  ;;  %s483_s26 = scalar_lea.vmem [#allocation7], %s3018_s25 }
  0x28   : > { %v3024_v2 = vld [vmem:[%s4274_s12] sm:$0x3f]  ;;  %s3041_s12 = scalar_lea.vmem %s4240_s3, %s2482_s14  ;;  %p2486_p1 = scmp.ne.s32.totalorder %s2836_s15, 0 }
  0x29   : > { %v3036_v4 = vld [vmem:[%s491_s28] sm:$0xff]  ;;  %s505_s6 = scalar_select %p504_p0, %s2836_s15, 1 }
  0x2a   : > { %516 = sbr.rel (%p2486_p1) target bundleno = 467 (0x1d3), region = 72 }
  0x2b   : > { %s487_s22 = scalar_lea.vmem %s4275_s1, %s2479_s20  ;;  %s2485_s21 = sshll.u32 %s505_s6, 2 }
  0x2c   : > { %v3034_v3 = vld [vmem:[%s487_s22] sm:$0xff]  ;;  %s3052_s27 = scalar_lea.vmem %s4242_s5, %s2485_s21 }
  0x2f   : > { %v522_v5 = vld [vmem:[%s4245_s8 + $0x18] sm:$0xff]  ;;  %v521_v6 = vld [vmem:[%s4245_s8 + $0x10] sm:$0xff]  ;;  %vm517_vm0 = vcmask 261120   ;;  %v2855_v7 = vmov 0.0   ;;  %v520_v8 = vld [vmem:[%s4245_s8 + $0x8] sm:$0xff]  ;;  %v2856_v14 = vmov 0  }
  0x30   : > { %538 = vmatpush.msra.mxu0 %v522_v5  ;;  %518 = vst.msk [vmem:[#allocation2] sm:$0xff] %vm517_vm0, %v2855_v7  ;;  %v519_v9 = vld [vmem:[%s4245_s8] sm:$0xff]  ;;  %2621 = vset.pattern.permute.xlu1 %v2856_v14  ;;  %v579_v16 = vld [vmem:[%s4246_s9 + $0x38] sm:$0xff]  ;;  %v578_v17 = vld [vmem:[%s4246_s9 + $0x30] sm:$0xff]  ;;  %v2857_v18 = vmov 1   ;;  %v570_v33 = vperm.slane %v3014_v1, 3 }
  0x31   : > { %606 = vperm.xlu1 %2621, %v3036_v4   ;;  %595 = vmatpush.msra.mxu1 %v579_v16  ;;  %v577_v19 = vld [vmem:[%s4246_s9 + $0x28] sm:$0xff]  ;;  %v576_v20 = vld [vmem:[%s4246_s9 + $0x20] sm:$0xff]  ;;  %v573_v38 = vperm.slane %v3014_v1, 4  ;;  %v609_v43 = vperm.slane %v3009_v0, 0  ;;  %v615_v44 = vperm.slane %v3009_v0, 1  ;;  %v618_v47 = vperm.slane %v3014_v1, 0 }
  0x32   : > { %539 = vmatpush.msra.mxu0 %v521_v6  ;;  %2623 = vset.pattern.permute.xlu0 %v2857_v18 }
  0x33   : > { %596 = vmatpush.msra.mxu1 %v578_v17 }
  0x34   : > { %540 = vmatpush.msra.mxu0 %v520_v8 }
  0x35   : > { %597 = vmatpush.msra.mxu1 %v577_v19 }
  0x36   : > { %541 = vmatpush.msra.mxu0 %v519_v9 }
  0x37   : > { %2487 = vmatmul.msk.f32.vlgmr.msra.gmra.mxu0 %vm517_vm0, %v3034_v3  ;;  %598 = vmatpush.msra.mxu1 %v576_v20 }
  0x39   : > { %2622 = vset.pattern.permute.xlu1 %v2857_v18 }
  0x3a   : > { %612 = vperm.xlu1 %2622, %v3036_v4  }
  0xa3   : > { %v607_v42 = vpop.permute.xlu1 %606 }
  0xa4   : > { %v610_v45 = vmul.f32 %v609_v43, %v607_v42 }
  0xac   : > { %v613_v46 = vpop.permute.xlu1 %612 }
  0xad   : > { %v616_v48 = vmul.f32 %v615_v44, %v613_v46 }
  0xaf   : > { %v617_v49 = vadd.f32 %v616_v48, %v610_v45 }
  0xb1   : > { %v619_v50 = vadd.f32 %v618_v47, %v617_v49 }
  0xb3   : > { %620 = vst.msk [vmem:[#allocation4] sm:$0xff] %vm517_vm0, %v619_v50 }
  0xb4   : > { %v543_v10 = vpop.f32.mrf.mxu0 }
  0xb5   : > { %v546_v11 = vsel %vm517_vm0, %v543_v10, 0.0  ;;  %v549_v12 = vmul.f32 %v543_v10, %v543_v10 }
  0xb6   : > { %547 = vadd.xlane.f32.xlu0 %v546_v11 }
  0xb7   : > { %v550_v13 = vsel %vm517_vm0, %v549_v12, 0.0 }
  0xbe   : > { %551 = vadd.xlane.f32.xlu0 %v550_v13 }
 0x129   : > { %v548_v15 = vpop.xlane.xlu0 %547 }
 0x12a   : > { %v553_v21 = vmul.f32 0.03125, %v548_v15 }
 0x12c   : > { %v555_v23 = vmul.f32 %v553_v21, %v553_v21  ;;  %v569_v36 = vsub.f32 %v543_v10, %v553_v21 }
 0x131   : > { %v552_v22 = vpop.xlane.xlu0 %551 }
 0x132   : > { %v554_v24 = vmul.f32 0.03125, %v552_v22 }
 0x134   : > { %v556_v25 = vsub.f32 %v554_v24, %v555_v23 }
 0x136   : > { %v557_v26 = vmax.f32 %v556_v25, 0.0 }
 0x138   : > { %v558_v27 = vadd.f32 1e-05, %v557_v26 }
 0x13a   : > { %2624 = vrsqrt.f32 %v558_v27  ;;  %vm565_vm2 = vweird.f32 %v558_v27 }
 0x140   : > { %v2625_v28 = vpop.eup %2624 }
 0x141   : > { %v560_v29 = vmul.f32 %v2625_v28, %v558_v27  ;;  %vm566_vm1 = vweird.f32 %v2625_v28 }
 0x142   : > { %vm567_vm3 = vmor %vm565_vm2, %vm566_vm1 }
 0x143   : > { %v561_v30 = vmul.f32 %v2625_v28, %v560_v29 }
 0x145   : > { %v562_v31 = vmul.f32 0.5, %v561_v30 }
 0x147   : > { %v563_v32 = vsub.f32 1.5, %v562_v31 }
 0x149   : > { %v564_v34 = vmul.f32 %v2625_v28, %v563_v32 }
 0x14b   : > { %v568_v35 = vsel %vm567_vm3, %v2625_v28, %v564_v34 }
 0x14c   : > { %v571_v37 = vmul.f32 %v570_v33, %v568_v35 }
 0x14e   : > { %v572_v39 = vmul.f32 %v571_v37, %v569_v36 }
 0x150   : > { %v574_v40 = vadd.f32 %v573_v38, %v572_v39 }
 0x152   : > { %v575_v41 = vmax.f32 %v574_v40, 0.0 }
 0x154   : > { %2488 = vmatmul.msk.f32.vlgmr.msra.gmra.mxu1 %vm517_vm0, %v575_v41 }
 0x1d1   : > { %v600_v51 = vpop.f32.mrf.mxu1 }
 0x1d2   : > { %603 = vst.msk [vmem:[#allocation3] sm:$0xff] %vm517_vm0, %v600_v51 }
 0x1d3 PF: > { %s621_s1 = sshra.s32 %s2836_s15, 7  ;;  %s626_s14 = sand.u32 127, %s2836_s15 }
 0x1d4   : > { %s623_s24 = sadd.s32 %s2840_s16, %s621_s1 }
 0x1d5   : > { %s2489_s0 = sshll.u32 %s623_s24, 7 }
 0x1d6   : > { %s627_s19 = sadd.s32 %s2489_s0, %s626_s14 }
 0x1d7   : > { %s628_s6 = sld [smem:[#allocation6 + %s627_s19]] }
 0x1dd   : > { %p2490_p2 = scmp.le.s32.totalorder %s628_s6, 0 }
 0x1df   : > { %632 = sbr.rel (%p2490_p2) target bundleno = 1462 (0x5b6), region = 76 }
 0x1e4   : > { %v636_v52 = vld [vmem:[%s3046_s29 + $0x8] sm:$0xff]  ;;  %v635_v53 = vld [vmem:[%s3046_s29] sm:$0xff]  ;;  %v2858_v54 = vmov 0   ;;  %v2859_v55 = vmov 1   ;;  %v750_v56 = vld [vmem:[%s4244_s7 + $0x18] sm:$0xff]  ;;  %v674_v5 = vperm.slane %v3009_v0, 0 }
 0x1e5   : > { %2628 = vset.pattern.permute.xlu1 %v2858_v54  ;;  %2626 = vset.pattern.permute.xlu0 %v2858_v54  ;;  %v749_v57 = vld [vmem:[%s4244_s7 + $0x10] sm:$0xff]  ;;  %v748_v58 = vld [vmem:[%s4244_s7 + $0x8] sm:$0xff]  ;;  %v747_v59 = vld [vmem:[%s4244_s7] sm:$0xff]  ;;  %v685_v6 = vperm.slane %v3009_v0, 1  ;;  %vm751_vm4 = vcmask 261120  }
 0x1e6   : > { %671 = vperm.xlu0 %2626, %v636_v52   ;;  %666 = vperm.xlu1 %2628, %v635_v53   ;;  %v690_v62 = vld [vmem:[#allocation4] sm:$0xff] }
 0x1e7   : > { %2630 = vset.pattern.permute.xlu2 %v2858_v54  ;;  %812 = vmatpush.msra.mxu0 %v750_v56  ;;  %v695_v63 = vrot.slane %v690_v62, 4  ;;  %v699_v9 = vperm.slane %v690_v62, 0  ;;  %v696_v17 = vrot.slane %v690_v62, 5  ;;  %v692_v24 = vrot.slane %v690_v62, 1 }
 0x1e8   : > { %2534 = vmatpush.msra.mxu3 %v750_v56  ;;  %v697_v31 = vrot.slane %v690_v62, 6  ;;  %v693_v37 = vrot.slane %v690_v62, 2  ;;  %v698_v43 = vrot.slane %v690_v62, 7  ;;  %v694_v49 = vrot.slane %v690_v62, 3 }
 0x1e9   : > { %813 = vmatpush.msra.mxu0 %v749_v57  ;;  %v3114_v10 = vperm.slane %v695_v63, 0  ;;  %v704_v22 = vperm.slane %v696_v17, 0  ;;  %v700_v28 = vperm.slane %v692_v24, 0 }
 0x1ea   : > { %2535 = vmatpush.msra.mxu3 %v749_v57  ;;  %v705_v34 = vperm.slane %v697_v31, 0  ;;  %v701_v40 = vperm.slane %v693_v37, 0  ;;  %v706_v46 = vperm.slane %v698_v43, 0 }
 0x1eb   : > { %814 = vmatpush.msra.mxu0 %v748_v58 }
 0x1ec   : > { %2536 = vmatpush.msra.mxu3 %v748_v58 }
 0x1ed   : > { %815 = vmatpush.msra.mxu0 %v747_v59 }
 0x1ee   : > { %2627 = vset.pattern.permute.xlu0 %v2859_v55  ;;  %2629 = vset.pattern.permute.xlu1 %v2859_v55 }
 0x1ef   : > { %682 = vperm.xlu0 %2627, %v636_v52   ;;  %678 = vperm.xlu1 %2629, %v635_v53   ;;  %v702_v52 = vperm.slane %v694_v49, 0 }
 0x1f0   : > { %2537 = vmatpush.msra.mxu3 %v747_v59 }
 0x258   : > { %v667_v60 = vpop.permute.xlu1 %666  ;;  %v672_v61 = vpop.permute.xlu0 %671 }
 0x259   : > { %v675_v11 = vmul.f32 %v674_v5, %v667_v60  ;;  %v676_v12 = vmul.f32 %v674_v5, %v672_v61 }
 0x261   : > { %v683_v7 = vpop.permute.xlu0 %682  ;;  %v679_v8 = vpop.permute.xlu1 %678 }
 0x262   : > { %v687_v13 = vmul.f32 %v685_v6, %v683_v7  ;;  %v686_v14 = vmul.f32 %v685_v6, %v679_v8 }
 0x264   : > { %v689_v15 = vadd.f32 %v687_v13, %v676_v12  ;;  %v688_v16 = vadd.f32 %v686_v14, %v675_v11 }
 0x266   : > { %v715_v18 = vsub.f32 %v699_v9, %v688_v16  ;;  %v724_v19 = vsub.f32 %v3114_v10, %v689_v15  ;;  %v716_v0 = vsub.f32 %v699_v9, %v689_v15  ;;  %v725_v23 = vsub.f32 %v704_v22, %v688_v16 }
 0x267   : > { %v723_v25 = vsub.f32 %v3114_v10, %v688_v16  ;;  %v717_v29 = vsub.f32 %v700_v28, %v688_v16  ;;  %v726_v30 = vsub.f32 %v704_v22, %v689_v15  ;;  %v718_v35 = vsub.f32 %v700_v28, %v689_v15 }
 0x268   : > { %v731_v20 = vmax.f32 %v715_v18, 0.0  ;;  %v740_v21 = vmax.f32 %v724_v19, 0.0  ;;  %v732_v26 = vmax.f32 %v716_v0, 0.0  ;;  %v741_v27 = vmax.f32 %v725_v23, 0.0 }
 0x269   : > { %v733_v32 = vmax.f32 %v717_v29, 0.0  ;;  %v742_v33 = vmax.f32 %v726_v30, 0.0  ;;  %v727_v36 = vsub.f32 %v705_v34, %v688_v16  ;;  %v734_v38 = vmax.f32 %v718_v35, 0.0 }
 0x26a   : > { %2492 = vmatmul.msk.f32.vlgmr.msra.gmra.mxu0 %vm751_vm4, %v731_v20  ;;  %2501 = vmatmul.msk.f32.vlgmr.msra.gmra.mxu3 %vm751_vm4, %v740_v21  ;;  %v719_v41 = vsub.f32 %v701_v40, %v688_v16  ;;  %v728_v42 = vsub.f32 %v705_v34, %v689_v15  ;;  %v720_v47 = vsub.f32 %v701_v40, %v689_v15  ;;  %v739_v59 = vmax.f32 %v723_v25, 0.0 }
 0x26b   : > { %v743_v39 = vmax.f32 %v727_v36, 0.0  ;;  %v729_v48 = vsub.f32 %v706_v46, %v688_v16  ;;  %v721_v53 = vsub.f32 %v702_v52, %v688_v16  ;;  %v730_v54 = vsub.f32 %v706_v46, %v689_v15 }
 0x26c   : > { %v735_v44 = vmax.f32 %v719_v41, 0.0  ;;  %v744_v45 = vmax.f32 %v728_v42, 0.0  ;;  %v736_v50 = vmax.f32 %v720_v47, 0.0  ;;  %v722_v57 = vsub.f32 %v702_v52, %v689_v15 }
 0x26d   : > { %v745_v51 = vmax.f32 %v729_v48, 0.0  ;;  %v737_v55 = vmax.f32 %v721_v53, 0.0  ;;  %v746_v56 = vmax.f32 %v730_v54, 0.0  ;;  %v2860_v41 = vmov 2  }
 0x26e   : > { %v738_v58 = vmax.f32 %v722_v57, 0.0  ;;  %2631 = vset.pattern.permute.xlu1 %v2860_v41 }
 0x272   : > { %2493 = vmatmul.msk.f32.gmra.mxu0 %vm751_vm4, %v732_v26  ;;  %2502 = vmatmul.msk.f32.gmra.mxu3 %vm751_vm4, %v741_v27 }
 0x27a   : > { %2494 = vmatmul.msk.f32.gmra.mxu0 %vm751_vm4, %v733_v32  ;;  %2503 = vmatmul.msk.f32.gmra.mxu3 %vm751_vm4, %v742_v33 }
 0x282   : > { %2495 = vmatmul.msk.f32.gmra.mxu0 %vm751_vm4, %v734_v38  ;;  %2504 = vmatmul.msk.f32.gmra.mxu3 %vm751_vm4, %v743_v39 }
 0x28a   : > { %2496 = vmatmul.msk.f32.gmra.mxu0 %vm751_vm4, %v735_v44  ;;  %2505 = vmatmul.msk.f32.gmra.mxu3 %vm751_vm4, %v744_v45 }
 0x292   : > { %2497 = vmatmul.msk.f32.gmra.mxu0 %vm751_vm4, %v736_v50  ;;  %2506 = vmatmul.msk.f32.gmra.mxu3 %vm751_vm4, %v745_v51 }
 0x29a   : > { %2498 = vmatmul.msk.f32.gmra.mxu0 %vm751_vm4, %v737_v55  ;;  %2507 = vmatmul.msk.f32.gmra.mxu3 %vm751_vm4, %v746_v56 }
 0x2a2   : > { %2499 = vmatmul.msk.f32.gmra.mxu0 %vm751_vm4, %v738_v58 }
 0x2aa   : > { %2500 = vmatmul.msk.f32.gmra.mxu0 %vm751_vm4, %v739_v59 }
 0x2e7   : > { %v3134_v60 = vpop.f32.mrf.mxu0 }
 0x2e8   : > { %v865_v61 = vsel %vm751_vm4, %v3134_v60, 0.0  ;;  %v913_v62 = vmul.f32 %v3134_v60, %v3134_v60 }
 0x2e9   : > { %866 = vadd.xlane.f32.xlu1 %v865_v61 }
 0x2ea   : > { %v929_v63 = vsel %vm751_vm4, %v913_v62, 0.0 }
 0x2eb   : > { %930 = vadd.xlane.f32.xlu0 %v929_v63 }
 0x2ed   : > { %v3141_v5 = vpop.f32.mrf.mxu3 }
 0x2ee   : > { %v892_v6 = vsel %vm751_vm4, %v3141_v5, 0.0  ;;  %v922_v8 = vmul.f32 %v3141_v5, %v3141_v5 }
 0x2ef   : > { %893 = vadd.xlane.f32.xlu2 %v892_v6  ;;  %v3145_v7 = vpop.f32.mrf.mxu0 }
 0x2f0   : > { %v956_v10 = vsel %vm751_vm4, %v922_v8, 0.0  ;;  %v868_v16 = vsel %vm751_vm4, %v3145_v7, 0.0  ;;  %v914_v20 = vmul.f32 %v3145_v7, %v3145_v7 }
 0x2f2   : > { %v932_v22 = vsel %vm751_vm4, %v914_v20, 0.0 }
 0x2f5   : > { %v3149_v9 = vpop.f32.mrf.mxu3 }
 0x2f6   : > { %v895_v26 = vsel %vm751_vm4, %v3149_v9, 0.0  ;;  %v923_v30 = vmul.f32 %v3149_v9, %v3149_v9 }
 0x2f7   : > { %957 = vadd.xlane.f32.xlu2 %v956_v10  ;;  %v3152_v11 = vpop.f32.mrf.mxu0 }
 0x2f8   : > { %v871_v12 = vsel %vm751_vm4, %v3152_v11, 0.0  ;;  %v915_v13 = vmul.f32 %v3152_v11, %v3152_v11  ;;  %v959_v32 = vsel %vm751_vm4, %v923_v30, 0.0 }
 0x2f9   : > { %872 = vadd.xlane.f32.xlu1 %v871_v12 }
 0x2fa   : > { %v935_v14 = vsel %vm751_vm4, %v915_v13, 0.0 }
 0x2fb   : > { %936 = vadd.xlane.f32.xlu0 %v935_v14  ;;  %v1318_v14 = vld [vmem:[%s4246_s9 + $0x18] sm:$0xff] }
 0x2fc   : > { %1379 = vmatpush.msra.mxu1 %v1318_v14  ;;  %2538 = vmatpush.msra.mxu2 %v1318_v14 }
 0x2fd   : > { %v3159_v15 = vpop.f32.mrf.mxu3 }
 0x2fe   : > { %v898_v39 = vsel %vm751_vm4, %v3159_v15, 0.0  ;;  %v924_v43 = vmul.f32 %v3159_v15, %v3159_v15 }
 0x2ff   : > { %869 = vadd.xlane.f32.xlu2 %v868_v16  ;;  %v3163_v17 = vpop.f32.mrf.mxu0 }
 0x300   : > { %v916_v18 = vmul.f32 %v3163_v17, %v3163_v17  ;;  %v962_v45 = vsel %vm751_vm4, %v924_v43, 0.0  ;;  %v874_v50 = vsel %vm751_vm4, %v3163_v17, 0.0 }
 0x302   : > { %v938_v19 = vsel %vm751_vm4, %v916_v18, 0.0  ;;  %v1317_v18 = vld [vmem:[%s4246_s9 + $0x10] sm:$0xff] }
 0x303   : > { %939 = vadd.xlane.f32.xlu1 %v938_v19  ;;  %1380 = vmatpush.msra.mxu1 %v1317_v18 }
 0x304   : > { %2539 = vmatpush.msra.mxu2 %v1317_v18 }
 0x305   : > { %v3170_v21 = vpop.f32.mrf.mxu3 }
 0x306   : > { %v925_v0 = vmul.f32 %v3170_v21, %v3170_v21  ;;  %v901_v53 = vsel %vm751_vm4, %v3170_v21, 0.0 }
 0x307   : > { %933 = vadd.xlane.f32.xlu2 %v932_v22  ;;  %v3175_v23 = vpop.f32.mrf.mxu0  ;;  %v1316_v22 = vld [vmem:[%s4246_s9 + $0x8] sm:$0xff] }
 0x308   : > { %v965_v24 = vsel %vm751_vm4, %v925_v0, 0.0  ;;  %v877_v33 = vsel %vm751_vm4, %v3175_v23, 0.0  ;;  %v917_v57 = vmul.f32 %v3175_v23, %v3175_v23  ;;  %1381 = vmatpush.msra.mxu1 %v1316_v22  ;;  %2540 = vmatpush.msra.mxu2 %v1316_v22 }
 0x30a   : > { %v941_v58 = vsel %vm751_vm4, %v917_v57, 0.0 }
 0x30b   : > { %966 = vadd.xlane.f32.xlu1 %v965_v24  ;;  %v1315_v24 = vld [vmem:[%s4246_s9] sm:$0xff] }
 0x30c   : > { %1382 = vmatpush.msra.mxu1 %v1315_v24  ;;  %2541 = vmatpush.msra.mxu2 %v1315_v24 }
 0x30d   : > { %v3178_v25 = vpop.f32.mrf.mxu3 }
 0x30e   : > { %v904_v27 = vsel %vm751_vm4, %v3178_v25, 0.0  ;;  %v926_v55 = vmul.f32 %v3178_v25, %v3178_v25 }
 0x30f   : > { %896 = vadd.xlane.f32.xlu2 %v895_v26  ;;  %905 = vadd.xlane.f32.xlu0 %v904_v27  ;;  %v3184_v28 = vpop.f32.mrf.mxu0 }
 0x310   : > { %v880_v29 = vsel %vm751_vm4, %v3184_v28, 0.0  ;;  %v918_v44 = vmul.f32 %v3184_v28, %v3184_v28  ;;  %v968_v56 = vsel %vm751_vm4, %v926_v55, 0.0  ;;  %v3275_v55 = vperm.slane %v3014_v1, 1 }
 0x312   : > { %v944_v46 = vsel %vm751_vm4, %v918_v44, 0.0 }
 0x313   : > { %881 = vadd.xlane.f32.xlu1 %v880_v29 }
 0x315   : > { %v3190_v31 = vpop.f32.mrf.mxu3 }
 0x316   : > { %v907_v34 = vsel %vm751_vm4, %v3190_v31, 0.0  ;;  %v927_v35 = vmul.f32 %v3190_v31, %v3190_v31 }
 0x317   : > { %960 = vadd.xlane.f32.xlu2 %v959_v32  ;;  %878 = vadd.xlane.f32.xlu0 %v877_v33  ;;  %v3199_v36 = vpop.f32.mrf.mxu0 }
 0x318   : > { %v971_v40 = vsel %vm751_vm4, %v927_v35, 0.0  ;;  %v919_v49 = vmul.f32 %v3199_v36, %v3199_v36  ;;  %v883_v61 = vsel %vm751_vm4, %v3199_v36, 0.0 }
 0x31a   : > { %v947_v51 = vsel %vm751_vm4, %v919_v49, 0.0 }
 0x31b   : > { %908 = vadd.xlane.f32.xlu1 %v907_v34 }
 0x31d   : > { %v3201_v37 = vpop.f32.mrf.mxu3 }
 0x31e   : > { %v928_v38 = vmul.f32 %v3201_v37, %v3201_v37  ;;  %v910_v59 = vsel %vm751_vm4, %v3201_v37, 0.0 }
 0x31f   : > { %899 = vadd.xlane.f32.xlu2 %v898_v39  ;;  %972 = vadd.xlane.f32.xlu0 %v971_v40  ;;  %v3215_v47 = vpop.f32.mrf.mxu0 }
 0x320   : > { %v974_v42 = vsel %vm751_vm4, %v928_v38, 0.0  ;;  %v886_v48 = vsel %vm751_vm4, %v3215_v47, 0.0  ;;  %v920_v62 = vmul.f32 %v3215_v47, %v3215_v47 }
 0x322   : > { %v950_v10 = vsel %vm751_vm4, %v920_v62, 0.0 }
 0x323   : > { %975 = vadd.xlane.f32.xlu1 %v974_v42 }
 0x327   : > { %963 = vadd.xlane.f32.xlu2 %v962_v45  ;;  %945 = vadd.xlane.f32.xlu0 %v944_v46  ;;  %v3224_v52 = vpop.f32.mrf.mxu0 }
 0x328   : > { %v889_v54 = vsel %vm751_vm4, %v3224_v52, 0.0  ;;  %v921_v27 = vmul.f32 %v3224_v52, %v3224_v52 }
 0x32a   : > { %v953_v39 = vsel %vm751_vm4, %v921_v27, 0.0 }
 0x32b   : > { %887 = vadd.xlane.f32.xlu1 %v886_v48 }
 0x32f   : > { %875 = vadd.xlane.f32.xlu2 %v874_v50  ;;  %948 = vadd.xlane.f32.xlu0 %v947_v51 }
 0x337   : > { %902 = vadd.xlane.f32.xlu2 %v901_v53  ;;  %890 = vadd.xlane.f32.xlu0 %v889_v54 }
 0x33f   : > { %969 = vadd.xlane.f32.xlu2 %v968_v56 }
 0x344   : > { %652 = vperm.xlu1 %2631, %v3036_v4  }
 0x347   : > { %942 = vadd.xlane.f32.xlu2 %v941_v58 }
 0x34b   : > { %646 = vperm.xlu0 %2627, %v3036_v4  }
 0x34f   : > { %911 = vadd.xlane.f32.xlu2 %v910_v59 }
 0x357   : > { %884 = vadd.xlane.f32.xlu2 %v883_v61 }
 0x35c   : > { %v867_v63 = vpop.xlane.xlu1 %866 }
 0x35d   : > { %v3244_v6 = vmul.f32 0.03125, %v867_v63  ;;  %v3285_v63 = vperm.slane %v3014_v1, 2 }
 0x35e   : > { %v931_v8 = vpop.xlane.xlu0 %930 }
 0x35f   : > { %v1009_v12 = vmul.f32 %v3244_v6, %v3244_v6  ;;  %v993_v13 = vmul.f32 0.03125, %v931_v8  ;;  %951 = vadd.xlane.f32.xlu2 %v950_v10  ;;  %v1233_v61 = vsub.f32 %v3134_v60, %v3244_v6 }
 0x361   : > { %v1025_v16 = vsub.f32 %v993_v13, %v1009_v12 }
 0x362   : > { %v894_v19 = vpop.xlane.xlu2 %893 }
 0x363   : > { %v1041_v20 = vmax.f32 %v1025_v16, 0.0  ;;  %v3261_v26 = vmul.f32 0.03125, %v894_v19 }
 0x365   : > { %v1057_v0 = vadd.f32 1e-05, %v1041_v20  ;;  %v1018_v30 = vmul.f32 %v3261_v26, %v3261_v26 }
 0x367   : > { %2676 = vrsqrt.f32 %v1057_v0  ;;  %vm1079_vm6 = vweird.f32 %v1057_v0 }
 0x36a   : > { %v958_v29 = vpop.xlane.xlu2 %957 }
 0x36b   : > { %v1002_v32 = vmul.f32 0.03125, %v958_v29 }
 0x36c   : > { %v873_v33 = vpop.xlane.xlu1 %872 }
 0x36d   : > { %v2677_v34 = vpop.eup %2676  ;;  %v1034_v35 = vsub.f32 %v1002_v32, %v1018_v30  ;;  %v3267_v38 = vmul.f32 0.03125, %v873_v33 }
 0x36e   : > { %v1074_v40 = vmul.f32 %v2677_v34, %v1057_v0  ;;  %v937_v41 = vpop.xlane.xlu0 %936  ;;  %954 = vadd.xlane.f32.xlu1 %v953_v39  ;;  %vm1080_vm5 = vweird.f32 %v2677_v34 }
 0x36f   : > { %v1050_v42 = vmax.f32 %v1034_v35, 0.0  ;;  %v1011_v43 = vmul.f32 %v3267_v38, %v3267_v38  ;;  %v995_v44 = vmul.f32 0.03125, %v937_v41  ;;  %vm1081_vm7 = vmor %vm1079_vm6, %vm1080_vm5 }
 0x370   : > { %v1075_v45 = vmul.f32 %v2677_v34, %v1074_v40 }
 0x371   : > { %v1066_v46 = vadd.f32 1e-05, %v1050_v42  ;;  %v1027_v48 = vsub.f32 %v995_v44, %v1011_v43 }
 0x372   : > { %v1076_v49 = vmul.f32 0.5, %v1075_v45  ;;  %v870_v50 = vpop.xlane.xlu2 %869 }
 0x373   : > { %2678 = vrsqrt.f32 %v1066_v46  ;;  %v1043_v51 = vmax.f32 %v1027_v48, 0.0  ;;  %v3277_v57 = vmul.f32 0.03125, %v870_v50  ;;  %vm1169_vm9 = vweird.f32 %v1066_v46 }
 0x374   : > { %v1077_v53 = vsub.f32 1.5, %v1076_v49 }
 0x375   : > { %v3272_v54 = vadd.f32 1e-05, %v1043_v51  ;;  %v1010_v12 = vmul.f32 %v3277_v57, %v3277_v57 }
 0x376   : > { %v1078_v56 = vmul.f32 %v2677_v34, %v1077_v53  ;;  %v3289_v16 = vpop.xlane.xlu1 %939 }
 0x377   : > { %640 = vperm.xlu2 %2630, %v3036_v4   ;;  %2680 = vrsqrt.f32 %v3272_v54  ;;  %vm1099_vm14 = vweird.f32 %v3272_v54 }
 0x378   : > { %v1082_v58 = vsel %vm1081_vm7, %v2677_v34, %v1078_v56  ;;  %v1242_v34 = vsub.f32 %v3141_v5, %v3261_v26 }
 0x379   : > { %v2679_v59 = vpop.eup %2678  ;;  %v1250_v62 = vmul.f32 %v3275_v55, %v1082_v58 }
 0x37a   : > { %v1164_v8 = vmul.f32 %v2679_v59, %v1066_v46  ;;  %v934_v10 = vpop.xlane.xlu2 %933  ;;  %vm1170_vm8 = vweird.f32 %v2679_v59 }
 0x37b   : > { %v994_v13 = vmul.f32 0.03125, %v934_v10  ;;  %v1266_v14 = vmul.f32 %v1250_v62, %v1233_v61  ;;  %vm1171_vm10 = vmor %vm1169_vm9, %vm1170_vm8 }
 0x37c   : > { %v1165_v4 = vmul.f32 %v2679_v59, %v1164_v8 }
 0x37d   : > { %v1026_v18 = vsub.f32 %v994_v13, %v1010_v12  ;;  %v1283_v19 = vadd.f32 %v3285_v63, %v1266_v14  ;;  %v2681_v20 = vpop.eup %2680  ;;  %v1234_v14 = vsub.f32 %v3145_v7, %v3277_v57 }
 0x37e   : > { %v1166_v60 = vmul.f32 0.5, %v1165_v4  ;;  %v1094_v1 = vmul.f32 %v2681_v20, %v3272_v54  ;;  %v3299_v39 = vpop.xlane.xlu1 %966  ;;  %vm1100_vm12 = vweird.f32 %v2681_v20  ;;  %v1235_v54 = vsub.f32 %v3152_v11, %v3267_v38 }
 0x37f   : > { %v1042_v6 = vmax.f32 %v1026_v18, 0.0  ;;  %v1299_v22 = vmax.f32 %v1283_v19, 0.0  ;;  %vm1101_vm0 = vmor %vm1099_vm14, %vm1100_vm12 }
 0x380   : > { %v1167_v0 = vsub.f32 1.5, %v1166_v60  ;;  %v1095_v32 = vmul.f32 %v2681_v20, %v1094_v1 }
 0x381   : > { %v1058_v24 = vadd.f32 1e-05, %v1042_v6  ;;  %2508 = vmatmul.msk.f32.vlgmr.msra.gmra.mxu1 %vm751_vm4, %v1299_v22 }
 0x382   : > { %v1168_v27 = vmul.f32 %v2679_v59, %v1167_v0  ;;  %v897_v29 = vpop.xlane.xlu2 %896  ;;  %v3294_v33 = vpop.xlane.xlu0 %905  ;;  %v1096_v43 = vmul.f32 0.5, %v1095_v32 }
 0x383   : > { %2682 = vrsqrt.f32 %v1058_v24  ;;  %v3301_v40 = vmul.f32 0.03125, %v897_v29  ;;  %vm1089_vm13 = vweird.f32 %v1058_v24 }
 0x384   : > { %v1172_v30 = vsel %vm1171_vm10, %v2679_v59, %v1168_v27  ;;  %v1097_v5 = vsub.f32 1.5, %v1096_v43 }
 0x385   : > { %v1259_v35 = vmul.f32 %v3275_v55, %v1172_v30  ;;  %v1019_v48 = vmul.f32 %v3301_v40, %v3301_v40 }
 0x386   : > { %v1098_v61 = vmul.f32 %v2681_v20, %v1097_v5  ;;  %v882_v62 = vpop.xlane.xlu1 %881 }
 0x387   : > { %v1275_v41 = vmul.f32 %v1259_v35, %v1242_v34 }
 0x388   : > { %v1102_v18 = vsel %vm1101_vm0, %v2681_v20, %v1098_v61 }
 0x389   : > { %v2683_v42 = vpop.eup %2682  ;;  %v1292_v46 = vadd.f32 %v3285_v63, %v1275_v41  ;;  %v1252_v6 = vmul.f32 %v3275_v55, %v1102_v18 }
 0x38a   : > { %v1084_v44 = vmul.f32 %v2683_v42, %v1058_v24  ;;  %v961_v45 = vpop.xlane.xlu2 %960  ;;  %v3307_v58 = vpop.xlane.xlu0 %878  ;;  %vm1090_vm11 = vweird.f32 %v2683_v42 }
 0x38b   : > { %v1003_v49 = vmul.f32 0.03125, %v961_v45  ;;  %v1308_v51 = vmax.f32 %v1292_v46, 0.0  ;;  %vm1091_vm15 = vmor %vm1089_vm13, %vm1090_vm11  ;;  %v1268_v32 = vmul.f32 %v1252_v6, %v1235_v54 }
 0x38c   : > { %v1085_v50 = vmul.f32 %v2683_v42, %v1084_v44 }
 0x38d   : > { %v1035_v26 = vsub.f32 %v1003_v49, %v1019_v48  ;;  %2517 = vmatmul.msk.f32.vlgmr.msra.gmra.mxu2 %vm751_vm4, %v1308_v51  ;;  %v1285_v38 = vadd.f32 %v3285_v63, %v1268_v32  ;;  %v3329_v51 = vmul.f32 0.03125, %v882_v62 }
 0x38e   : > { %v1086_v53 = vmul.f32 0.5, %v1085_v50  ;;  %v909_v29 = vpop.xlane.xlu1 %908 }
 0x38f   : > { %v1051_v56 = vmax.f32 %v1035_v26, 0.0  ;;  %v3321_v41 = vmul.f32 0.03125, %v909_v29  ;;  %v1301_v26 = vmax.f32 %v1285_v38, 0.0  ;;  %v1014_v62 = vmul.f32 %v3329_v51, %v3329_v51 }
 0x390   : > { %v1087_v59 = vsub.f32 1.5, %v1086_v53 }
 0x391   : > { %v1067_v8 = vadd.f32 1e-05, %v1051_v56  ;;  %v1023_v46 = vmul.f32 %v3321_v41, %v3321_v41  ;;  %v996_v56 = vmul.f32 0.03125, %v3289_v16 }
 0x392   : > { %v1088_v10 = vmul.f32 %v2683_v42, %v1087_v59  ;;  %v900_v12 = vpop.xlane.xlu2 %899  ;;  %v973_v0 = vpop.xlane.xlu0 %972  ;;  %v1243_v59 = vsub.f32 %v3149_v9, %v3301_v40 }
 0x393   : > { %2684 = vrsqrt.f32 %v1067_v8  ;;  %v3313_v19 = vmul.f32 0.03125, %v900_v12  ;;  %v1007_v11 = vmul.f32 0.03125, %v973_v0  ;;  %vm1179_vm2 = vweird.f32 %v1067_v8 }
 0x394   : > { %v1092_v13 = vsel %vm1091_vm15, %v2683_v42, %v1088_v10 }
 0x395   : > { %v1251_v4 = vmul.f32 %v3275_v55, %v1092_v13  ;;  %v1020_v7 = vmul.f32 %v3313_v19, %v3313_v19  ;;  %v1039_v5 = vsub.f32 %v1007_v11, %v1023_v46 }
 0x397   : > { %v1267_v60 = vmul.f32 %v1251_v4, %v1234_v14  ;;  %v1055_v14 = vmax.f32 %v1039_v5, 0.0 }
 0x399   : > { %v2685_v22 = vpop.eup %2684  ;;  %v1284_v1 = vadd.f32 %v3285_v63, %v1267_v60  ;;  %v3343_v0 = vadd.f32 1e-05, %v1055_v14 }
 0x39a   : > { %v1174_v24 = vmul.f32 %v2685_v22, %v1067_v8  ;;  %v964_v27 = vpop.xlane.xlu2 %963  ;;  %vm1180_vm1 = vweird.f32 %v2685_v22  ;;  %v946_v49 = vpop.xlane.xlu0 %945 }
 0x39b   : > { %v1004_v57 = vmul.f32 0.03125, %v964_v27  ;;  %v1300_v30 = vmax.f32 %v1284_v1, 0.0  ;;  %vm1181_vm3 = vmor %vm1179_vm2, %vm1180_vm1  ;;  %v998_v10 = vmul.f32 0.03125, %v946_v49  ;;  %vm1219_vm2 = vweird.f32 %v3343_v0 }
 0x39c   : > { %v1175_v20 = vmul.f32 %v2685_v22, %v1174_v24  ;;  %v1005_v24 = vmul.f32 0.03125, %v3299_v39 }
 0x39d   : > { %v1036_v34 = vsub.f32 %v1004_v57, %v1020_v7  ;;  %2509 = vmatmul.msk.f32.gmra.mxu1 %vm751_vm4, %v1300_v30  ;;  %v1030_v9 = vsub.f32 %v998_v10, %v1014_v62  ;;  %v3350_v57 = vmul.f32 0.03125, %v3294_v33 }
 0x39e   : > { %v1176_v35 = vmul.f32 0.5, %v1175_v20 }
 0x39f   : > { %v1052_v42 = vmax.f32 %v1036_v34, 0.0  ;;  %v1046_v7 = vmax.f32 %v1030_v9, 0.0  ;;  %v1022_v33 = vmul.f32 %v3350_v57, %v3350_v57 }
 0x3a0   : > { %v1177_v43 = vsub.f32 1.5, %v1176_v35 }
 0x3a1   : > { %v1068_v44 = vadd.f32 1e-05, %v1052_v42  ;;  %v3353_v39 = vadd.f32 1e-05, %v1046_v7  ;;  %v1435_v42 = vld [vmem:[%s4246_s9 + $0x58] sm:$0xff] }
 0x3a2   : > { %v1178_v45 = vmul.f32 %v2685_v22, %v1177_v43  ;;  %v876_v48 = vpop.xlane.xlu2 %875  ;;  %1454 = vmatpush.msrb.mxu2 %v1435_v42 }
 0x3a3   : > { %2686 = vrsqrt.f32 %v1068_v44  ;;  %v3327_v50 = vmul.f32 0.03125, %v876_v48  ;;  %vm1189_vm6 = vweird.f32 %v1068_v44 }
 0x3a4   : > { %v1182_v53 = vsel %vm1181_vm3, %v2685_v22, %v1178_v45 }
 0x3a5   : > { %v1012_v61 = vmul.f32 %v3327_v50, %v3327_v50  ;;  %v1260_v8 = vmul.f32 %v3275_v55, %v1182_v53  ;;  %2510 = vmatmul.msk.f32.gmra.mxu1 %vm751_vm4, %v1301_v26  ;;  %v3370_v53 = vmul.f32 0.03125, %v3307_v58 }
 0x3a7   : > { %v1028_v12 = vsub.f32 %v996_v56, %v1012_v61  ;;  %v1276_v13 = vmul.f32 %v1260_v8, %v1243_v59  ;;  %v1013_v62 = vmul.f32 %v3370_v53, %v3370_v53 }
 0x3a9   : > { %v2687_v4 = vpop.eup %2686  ;;  %v1044_v18 = vmax.f32 %v1028_v12, 0.0  ;;  %v1293_v16 = vadd.f32 %v3285_v63, %v1276_v13 }
 0x3aa   : > { %v1184_v60 = vmul.f32 %v2687_v4, %v1068_v44  ;;  %v903_v40 = vpop.xlane.xlu2 %902  ;;  %vm1190_vm5 = vweird.f32 %v2687_v4  ;;  %v1244_v44 = vsub.f32 %v3159_v15, %v3313_v19 }
 0x3ab   : > { %v1060_v6 = vadd.f32 1e-05, %v1044_v18  ;;  %v3341_v22 = vmul.f32 0.03125, %v903_v40  ;;  %v1309_v54 = vmax.f32 %v1293_v16, 0.0  ;;  %vm1191_vm7 = vmor %vm1189_vm6, %vm1190_vm5 }
 0x3ac   : > { %v1185_v1 = vmul.f32 %v2687_v4, %v1184_v60 }
 0x3ad   : > { %2688 = vrsqrt.f32 %v1060_v6  ;;  %v1021_v27 = vmul.f32 %v3341_v22, %v3341_v22  ;;  %2518 = vmatmul.msk.f32.gmra.mxu2 %vm751_vm4, %v1309_v54  ;;  %vm1109_vm9 = vweird.f32 %v1060_v6 }
 0x3ae   : > { %v1186_v29 = vmul.f32 0.5, %v1185_v1  ;;  %2690 = vrsqrt.f32 %v3343_v0 }
 0x3af   : > { %v1037_v20 = vsub.f32 %v1005_v24, %v1021_v27  ;;  %v1236_v24 = vsub.f32 %v3163_v17, %v3327_v50 }
 0x3b0   : > { %v1187_v30 = vsub.f32 1.5, %v1186_v29 }
 0x3b1   : > { %v1053_v32 = vmax.f32 %v1037_v20, 0.0 }
 0x3b2   : > { %v1188_v34 = vmul.f32 %v2687_v4, %v1187_v30  ;;  %v970_v35 = vpop.xlane.xlu2 %969 }
 0x3b3   : > { %v2689_v43 = vpop.eup %2688  ;;  %v3360_v11 = vadd.f32 1e-05, %v1053_v32  ;;  %v1006_v38 = vmul.f32 0.03125, %v970_v35  ;;  %v976_v35 = vpop.xlane.xlu1 %975 }
 0x3b4   : > { %v1104_v45 = vmul.f32 %v2689_v43, %v1060_v6  ;;  %v1192_v46 = vsel %vm1191_vm7, %v2687_v4, %v1188_v34  ;;  %v3366_v5 = vpop.eup %2690  ;;  %vm1110_vm8 = vweird.f32 %v2689_v43  ;;  %v1434_v34 = vld [vmem:[%s4246_s9 + $0x50] sm:$0xff]  ;;  %vm1129_vm7 = vweird.f32 %v3353_v39 }
 0x3b5   : > { %2692 = vrsqrt.f32 %v3360_v11  ;;  %v1038_v48 = vsub.f32 %v1006_v38, %v1022_v33  ;;  %v1261_v49 = vmul.f32 %v3275_v55, %v1192_v46  ;;  %v1214_v8 = vmul.f32 %v3366_v5, %v3343_v0  ;;  %vm1111_vm10 = vmor %vm1109_vm9, %vm1110_vm8  ;;  %1455 = vmatpush.msrb.mxu2 %v1434_v34  ;;  %v949_v46 = vpop.xlane.xlu0 %948 }
 0x3b6   : > { %2694 = vrsqrt.f32 %v3353_v39  ;;  %v1105_v26 = vmul.f32 %v2689_v43, %v1104_v45  ;;  %vm1199_vm12 = vweird.f32 %v3360_v11  ;;  %vm1220_vm15 = vweird.f32 %v3366_v5 }
 0x3b7   : > { %v1054_v56 = vmax.f32 %v1038_v48, 0.0  ;;  %v1277_v59 = vmul.f32 %v1261_v49, %v1244_v44  ;;  %v1215_v60 = vmul.f32 %v3366_v5, %v1214_v8  ;;  %v1246_v34 = vsub.f32 %v3178_v25, %v3350_v57  ;;  %vm3450_vm3 = vmor %vm1219_vm2, %vm1220_vm15 }
 0x3b8   : > { %v1106_v61 = vmul.f32 0.5, %v1105_v26  ;;  %v1008_v26 = vmul.f32 0.03125, %v976_v35 }
 0x3b9   : > { %v3374_v15 = vadd.f32 1e-05, %v1054_v56  ;;  %v1294_v19 = vadd.f32 %v3285_v63, %v1277_v59  ;;  %v1216_v20 = vmul.f32 0.5, %v1215_v60  ;;  %v1433_v60 = vld [vmem:[%s4246_s9 + $0x48] sm:$0xff] }
 0x3ba   : > { %v1107_v10 = vsub.f32 1.5, %v1106_v61  ;;  %v943_v12 = vpop.xlane.xlu2 %942  ;;  %1456 = vmatpush.msrb.mxu2 %v1433_v60 }
 0x3bb   : > { %v2693_v13 = vpop.eup %2692  ;;  %2696 = vrsqrt.f32 %v3374_v15  ;;  %v997_v58 = vmul.f32 0.03125, %v943_v12  ;;  %v1310_v14 = vmax.f32 %v1294_v19, 0.0  ;;  %v1217_v19 = vsub.f32 1.5, %v1216_v20 }
 0x3bc   : > { %v3380_v4 = vpop.eup %2694  ;;  %v1108_v18 = vmul.f32 %v2689_v43, %v1107_v10  ;;  %v1194_v16 = vmul.f32 %v2693_v13, %v3360_v11  ;;  %vm1200_vm11 = vweird.f32 %v2693_v13  ;;  %v1245_v11 = vsub.f32 %v3170_v21, %v3341_v22 }
 0x3bd   : > { %v1029_v9 = vsub.f32 %v997_v58, %v1013_v62  ;;  %2519 = vmatmul.msk.f32.gmra.mxu2 %vm751_vm4, %v1310_v14  ;;  %v1124_v54 = vmul.f32 %v3380_v4, %v3353_v39  ;;  %vm1201_vm13 = vmor %vm1199_vm12, %vm1200_vm11  ;;  %vm1209_vm0 = vweird.f32 %v3374_v15  ;;  %v999_v20 = vmul.f32 0.03125, %v949_v46 }
 0x3be   : > { %v1112_v40 = vsel %vm1111_vm10, %v2689_v43, %v1108_v18  ;;  %v1195_v1 = vmul.f32 %v2693_v13, %v1194_v16  ;;  %v1974_v43 = vlaneseq  ;;  %vm1130_vm5 = vweird.f32 %v3380_v4 }
 0x3bf   : > { %v1253_v27 = vmul.f32 %v3275_v55, %v1112_v40  ;;  %v1045_v29 = vmax.f32 %v1029_v9, 0.0  ;;  %v1125_v33 = vmul.f32 %v3380_v4, %v1124_v54  ;;  %v1218_v9 = vmul.f32 %v3366_v5, %v1217_v19  ;;  %vm3467_vm8 = vmor %vm1129_vm7, %vm1130_vm5 }
 0x3c0   : > { %v1196_v6 = vmul.f32 0.5, %v1195_v1  ;;  %v3406_v49 = vshrl.u32 %v1974_v43, 7 }
 0x3c1   : > { %v3390_v7 = vpop.eup %2696  ;;  %v1269_v30 = vmul.f32 %v1253_v27, %v1236_v24  ;;  %v3392_v32 = vadd.f32 1e-05, %v1045_v29  ;;  %v1126_v62 = vmul.f32 0.5, %v1125_v33  ;;  %v888_v27 = vpop.xlane.xlu1 %887  ;;  %v1222_v25 = vsel %vm3450_vm3, %v3366_v5, %v1218_v9 }
 0x3c2   : > { %v1197_v42 = vsub.f32 1.5, %v1196_v6  ;;  %v1204_v17 = vmul.f32 %v3390_v7, %v3374_v15  ;;  %v912_v50 = vpop.xlane.xlu2 %911  ;;  %2632 = vset.pattern.permute.xlu1 %v3406_v49  ;;  %2644 = vset.pattern.permute.xlu2 %v3406_v49  ;;  %vm1210_vm14 = vweird.f32 %v3390_v7 }
 0x3c3   : > { %2698 = vrsqrt.f32 %v3392_v32  ;;  %v3401_v38 = vmul.f32 0.03125, %v912_v50  ;;  %v1286_v45 = vadd.f32 %v3285_v63, %v1269_v30  ;;  %vm3429_vm1 = vmor %vm1209_vm0, %vm1210_vm14  ;;  %v1127_v24 = vsub.f32 1.5, %v1126_v62 }
 0x3c4   : > { %v1198_v44 = vmul.f32 %v2693_v13, %v1197_v42  ;;  %v1205_v48 = vmul.f32 %v3390_v7, %v1204_v17  ;;  %v3454_v42 = vpop.xlane.xlu0 %890  ;;  %v3458_v50 = vmul.f32 0.03125, %v888_v27  ;;  %vm1119_vm9 = vweird.f32 %v3392_v32 }
 0x3c5   : > { %v1024_v56 = vmul.f32 %v3401_v38, %v3401_v38  ;;  %v1302_v59 = vmax.f32 %v1286_v45, 0.0  ;;  %v1128_v57 = vmul.f32 %v3380_v4, %v1127_v24 }
 0x3c6   : > { %v1202_v61 = vsel %vm1201_vm13, %v2693_v13, %v1198_v44  ;;  %v1206_v8 = vmul.f32 0.5, %v1205_v48  ;;  %v1016_v39 = vmul.f32 %v3458_v50, %v3458_v50 }
 0x3c7   : > { %v1262_v10 = vmul.f32 %v3275_v55, %v1202_v61  ;;  %v1040_v12 = vsub.f32 %v1008_v26, %v1024_v56  ;;  %2511 = vmatmul.msk.f32.gmra.mxu1 %vm751_vm4, %v1302_v59  ;;  %v1264_v56 = vmul.f32 %v3275_v55, %v1222_v25  ;;  %v1237_v61 = vsub.f32 %v3175_v23, %v3370_v53 }
 0x3c8   : > { %v1207_v58 = vsub.f32 1.5, %v1206_v8  ;;  %v1132_v23 = vsel %vm3467_vm8, %v3380_v4, %v1128_v57  ;;  %v1238_v4 = vsub.f32 %v3184_v28, %v3329_v51  ;;  %v3506_v51 = vmul.f32 0.03125, %v3454_v42 }
 0x3c9   : > { %v3418_v14 = vpop.eup %2698  ;;  %v1278_v13 = vmul.f32 %v1262_v10, %v1245_v11  ;;  %v1056_v18 = vmax.f32 %v1040_v12, 0.0  ;;  %v1247_v11 = vsub.f32 %v3190_v31, %v3321_v41  ;;  %v637_v10 = vld [vmem:[%s3052_s27] sm:$0x7]  ;;  %v653_v40 = vpop.permute.xlu1 %652 }
 0x3ca   : > { %v1208_v16 = vmul.f32 %v3390_v7, %v1207_v58  ;;  %v1114_v21 = vmul.f32 %v3418_v14, %v3392_v32  ;;  %v885_v22 = vpop.xlane.xlu2 %884  ;;  %vm1120_vm6 = vweird.f32 %v3418_v14  ;;  %v1432_v32 = vld [vmem:[%s4246_s9 + $0x40] sm:$0xff]  ;;  %v649_v53 = vperm.slane %v637_v10, 1 }
 0x3cb   : > { %v3433_v1 = vadd.f32 1e-05, %v1056_v18  ;;  %v3435_v54 = vmul.f32 0.03125, %v885_v22  ;;  %v1295_v15 = vadd.f32 %v3285_v63, %v1278_v13  ;;  %vm1121_vm10 = vmor %vm1119_vm9, %vm1120_vm6  ;;  %1457 = vmatpush.msrb.mxu2 %v1432_v32  ;;  %v1280_v31 = vmul.f32 %v1264_v56, %v1247_v11 }
 0x3cc   : > { %v1115_v29 = vmul.f32 %v3418_v14, %v1114_v21  ;;  %v1212_v6 = vsel %vm3429_vm1, %v3390_v7, %v1208_v16  ;;  %v647_v18 = vpop.permute.xlu0 %646  ;;  %v643_v22 = vperm.slane %v637_v10, 0 }
 0x3cd   : > { %2700 = vrsqrt.f32 %v3433_v1  ;;  %v1015_v30 = vmul.f32 %v3435_v54, %v3435_v54  ;;  %v1311_v17 = vmax.f32 %v1295_v15, 0.0  ;;  %v1263_v0 = vmul.f32 %v3275_v55, %v1212_v6 }
 0x3ce   : > { %v1116_v7 = vmul.f32 0.5, %v1115_v29  ;;  %v650_v15 = vsub.f32 %v647_v18, %v649_v53  ;;  %vm1229_vm12 = vweird.f32 %v3433_v1 }
 0x3cf   : > { %v1031_v43 = vsub.f32 %v999_v20, %v1015_v30  ;;  %2520 = vmatmul.msk.f32.gmra.mxu2 %vm751_vm4, %v1311_v17  ;;  %v1279_v45 = vmul.f32 %v1263_v0, %v1246_v34  ;;  %v1297_v20 = vadd.f32 %v3285_v63, %v1280_v31  ;;  %v655_v0 = vperm.slane %v637_v10, 2 }
 0x3d0   : > { %v1117_v33 = vsub.f32 1.5, %v1116_v7 }
 0x3d1   : > { %v1047_v46 = vmax.f32 %v1031_v43, 0.0  ;;  %v1296_v26 = vadd.f32 %v3285_v63, %v1279_v45  ;;  %v658_v43 = vmul.f32 %v650_v15, %v650_v15  ;;  %v1313_v45 = vmax.f32 %v1297_v20, 0.0 }
 0x3d2   : > { %v1118_v48 = vmul.f32 %v3418_v14, %v1117_v33  ;;  %v952_v5 = vpop.xlane.xlu2 %951  ;;  %vm656_vm14 = vcmp.eq.f32.partialorder %v653_v40, %v655_v0  ;;  %v633_v40 = vld [vmem:[%s3041_s12] sm:$0xff] }
 0x3d3   : > { %v2701_v59 = vpop.eup %2700  ;;  %v3479_v8 = vadd.f32 1e-05, %v1047_v46  ;;  %v1000_v19 = vmul.f32 0.03125, %v952_v5  ;;  %v1312_v21 = vmax.f32 %v1296_v26, 0.0  ;;  %v1248_v46 = vsub.f32 %v3201_v37, %v3401_v38 }
 0x3d4   : > { %v1224_v12 = vmul.f32 %v2701_v59, %v3433_v1  ;;  %v1122_v62 = vsel %vm1121_vm10, %v3418_v14, %v1118_v48  ;;  %v1255_v14 = vmul.f32 %v3275_v55, %v1132_v23  ;;  %vm1230_vm11 = vweird.f32 %v2701_v59 }
 0x3d5   : > { %2702 = vrsqrt.f32 %v3479_v8  ;;  %v1032_v58 = vsub.f32 %v1000_v19, %v1016_v39  ;;  %v1254_v13 = vmul.f32 %v3275_v55, %v1122_v62  ;;  %vm1231_vm13 = vmor %vm1229_vm12, %vm1230_vm11  ;;  %v1017_v26 = vmul.f32 %v3506_v51, %v3506_v51 }
 0x3d6   : > { %v1225_v16 = vmul.f32 %v2701_v59, %v1224_v12  ;;  %v1271_v7 = vmul.f32 %v1255_v14, %v1238_v4  ;;  %vm1139_vm2 = vweird.f32 %v3479_v8  ;;  %v2861_v39 = vmov 0.0  }
 0x3d7   : > { %v1048_v41 = vmax.f32 %v1032_v58, 0.0  ;;  %v1270_v60 = vmul.f32 %v1254_v13, %v1237_v61  ;;  %2521 = vmatmul.msk.f32.gmra.mxu2 %vm751_vm4, %v1312_v21 }
 0x3d8   : > { %v1226_v9 = vmul.f32 0.5, %v1225_v16  ;;  %v1288_v48 = vadd.f32 %v3285_v63, %v1271_v7  ;;  %v1239_v16 = vsub.f32 %v3199_v36, %v3435_v54 }
 0x3d9   : > { %v3498_v24 = vadd.f32 1e-05, %v1048_v41  ;;  %v1287_v27 = vadd.f32 %v3285_v63, %v1270_v60 }
 0x3da   : > { %v1227_v29 = vsub.f32 1.5, %v1226_v9  ;;  %v641_v6 = vpop.permute.xlu2 %640  ;;  %v1304_v32 = vmax.f32 %v1288_v48, 0.0  ;;  %v1240_v9 = vsub.f32 %v3215_v47, %v3458_v50 }
 0x3db   : > { %v2703_v30 = vpop.eup %2702  ;;  %2704 = vrsqrt.f32 %v3498_v24  ;;  %v644_v34 = vsub.f32 %v641_v6, %v643_v22  ;;  %v1303_v35 = vmax.f32 %v1287_v27, 0.0  ;;  %vm1149_vm6 = vweird.f32 %v3498_v24 }
 0x3dc   : > { %v1228_v17 = vmul.f32 %v2701_v59, %v1227_v29  ;;  %v1134_v28 = vmul.f32 %v2703_v30, %v3479_v8  ;;  %vm1140_vm0 = vweird.f32 %v2703_v30 }
 0x3dd   : > { %v657_v25 = vmul.f32 %v644_v34, %v644_v34  ;;  %2512 = vmatmul.msk.f32.gmra.mxu1 %vm751_vm4, %v1303_v35  ;;  %vm1141_vm3 = vmor %vm1139_vm2, %vm1140_vm0  ;;  %v634_v35 = vld [vmem:[%s3041_s12 + $0x8] sm:$0xff] }
 0x3de   : > { %v1232_v57 = vsel %vm1231_vm13, %v2701_v59, %v1228_v17  ;;  %v1135_v33 = vmul.f32 %v2703_v30, %v1134_v28  ;;  %v1241_v17 = vsub.f32 %v3224_v52, %v3506_v51 }
 0x3df   : > { %v1265_v44 = vmul.f32 %v3275_v55, %v1232_v57  ;;  %v659_v1 = vadd.f32 %v658_v43, %v657_v25  ;;  %2522 = vmatmul.msk.f32.gmra.mxu2 %vm751_vm4, %v1313_v45 }
 0x3e0   : > { %v1136_v5 = vmul.f32 0.5, %v1135_v33 }
 0x3e1   : > { %v2705_v42 = vpop.eup %2704  ;;  %v1281_v56 = vmul.f32 %v1265_v44, %v1248_v46  ;;  %vm660_vm15 = vcmp.le.f32.partialorder %v659_v1, 36.0  ;;  %v955_v59 = vpop.xlane.xlu1 %954 }
 0x3e2   : > { %v1137_v61 = vsub.f32 1.5, %v1136_v5  ;;  %v1144_v37 = vmul.f32 %v2705_v42, %v3498_v24  ;;  %vm661_vm1 = vmand %vm660_vm15, %vm656_vm14  ;;  %v1001_v38 = vmul.f32 0.03125, %v955_v59  ;;  %vm1150_vm5 = vweird.f32 %v2705_v42 }
 0x3e3   : > { %v3518_v19 = vsel %vm661_vm1, 1.0, %v2861_v39  ;;  %v1298_v11 = vadd.f32 %v3285_v63, %v1281_v56  ;;  %vm1151_vm7 = vmor %vm1149_vm6, %vm1150_vm5 }
 0x3e4   : > { %v1138_v10 = vmul.f32 %v2703_v30, %v1137_v61  ;;  %v1145_v12 = vmul.f32 %v2705_v42, %v1144_v37  ;;  %v1033_v62 = vsub.f32 %v1001_v38, %v1017_v26  ;;  %v1973_v23 = vperm.slane %v3518_v19, 0 }
 0x3e5   : > { %2513 = vmatmul.msk.f32.gmra.mxu1 %vm751_vm4, %v1304_v32  ;;  %v1314_v53 = vmax.f32 %v1298_v11, 0.0  ;;  %v1986_v58 = vperm.slane %v3518_v19, 1 }
 0x3e6   : > { %v1142_v13 = vsel %vm1141_vm3, %v2703_v30, %v1138_v10  ;;  %v1146_v18 = vmul.f32 0.5, %v1145_v12  ;;  %v1049_v8 = vmax.f32 %v1033_v62, 0.0 }
 0x3e7   : > { %v1256_v21 = vmul.f32 %v3275_v55, %v1142_v13  ;;  %v3527_v31 = vpack.i.bf16 %v1986_v58, %v1973_v23  ;;  %2523 = vmatmul.msk.f32.gmra.mxu2 %vm751_vm4, %v1314_v53 }
 0x3e8   : > { %v1147_v41 = vsub.f32 1.5, %v1146_v18  ;;  %v1065_v22 = vadd.f32 1e-05, %v1049_v8 }
 0x3e9   : > { %v1272_v60 = vmul.f32 %v1256_v21, %v1239_v16  ;;  %2634 = vperm.xlu1 %2632, %v3527_v31  }
 0x3ea   : > { %v1148_v14 = vmul.f32 %v2705_v42, %v1147_v41  ;;  %2706 = vrsqrt.f32 %v1065_v22  ;;  %vm1159_vm9 = vweird.f32 %v1065_v22 }
 0x3eb   : > { %v1289_v36 = vadd.f32 %v3285_v63, %v1272_v60 }
 0x3ec   : > { %v1152_v54 = vsel %vm1151_vm7, %v2705_v42, %v1148_v14  ;;  %v3560_v42 = vld [vmem:[#allocation3] sm:$0xff] }
 0x3ed   : > { %v1305_v4 = vmax.f32 %v1289_v36, 0.0  ;;  %v1257_v15 = vmul.f32 %v3275_v55, %v1152_v54  ;;  %v1467_v26 = vrot.slane %v3560_v42, 1  ;;  %v1468_v56 = vrot.slane %v3560_v42, 2 }
 0x3ee   : > { %v1474_v61 = vperm.slane %v3560_v42, 0  ;;  %v1471_v32 = vrot.slane %v3560_v42, 5  ;;  %v1469_v11 = vrot.slane %v3560_v42, 3  ;;  %v1472_v60 = vrot.slane %v3560_v42, 6 }
 0x3ef   : > { %2514 = vmatmul.msk.f32.gmra.mxu1 %vm751_vm4, %v1305_v4  ;;  %v1273_v27 = vmul.f32 %v1257_v15, %v1240_v9  ;;  %2524 = vmatmul.msk.f32.vlgmr.msrb.gmra.mxu2 %vm751_vm4, %v633_v40  ;;  %v3567_v37 = vperm.slane %v1467_v26, 0  ;;  %v3569_v38 = vperm.slane %v1468_v56, 0  ;;  %v1470_v4 = vrot.slane %v3560_v42, 4 }
 0x3f0   : > { %v2707_v29 = vpop.eup %2706  ;;  %v3577_v53 = vperm.slane %v1471_v32, 0  ;;  %v3585_v8 = vperm.slane %v1469_v11, 0  ;;  %v1480_v40 = vperm.slane %v1472_v60, 0 }
 0x3f1   : > { %v1154_v24 = vmul.f32 %v2707_v29, %v1065_v22  ;;  %v1290_v6 = vadd.f32 %v3285_v63, %v1273_v27  ;;  %vm1160_vm8 = vweird.f32 %v2707_v29 }
 0x3f2   : > { %vm1161_vm10 = vmor %vm1159_vm9, %vm1160_vm8 }
 0x3f3   : > { %v1155_v20 = vmul.f32 %v2707_v29, %v1154_v24  ;;  %v1306_v34 = vmax.f32 %v1290_v6, 0.0  ;;  %v1473_v24 = vrot.slane %v3560_v42, 7 }
 0x3f5   : > { %v1156_v30 = vmul.f32 0.5, %v1155_v20 }
 0x3f7   : > { %v1157_v7 = vsub.f32 1.5, %v1156_v30  ;;  %2515 = vmatmul.msk.f32.gmra.mxu1 %vm751_vm4, %v1306_v34  ;;  %2525 = vmatmul.msk.f32.gmra.mxu2 %vm751_vm4, %v634_v35 }
 0x3f9   : > { %v1158_v47 = vmul.f32 %v2707_v29, %v1157_v7  ;;  %v3610_v7 = vperm.slane %v1473_v24, 0 }
 0x3fb   : > { %v1162_v50 = vsel %vm1161_vm10, %v2707_v29, %v1158_v47  ;;  %v1478_v29 = vperm.slane %v1470_v4, 0 }
 0x3fc   : > { %v1258_v28 = vmul.f32 %v3275_v55, %v1162_v50 }
 0x3fe   : > { %v1274_v0 = vmul.f32 %v1258_v28, %v1241_v17  ;;  %v1384_v57 = vpop.f32.mrf.mxu1 }
 0x3ff   : > { %v1490_v10 = vadd.f32 %v1474_v61, %v1384_v57 }
 0x400   : > { %v1291_v43 = vadd.f32 %v3285_v63, %v1274_v0 }
 0x402   : > { %v1307_v25 = vmax.f32 %v1291_v43, 0.0 }
 0x404   : > { %2516 = vmatmul.msk.f32.gmra.mxu1 %vm751_vm4, %v1307_v25 }
 0x410   : > { %v3548_v33 = vpop.f32.mrf.mxu2 }
 0x41a   : > { %v3550_v45 = vpop.f32.mrf.mxu1 }
 0x422   : > { %v1390_v1 = vpop.f32.mrf.mxu1 }
 0x423   : > { %v1492_v12 = vadd.f32 %v3567_v37, %v1390_v1 }
 0x430   : > { %v1414_v46 = vpop.f32.mrf.mxu2 }
 0x431   : > { %v1500_v22 = vadd.f32 %v3577_v53, %v1414_v46 }
 0x440   : > { %v3552_v44 = vpop.f32.mrf.mxu2 }
 0x444   : > { %v3554_v5 = vpop.f32.mrf.mxu1 }
 0x452   : > { %v1420_v48 = vpop.f32.mrf.mxu2 }
 0x453   : > { %v1502_v6 = vadd.f32 %v1480_v40, %v1420_v48 }
 0x45a   : > { %v3556_v52 = vpop.f32.mrf.mxu2  ;;  %v1396_v55 = vpop.f32.mrf.mxu1 }
 0x45b   : > { %v1494_v62 = vadd.f32 %v3569_v38, %v1396_v55 }
 0x462   : > { %v1426_v51 = vpop.f32.mrf.mxu2  ;;  %v3558_v63 = vpop.f32.mrf.mxu1 }
 0x463   : > { %v1504_v0 = vadd.f32 %v3610_v7, %v1426_v51 }
 0x46a   : > { %v3564_v59 = vpop.f32.mrf.mxu2 }
 0x46c   : > { %v1402_v39 = vpop.f32.mrf.mxu1 }
 0x46d   : > { %v1496_v14 = vadd.f32 %v3585_v8, %v1402_v39 }
 0x472   : > { %v1459_v23 = vpop.f32.mrf.mxu2 }
 0x473   : > { %v3579_v58 = vadd.f32 %v1494_v62, %v1459_v23  ;;  %v3581_v13 = vadd.f32 %v1492_v12, %v1459_v23  ;;  %v3583_v18 = vadd.f32 %v1490_v10, %v1459_v23  ;;  %v3596_v54 = vadd.f32 %v1500_v22, %v1459_v23 }
 0x474   : > { %v1405_v36 = vpop.f32.mrf.mxu1  ;;  %v3598_v9 = vadd.f32 %v1496_v14, %v1459_v23  ;;  %v3608_v35 = vadd.f32 %v1502_v6, %v1459_v23  ;;  %v3622_v25 = vadd.f32 %v1504_v0, %v1459_v23  ;;  %v1491_v10 = vadd.f32 %v1474_v61, %v3550_v45 }
 0x475   : > { %v1534_v16 = vsel %vm751_vm4, %v3579_v58, 0.0  ;;  %v1528_v21 = vsel %vm751_vm4, %v3581_v13, 0.0  ;;  %v1522_v41 = vsel %vm751_vm4, %v3583_v18, 0.0  ;;  %v1552_v15 = vsel %vm751_vm4, %v3596_v54, 0.0 }
 0x476   : > { %1535 = vadd.xlane.f32.xlu2 %v1534_v16  ;;  %1529 = vadd.xlane.f32.xlu1 %v1528_v21  ;;  %v1540_v27 = vsel %vm751_vm4, %v3598_v9, 0.0  ;;  %v1570_v34 = vmul.f32 %v3583_v18, %v3583_v18  ;;  %v1558_v28 = vsel %vm751_vm4, %v3608_v35, 0.0  ;;  %v1576_v43 = vmul.f32 %v3598_v9, %v3598_v9 }
 0x477   : > { %1523 = vadd.xlane.f32.xlu0 %v1522_v41  ;;  %v1572_v57 = vmul.f32 %v3581_v13, %v3581_v13  ;;  %v1564_v1 = vsel %vm751_vm4, %v3622_v25, 0.0  ;;  %v1582_v55 = vmul.f32 %v3608_v35, %v3608_v35  ;;  %v1574_v51 = vmul.f32 %v3579_v58, %v3579_v58 }
 0x478   : > { %v1586_v50 = vsel %vm751_vm4, %v1570_v34, 0.0  ;;  %v1604_v46 = vsel %vm751_vm4, %v1576_v43, 0.0  ;;  %v1580_v62 = vmul.f32 %v3596_v54, %v3596_v54  ;;  %v1495_v45 = vadd.f32 %v3569_v38, %v3558_v63 }
 0x479   : > { %v1592_v48 = vsel %vm751_vm4, %v1572_v57, 0.0  ;;  %v1622_v56 = vsel %vm751_vm4, %v1582_v55, 0.0  ;;  %v1598_v39 = vsel %vm751_vm4, %v1574_v51, 0.0  ;;  %v1497_v42 = vadd.f32 %v3585_v8, %v1405_v36 }
 0x47a   : > { %v1462_v32 = vpop.f32.mrf.mxu2  ;;  %v1616_v21 = vsel %vm751_vm4, %v1580_v62, 0.0  ;;  %v1493_v61 = vadd.f32 %v3567_v37, %v3554_v5  ;;  %v1501_v5 = vadd.f32 %v3577_v53, %v3552_v44  ;;  %v1503_v37 = vadd.f32 %v1480_v40, %v3556_v52 }
 0x47b   : > { %v3642_v12 = vadd.f32 %v1491_v10, %v1462_v32  ;;  %v3657_v22 = vadd.f32 %v1497_v42, %v1462_v32  ;;  %v3659_v60 = vadd.f32 %v1495_v45, %v1462_v32  ;;  %v1982_v38 = vadd.s32 8, %v3406_v49 }
 0x47c   : > { %v3661_v14 = vadd.f32 %v1493_v61, %v1462_v32  ;;  %v1499_v8 = vadd.f32 %v1478_v29, %v3548_v33  ;;  %v3674_v36 = vadd.f32 %v1503_v37, %v1462_v32  ;;  %v1505_v49 = vadd.f32 %v3610_v7, %v3564_v59 }
 0x47d   : > { %v1525_v16 = vsel %vm751_vm4, %v3642_v12, 0.0  ;;  %v1543_v4 = vsel %vm751_vm4, %v3657_v22, 0.0  ;;  %2650 = vset.pattern.permute.xlu1 %v1982_v38  ;;  %2638 = vset.pattern.permute.xlu0 %v1982_v38  ;;  %v1571_v53 = vmul.f32 %v3642_v12, %v3642_v12  ;;  %v1577_v34 = vmul.f32 %v3657_v22, %v3657_v22 }
 0x47e   : > { %1553 = vadd.xlane.f32.xlu2 %v1552_v15  ;;  %v1537_v15 = vsel %vm751_vm4, %v3659_v60, 0.0  ;;  %v1531_v63 = vsel %vm751_vm4, %v3661_v14, 0.0  ;;  %v3678_v24 = vadd.f32 %v1499_v8, %v1462_v32  ;;  %v1561_v6 = vsel %vm751_vm4, %v3674_v36, 0.0 }
 0x47f   : > { %1541 = vadd.xlane.f32.xlu0 %v1540_v27  ;;  %v3676_v27 = vadd.f32 %v1501_v5, %v1462_v32  ;;  %v1573_v33 = vmul.f32 %v3661_v14, %v3661_v14  ;;  %v3692_v40 = vadd.f32 %v1505_v49, %v1462_v32  ;;  %v1575_v7 = vmul.f32 %v3659_v60, %v3659_v60 }
 0x480   : > { %v1549_v52 = vsel %vm751_vm4, %v3678_v24, 0.0  ;;  %v1579_v59 = vmul.f32 %v3678_v24, %v3678_v24  ;;  %v1999_v57 = vperm.slane %v3518_v19, 2  ;;  %v2038_v55 = vperm.slane %v3518_v19, 5 }
 0x481   : > { %v1408_v20 = vpop.f32.mrf.mxu1  ;;  %v1555_v44 = vsel %vm751_vm4, %v3676_v27, 0.0  ;;  %v1581_v0 = vmul.f32 %v3676_v27, %v3676_v27 }
 0x482   : > { %v1498_v30 = vadd.f32 %v1478_v29, %v1408_v20  ;;  %v1595_v29 = vsel %vm751_vm4, %v1573_v33, 0.0  ;;  %v1589_v20 = vsel %vm751_vm4, %v1571_v53, 0.0  ;;  %v1583_v33 = vmul.f32 %v3674_v36, %v3674_v36 }
 0x483   : > { %v1619_v43 = vsel %vm751_vm4, %v1581_v0, 0.0 }
 0x484   : > { %v3612_v47 = vadd.f32 %v1498_v30, %v1459_v23  ;;  %v1584_v23 = vmul.f32 %v3622_v25, %v3622_v25  ;;  %v1567_v30 = vsel %vm751_vm4, %v3692_v40, 0.0 }
 0x486   : > { %v1546_v17 = vsel %vm751_vm4, %v3612_v47, 0.0  ;;  %1587 = vadd.xlane.f32.xlu2 %v1586_v50  ;;  %v1578_v26 = vmul.f32 %v3612_v47, %v3612_v47  ;;  %v1628_v41 = vsel %vm751_vm4, %v1584_v23, 0.0  ;;  %v1613_v50 = vsel %vm751_vm4, %v1579_v59, 0.0 }
 0x487   : > { %1547 = vadd.xlane.f32.xlu1 %v1546_v17  ;;  %1559 = vadd.xlane.f32.xlu0 %v1558_v28  ;;  %v1607_v17 = vsel %vm751_vm4, %v1577_v34, 0.0  ;;  %v1601_v28 = vsel %vm751_vm4, %v1575_v7, 0.0 }
 0x488   : > { %v1610_v11 = vsel %vm751_vm4, %v1578_v26, 0.0  ;;  %v3715_v26 = vpop.permute.xlu1 %2634 }
 0x48e   : > { %1605 = vadd.xlane.f32.xlu2 %v1604_v46  ;;  %v2012_v46 = vperm.slane %v3518_v19, 3 }
 0x48f   : > { %1565 = vadd.xlane.f32.xlu1 %v1564_v1  ;;  %1593 = vadd.xlane.f32.xlu0 %v1592_v48  ;;  %v2025_v48 = vperm.slane %v3518_v19, 4 }
 0x490   : > { %v2645_v1 = vpack.i.bf16 %v2012_v46, %v1999_v57 }
 0x491   : > { %v2656_v51 = vpack.i.bf16 %v2038_v55, %v2025_v48 }
 0x496   : > { %1623 = vadd.xlane.f32.xlu2 %v1622_v56 }
 0x497   : > { %1599 = vadd.xlane.f32.xlu1 %v1598_v39  ;;  %1611 = vadd.xlane.f32.xlu0 %v1610_v11 }
 0x49e   : > { %1526 = vadd.xlane.f32.xlu2 %v1525_v16 }
 0x49f   : > { %1617 = vadd.xlane.f32.xlu1 %v1616_v21  ;;  %1629 = vadd.xlane.f32.xlu0 %v1628_v41 }
 0x4a6   : > { %1544 = vadd.xlane.f32.xlu2 %v1543_v4 }
 0x4a7   : > { %1538 = vadd.xlane.f32.xlu1 %v1537_v15  ;;  %1532 = vadd.xlane.f32.xlu0 %v1531_v63 }
 0x4ae   : > { %1562 = vadd.xlane.f32.xlu2 %v1561_v6  ;;  %v1585_v6 = vmul.f32 %v3692_v40, %v3692_v40 }
 0x4af   : > { %1556 = vadd.xlane.f32.xlu1 %v1555_v44  ;;  %1550 = vadd.xlane.f32.xlu0 %v1549_v52 }
 0x4b6   : > { %1596 = vadd.xlane.f32.xlu2 %v1595_v29 }
 0x4b7   : > { %1590 = vadd.xlane.f32.xlu1 %v1589_v20  ;;  %1568 = vadd.xlane.f32.xlu0 %v1567_v30  ;;  %v1631_v30 = vsel %vm751_vm4, %v1585_v6, 0.0 }
 0x4be   : > { %1614 = vadd.xlane.f32.xlu2 %v1613_v50 }
 0x4bf   : > { %1608 = vadd.xlane.f32.xlu1 %v1607_v17  ;;  %1602 = vadd.xlane.f32.xlu0 %v1601_v28  ;;  %v1625_v17 = vsel %vm751_vm4, %v1583_v33, 0.0 }
 0x4c7   : > { %1620 = vadd.xlane.f32.xlu0 %v1619_v43 }
 0x4d6   : > { %2646 = vperm.xlu2 %2644, %v2645_v1  }
 0x4d8   : > { %2652 = vperm.xlu1 %2650, %v2645_v1  }
 0x4db   : > { %2640 = vperm.xlu0 %2638, %v3527_v31  }
 0x4de   : > { %2657 = vperm.xlu2 %2644, %v2656_v51  }
 0x4e0   : > { %2662 = vperm.xlu1 %2650, %v2656_v51  }
 0x4e9   : > { %v1536_v56 = vpop.xlane.xlu2 %1535  ;;  %v1530_v32 = vpop.xlane.xlu1 %1529 }
 0x4ea   : > { %v1524_v39 = vpop.xlane.xlu0 %1523  ;;  %v3727_v4 = vmul.f32 0.03125, %v1530_v32  ;;  %v3739_v29 = vmul.f32 0.03125, %v1536_v56 }
 0x4eb   : > { %v3719_v62 = vmul.f32 0.03125, %v1524_v39 }
 0x4ec   : > { %v1668_v44 = vmul.f32 %v3727_v4, %v3727_v4  ;;  %v1670_v46 = vmul.f32 %v3739_v29, %v3739_v29 }
 0x4ed   : > { %v1666_v21 = vmul.f32 %v3719_v62, %v3719_v62 }
 0x4f1   : > { %v3717_v11 = vpop.xlane.xlu2 %1553 }
 0x4f2   : > { %v1542_v10 = vpop.xlane.xlu0 %1541 }
 0x4f3   : > { %v3725_v42 = vmul.f32 0.03125, %v1542_v10 }
 0x4f5   : > { %v1672_v37 = vmul.f32 %v3725_v42, %v3725_v42 }
 0x4f9   : > { %v1588_v23 = vpop.xlane.xlu2 %1587 }
 0x4fa   : > { %v1548_v16 = vpop.xlane.xlu1 %1547  ;;  %v1650_v41 = vmul.f32 0.03125, %v1588_v23  ;;  %v3723_v31 = vpop.xlane.xlu0 %1559 }
 0x4fb   : > { %v3742_v59 = vmul.f32 0.03125, %v1548_v16 }
 0x4fc   : > { %v1682_v45 = vsub.f32 %v1650_v41, %v1666_v21 }
 0x4fd   : > { %v1674_v51 = vmul.f32 %v3742_v59, %v3742_v59 }
 0x4fe   : > { %v1698_v61 = vmax.f32 %v1682_v45, 0.0  ;;  %v3758_v45 = vperm.slane %v3024_v2, 0 }
 0x500   : > { %v1714_v15 = vadd.f32 1e-05, %v1698_v61 }
 0x501   : > { %v1606_v63 = vpop.xlane.xlu2 %1605 }
 0x502   : > { %v3729_v5 = vpop.xlane.xlu1 %1565  ;;  %2708 = vrsqrt.f32 %v1714_v15  ;;  %v1656_v38 = vmul.f32 0.03125, %v1606_v63  ;;  %v1594_v8 = vpop.xlane.xlu0 %1593  ;;  %vm1736_vm12 = vweird.f32 %v1714_v15 }
 0x503   : > { %v1652_v52 = vmul.f32 0.03125, %v1594_v8 }
 0x504   : > { %v1688_v49 = vsub.f32 %v1656_v38, %v1672_v37 }
 0x505   : > { %v1684_v53 = vsub.f32 %v1652_v52, %v1668_v44  ;;  %v3768_v52 = vmul.f32 0.03125, %v3717_v11 }
 0x506   : > { %v1704_v20 = vmax.f32 %v1688_v49, 0.0 }
 0x507   : > { %v1700_v34 = vmax.f32 %v1684_v53, 0.0  ;;  %1632 = vadd.xlane.f32.xlu2 %v1631_v30 }
 0x508   : > { %v2709_v7 = vpop.eup %2708  ;;  %v3744_v50 = vadd.f32 1e-05, %v1704_v20 }
 0x509   : > { %v1731_v28 = vmul.f32 %v2709_v7, %v1714_v15  ;;  %v3747_v0 = vadd.f32 1e-05, %v1700_v34  ;;  %v3749_v43 = vpop.xlane.xlu2 %1623  ;;  %vm1737_vm11 = vweird.f32 %v2709_v7  ;;  %v1890_v15 = vsub.f32 %v3583_v18, %v3719_v62 }
 0x50a   : > { %v1600_v57 = vpop.xlane.xlu1 %1599  ;;  %1626 = vadd.xlane.f32.xlu1 %v1625_v17  ;;  %2710 = vrsqrt.f32 %v3744_v50  ;;  %v1612_v1 = vpop.xlane.xlu0 %1611  ;;  %vm1738_vm13 = vmor %vm1736_vm12, %vm1737_vm11  ;;  %v1676_v17 = vmul.f32 %v3768_v52, %v3768_v52  ;;  %vm1796_vm15 = vweird.f32 %v3744_v50 }
 0x50b   : > { %v1654_v48 = vmul.f32 0.03125, %v1600_v57  ;;  %v1732_v55 = vmul.f32 %v2709_v7, %v1731_v28  ;;  %v1658_v56 = vmul.f32 0.03125, %v1612_v1  ;;  %2712 = vrsqrt.f32 %v3747_v0 }
 0x50c   : > { %vm1756_vm2 = vweird.f32 %v3747_v0 }
 0x50d   : > { %v1686_v39 = vsub.f32 %v1654_v48, %v1670_v46  ;;  %v1733_v32 = vmul.f32 0.5, %v1732_v55  ;;  %v1690_v10 = vsub.f32 %v1658_v56, %v1674_v51  ;;  %v2051_v48 = vperm.slane %v3518_v19, 6 }
 0x50e   : > { %v2064_v55 = vperm.slane %v3518_v19, 7 }
 0x50f   : > { %v1702_v23 = vmax.f32 %v1686_v39, 0.0  ;;  %v1734_v16 = vsub.f32 1.5, %v1733_v32  ;;  %v1706_v21 = vmax.f32 %v1690_v10, 0.0 }
 0x510   : > { %v2711_v41 = vpop.eup %2710 }
 0x511   : > { %v3760_v61 = vadd.f32 1e-05, %v1702_v23  ;;  %v1735_v63 = vmul.f32 %v2709_v7, %v1734_v16  ;;  %v1791_v37 = vmul.f32 %v2711_v41, %v3744_v50  ;;  %v3763_v38 = vadd.f32 1e-05, %v1706_v21  ;;  %v1527_v8 = vpop.xlane.xlu2 %1526  ;;  %v3765_v44 = vpop.eup %2712 }
 0x512   : > { %v1618_v6 = vpop.xlane.xlu1 %1617  ;;  %v3770_v49 = vpop.xlane.xlu0 %1629  ;;  %v1751_v34 = vmul.f32 %v3765_v44, %v3747_v0  ;;  %vm1797_vm14 = vweird.f32 %v2711_v41  ;;  %vm1757_vm1 = vweird.f32 %v3765_v44  ;;  %v3838_v0 = vmul.f32 0.03125, %v3723_v31 }
 0x513   : > { %v1739_v33 = vsel %vm1738_vm13, %v2709_v7, %v1735_v63  ;;  %v1792_v53 = vmul.f32 %v2711_v41, %v1791_v37  ;;  %2714 = vrsqrt.f32 %v3763_v38  ;;  %v1660_v11 = vmul.f32 0.03125, %v1618_v6  ;;  %vm1798_vm0 = vmor %vm1796_vm15, %vm1797_vm14 }
 0x514   : > { %v1907_v20 = vmul.f32 %v3758_v45, %v1739_v33  ;;  %2716 = vrsqrt.f32 %v3760_v61  ;;  %v1752_v18 = vmul.f32 %v3765_v44, %v1751_v34  ;;  %v2666_v63 = vpack.i.bf16 %v2064_v55, %v2051_v48  ;;  %vm3831_vm3 = vmor %vm1756_vm2, %vm1757_vm1 }
 0x515   : > { %v1793_v30 = vmul.f32 0.5, %v1792_v53  ;;  %v1692_v57 = vsub.f32 %v1660_v11, %v1676_v17  ;;  %v1898_v31 = vsub.f32 %v3612_v47, %v3742_v59  ;;  %vm1776_vm7 = vweird.f32 %v3760_v61 }
 0x516   : > { %v3781_v28 = vmul.f32 %v1907_v20, %v1890_v15  ;;  %v1753_v21 = vmul.f32 0.5, %v1752_v18  ;;  %v3819_v18 = vmul.f32 0.03125, %v1527_v8  ;;  %vm1816_vm8 = vweird.f32 %v3763_v38 }
 0x517   : > { %v1794_v7 = vsub.f32 1.5, %v1793_v30  ;;  %v1708_v56 = vmax.f32 %v1692_v57, 0.0  ;;  %v1896_v30 = vsub.f32 %v3598_v9, %v3725_v42  ;;  %v2637_v9 = vunpack.i.h.bf16 %v3715_v26 }
 0x518   : > { %v1754_v33 = vsub.f32 1.5, %v1753_v21 }
 0x519   : > { %v3783_v46 = vpop.eup %2714  ;;  %v3786_v62 = vpop.xlane.xlu2 %1544  ;;  %v1795_v10 = vmul.f32 %v2711_v41, %v1794_v7  ;;  %v3798_v16 = vadd.f32 1e-05, %v1708_v56  ;;  %v2636_v56 = vunpack.i.l.bf16 %v3715_v26 }
 0x51a   : > { %v3788_v1 = vpop.xlane.xlu1 %1538  ;;  %v3792_v51 = vpop.eup %2716  ;;  %v1811_v23 = vmul.f32 %v3783_v46, %v3763_v38  ;;  %vm1817_vm5 = vweird.f32 %v3783_v46 }
 0x51b   : > { %v1533_v39 = vpop.xlane.xlu0 %1532  ;;  %v1771_v32 = vmul.f32 %v3792_v51, %v3760_v61  ;;  %2718 = vrsqrt.f32 %v3798_v16  ;;  %v1799_v6 = vsel %vm1798_vm0, %v2711_v41, %v1795_v10  ;;  %v1755_v41 = vmul.f32 %v3765_v44, %v1754_v33  ;;  %vm3875_vm10 = vmor %vm1816_vm8, %vm1817_vm5 }
 0x51c   : > { %v1812_v37 = vmul.f32 %v3783_v46, %v1811_v23  ;;  %v1913_v20 = vmul.f32 %v3758_v45, %v1799_v6  ;;  %v3821_v48 = vmul.f32 0.03125, %v1533_v39  ;;  %v1892_v10 = vsub.f32 %v3581_v13, %v3727_v4 }
 0x51d   : > { %v1772_v19 = vmul.f32 %v3792_v51, %v1771_v32  ;;  %v1894_v32 = vsub.f32 %v3579_v58, %v3739_v29  ;;  %v1900_v23 = vsub.f32 %v3596_v54, %v3768_v52  ;;  %v1759_v21 = vsel %vm3831_vm3, %v3765_v44, %v1755_v41 }
 0x51e   : > { %v1813_v17 = vmul.f32 0.5, %v1812_v37  ;;  %v3813_v7 = vmul.f32 %v1913_v20, %v1896_v30  ;;  %v1667_v13 = vmul.f32 %v3819_v18, %v3819_v18  ;;  %v1669_v4 = vmul.f32 %v3821_v48, %v3821_v48 }
 0x51f   : > { %2667 = vperm.xlu2 %2644, %v2666_v63   ;;  %v1773_v34 = vmul.f32 0.5, %v1772_v19  ;;  %vm1777_vm6 = vweird.f32 %v3792_v51  ;;  %v1909_v30 = vmul.f32 %v3758_v45, %v1759_v21  ;;  %v3861_v47 = vmul.f32 0.03125, %v3788_v1 }
 0x520   : > { %v1814_v39 = vsub.f32 1.5, %v1813_v17  ;;  %vm3864_vm9 = vmor %vm1776_vm7, %vm1777_vm6  ;;  %v3871_v21 = vmul.f32 0.03125, %v3729_v5  ;;  %vm1836_vm11 = vweird.f32 %v3798_v16 }
 0x521   : > { %v3804_v53 = vpop.xlane.xlu2 %1562  ;;  %v3811_v11 = vpop.eup %2718  ;;  %v1774_v42 = vsub.f32 1.5, %v1773_v34 }
 0x522   : > { %v3806_v15 = vpop.xlane.xlu1 %1556  ;;  %v1831_v57 = vmul.f32 %v3811_v11, %v3798_v16  ;;  %v1815_v34 = vmul.f32 %v3783_v46, %v1814_v39  ;;  %vm1837_vm12 = vweird.f32 %v3811_v11  ;;  %v1891_v16 = vsub.f32 %v3642_v12, %v3819_v18 }
 0x523   : > { %v1551_v50 = vpop.xlane.xlu0 %1550  ;;  %2672 = vperm.xlu1 %2650, %v2666_v63   ;;  %v1775_v44 = vmul.f32 %v3792_v51, %v1774_v42  ;;  %vm3917_vm13 = vmor %vm1836_vm11, %vm1837_vm12 }
 0x524   : > { %v1832_v55 = vmul.f32 %v3811_v11, %v1831_v57  ;;  %v3868_v42 = vmul.f32 0.03125, %v1551_v50  ;;  %v1819_v5 = vsel %vm3875_vm10, %v3783_v46, %v1815_v34 }
 0x525   : > { %v1779_v38 = vsel %vm3864_vm9, %v3792_v51, %v1775_v44  ;;  %v1671_v51 = vmul.f32 %v3861_v47, %v3861_v47  ;;  %v1915_v34 = vmul.f32 %v3758_v45, %v1819_v5 }
 0x526   : > { %v1833_v63 = vmul.f32 0.5, %v1832_v55  ;;  %v3858_v55 = vmul.f32 0.03125, %v3786_v62  ;;  %v3884_v62 = vperm.slane %v3024_v2, 1 }
 0x528   : > { %v1834_v57 = vsub.f32 1.5, %v1833_v63  ;;  %v1925_v63 = vmul.f32 %v1909_v30, %v1892_v10  ;;  %v1911_v10 = vmul.f32 %v3758_v45, %v1779_v38 }
 0x529   : > { %v1597_v19 = vpop.xlane.xlu2 %1596 }
 0x52a   : > { %v1591_v37 = vpop.xlane.xlu1 %1590  ;;  %v1653_v33 = vmul.f32 0.03125, %v1597_v19  ;;  %v1835_v19 = vmul.f32 %v3811_v11, %v1834_v57  ;;  %v1942_v5 = vadd.f32 %v3884_v62, %v1925_v63 }
 0x52b   : > { %v3847_v6 = vpop.xlane.xlu0 %1568  ;;  %v1651_v20 = vmul.f32 0.03125, %v1591_v37  ;;  %v1673_v37 = vmul.f32 %v3858_v55, %v3858_v55 }
 0x52c   : > { %v1685_v17 = vsub.f32 %v1653_v33, %v1669_v4  ;;  %v1675_v33 = vmul.f32 %v3868_v42, %v3868_v42  ;;  %v1839_v38 = vsel %vm3917_vm13, %v3811_v11, %v1835_v19  ;;  %v1958_v29 = vmax.f32 %v1942_v5, 0.0 }
 0x52d   : > { %v1683_v41 = vsub.f32 %v1651_v20, %v1667_v13  ;;  %v1917_v19 = vmul.f32 %v3758_v45, %v1839_v38 }
 0x52e   : > { %v1701_v8 = vmax.f32 %v1685_v17, 0.0  ;;  %v3907_v17 = vmul.f32 %v3838_v0, %v3838_v0 }
 0x52f   : > { %v1699_v39 = vmax.f32 %v1683_v41, 0.0  ;;  %v3911_v41 = vmul.f32 %v3871_v21, %v3871_v21 }
 0x530   : > { %v3886_v1 = vadd.f32 1e-05, %v1701_v8  ;;  %v1940_v8 = vadd.f32 %v3884_v62, %v3781_v28 }
 0x531   : > { %v3888_v50 = vadd.f32 1e-05, %v1699_v39  ;;  %v1615_v13 = vpop.xlane.xlu2 %1614 }
 0x532   : > { %v1609_v4 = vpop.xlane.xlu1 %1608  ;;  %2720 = vrsqrt.f32 %v3886_v1  ;;  %v1659_v46 = vmul.f32 0.03125, %v1615_v13  ;;  %v3928_v13 = vmul.f32 0.03125, %v3749_v43  ;;  %v1893_v43 = vsub.f32 %v3661_v14, %v3821_v48 }
 0x533   : > { %v1603_v20 = vpop.xlane.xlu0 %1602  ;;  %2722 = vrsqrt.f32 %v3888_v50  ;;  %v1657_v30 = vmul.f32 0.03125, %v1609_v4  ;;  %v3933_v4 = vmul.f32 0.03125, %v3806_v15  ;;  %vm1766_vm14 = vweird.f32 %v3886_v1 }
 0x534   : > { %v1655_v44 = vmul.f32 0.03125, %v1603_v20  ;;  %v1691_v59 = vsub.f32 %v1659_v46, %v1675_v33  ;;  %v1956_v46 = vmax.f32 %v1940_v8, 0.0  ;;  %vm1746_vm1 = vweird.f32 %v3888_v50 }
 0x535   : > { %v1689_v61 = vsub.f32 %v1657_v30, %v1673_v37  ;;  %v1927_v37 = vmul.f32 %v1911_v10, %v1894_v32  ;;  %v1677_v32 = vmul.f32 %v3933_v4, %v3933_v4 }
 0x536   : > { %v1687_v39 = vsub.f32 %v1655_v44, %v1671_v51  ;;  %v1707_v33 = vmax.f32 %v1691_v59, 0.0  ;;  %v1931_v51 = vmul.f32 %v1915_v34, %v1898_v31  ;;  %v3960_v34 = vadd.f32 %v3884_v62, %v3813_v7 }
 0x537   : > { %v1705_v28 = vmax.f32 %v1689_v61, 0.0  ;;  %v3965_v59 = vadd.f32 %v3884_v62, %v1927_v37  ;;  %v1933_v7 = vmul.f32 %v1917_v19, %v1900_v23 }
 0x538   : > { %v1703_v20 = vmax.f32 %v1687_v39, 0.0  ;;  %v3938_v11 = vpop.eup %2720  ;;  %v3942_v63 = vadd.f32 1e-05, %v1707_v33  ;;  %v3968_v8 = vadd.f32 %v3884_v62, %v1931_v51  ;;  %v2077_v33 = vmul.f32 %v2636_v56, %v1956_v46 }
 0x539   : > { %v3945_v15 = vpop.eup %2722  ;;  %v1761_v44 = vmul.f32 %v3938_v11, %v3886_v1  ;;  %v3951_v58 = vadd.f32 1e-05, %v1705_v28  ;;  %v1895_v28 = vsub.f32 %v3659_v60, %v3861_v47  ;;  %v2647_v54 = vpop.permute.xlu2 %2646  ;;  %v1960_v19 = vmax.f32 %v3965_v59, 0.0 }
 0x53a   : > { %v3949_v30 = vadd.f32 1e-05, %v1703_v20  ;;  %v1741_v31 = vmul.f32 %v3945_v15, %v3888_v50  ;;  %2724 = vrsqrt.f32 %v3942_v63  ;;  %v2079_v20 = vmul.f32 %v2637_v9, %v1958_v29 }
 0x53b   : > { %v1621_v10 = vpop.xlane.xlu0 %1620  ;;  %v1762_v57 = vmul.f32 %v3938_v11, %v1761_v44  ;;  %v1962_v56 = vmax.f32 %v3960_v34, 0.0  ;;  %v3992_v29 = vadd.f32 %v3884_v62, %v1933_v7  ;;  %vm1747_vm15 = vweird.f32 %v3945_v15 }
 0x53c   : > { %2726 = vrsqrt.f32 %v3949_v30  ;;  %v1742_v39 = vmul.f32 %v3945_v15, %v1741_v31  ;;  %v1661_v61 = vmul.f32 0.03125, %v1621_v10  ;;  %v4002_v34 = vsel %vm751_vm4, %v2079_v20, 0.0  ;;  %vm4016_vm2 = vmor %vm1746_vm1, %vm1747_vm15 }
 0x53d   : > { %2728 = vrsqrt.f32 %v3951_v58  ;;  %v1763_v5 = vmul.f32 0.5, %v1762_v57  ;;  %v3999_v57 = vsel %vm751_vm4, %v2077_v33, 0.0  ;;  %vm1767_vm0 = vweird.f32 %v3938_v11 }
 0x53e   : > { %v1743_v51 = vmul.f32 0.5, %v1742_v39  ;;  %v1693_v44 = vsub.f32 %v1661_v61, %v1677_v32  ;;  %vm1786_vm3 = vweird.f32 %v3949_v30  ;;  %vm1826_vm5 = vweird.f32 %v3942_v63  ;;  %vm1768_vm6 = vmor %vm1766_vm14, %vm1767_vm0 }
 0x53f   : > { %v1764_v23 = vsub.f32 1.5, %v1763_v5  ;;  %v2649_v50 = vunpack.i.h.bf16 %v2647_v54  ;;  %vm1806_vm9 = vweird.f32 %v3951_v58  ;;  %v4296_v47 = vmax.f32 %v3968_v8, 0.0 }
 0x540   : > { %v3989_v46 = vpop.eup %2724  ;;  %v1744_v26 = vsub.f32 1.5, %v1743_v51  ;;  %v1709_v9 = vmax.f32 %v1693_v44, 0.0  ;;  %vm2173_vm1 = vcmask 1041409  }
 0x541   : > { %v1821_v32 = vmul.f32 %v3989_v46, %v3942_v63  ;;  %v1765_v5 = vmul.f32 %v3938_v11, %v1764_v23  ;;  %vm1827_vm7 = vweird.f32 %v3989_v46  ;;  %v4029_v38 = vpop.permute.xlu2 %2657 }
 0x542   : > { %v2727_v10 = vpop.eup %2726  ;;  %v1745_v39 = vmul.f32 %v3945_v15, %v1744_v26  ;;  %v4007_v7 = vadd.f32 1e-05, %v1709_v9  ;;  %vm4039_vm11 = vmor %vm1826_vm5, %vm1827_vm7  ;;  %vm2179_vm5 = vcmask 1044484  }
 0x543   : > { %v2729_v59 = vpop.eup %2728  ;;  %v1781_v61 = vmul.f32 %v2727_v10, %v3949_v30  ;;  %v1822_v51 = vmul.f32 %v3989_v46, %v1821_v32  ;;  %v1769_v37 = vsel %vm1768_vm6, %v3938_v11, %v1765_v5  ;;  %vm1787_vm8 = vweird.f32 %v2727_v10 }
 0x544   : > { %v1801_v33 = vmul.f32 %v2729_v59, %v3951_v58  ;;  %2730 = vrsqrt.f32 %v4007_v7  ;;  %v1749_v44 = vsel %vm4016_vm2, %v3945_v15, %v1745_v39  ;;  %vm1807_vm10 = vweird.f32 %v2729_v59  ;;  %vm1788_vm12 = vmor %vm1786_vm3, %vm1787_vm8 }
 0x545   : > { %v1782_v20 = vmul.f32 %v2727_v10, %v1781_v61  ;;  %v1823_v23 = vmul.f32 0.5, %v1822_v51  ;;  %v2648_v61 = vunpack.i.l.bf16 %v2647_v54  ;;  %v1908_v1 = vmul.f32 %v3758_v45, %v1749_v44  ;;  %vm1808_vm13 = vmor %vm1806_vm9, %vm1807_vm10 }
 0x546   : > { %v1802_v9 = vmul.f32 %v2729_v59, %v1801_v33  ;;  %v1910_v33 = vmul.f32 %v3758_v45, %v1769_v37  ;;  %v2083_v5 = vmul.f32 %v2649_v50, %v1962_v56  ;;  %vm1846_vm14 = vweird.f32 %v4007_v7 }
 0x547   : > { %v1783_v32 = vmul.f32 0.5, %v1782_v20  ;;  %v1824_v52 = vsub.f32 1.5, %v1823_v23  ;;  %v2081_v44 = vmul.f32 %v2648_v61, %v1960_v19  ;;  %v1924_v37 = vmul.f32 %v1908_v1, %v1891_v16 }
 0x548   : > { %v1803_v31 = vmul.f32 0.5, %v1802_v9  ;;  %v1926_v63 = vmul.f32 %v1910_v33, %v1893_v43  ;;  %v2659_v19 = vunpack.i.l.bf16 %v4029_v38  ;;  %vm2175_vm2 = vcmask 1042434  }
 0x549   : > { %v1784_v51 = vsub.f32 1.5, %v1783_v32  ;;  %v1825_v54 = vmul.f32 %v3989_v46, %v1824_v52  ;;  %v1941_v12 = vadd.f32 %v3884_v62, %v1924_v37  ;;  %vm2177_vm3 = vcmask 1043459  }
 0x54a   : > { %v1804_v20 = vsub.f32 1.5, %v1803_v31  ;;  %v2653_v15 = vpop.permute.xlu1 %2652  ;;  %v2731_v39 = vpop.eup %2730  ;;  %v2660_v31 = vunpack.i.h.bf16 %v4029_v38  ;;  %v1943_v32 = vadd.f32 %v3884_v62, %v1926_v63  ;;  %vm2181_vm6 = vcmask 1045509  }
 0x54b   : > { %v1785_v26 = vmul.f32 %v2727_v10, %v1784_v51  ;;  %v1841_v52 = vmul.f32 %v2731_v39, %v4007_v7  ;;  %v1829_v18 = vsel %vm4039_vm11, %v3989_v46, %v1825_v54  ;;  %v1957_v50 = vmax.f32 %v1941_v12, 0.0 }
 0x54c   : > { %v1805_v58 = vmul.f32 %v2729_v59, %v1804_v20  ;;  %v1959_v61 = vmax.f32 %v1943_v32, 0.0  ;;  %v1916_v46 = vmul.f32 %v3758_v45, %v1829_v18  ;;  %vm1847_vm15 = vweird.f32 %v2731_v39 }
 0x54d   : > { %v1789_v56 = vsel %vm1788_vm12, %v2727_v10, %v1785_v26  ;;  %v1842_v16 = vmul.f32 %v2731_v39, %v1841_v52  ;;  %v2641_v9 = vpop.permute.xlu0 %2640  ;;  %v4295_v26 = vsub.f32 %v3678_v24, %v3868_v42  ;;  %v2654_v11 = vunpack.i.l.bf16 %v2653_v15  ;;  %vm1848_vm0 = vmor %vm1846_vm14, %vm1847_vm15 }
 0x54e   : > { %v1912_v30 = vmul.f32 %v3758_v45, %v1789_v56  ;;  %v1809_v23 = vsel %vm1808_vm13, %v2729_v59, %v1805_v58  ;;  %v2643_v48 = vunpack.i.h.bf16 %v2641_v9  ;;  %v2642_v43 = vunpack.i.l.bf16 %v2641_v9 }
 0x54f   : > { %v1914_v14 = vmul.f32 %v3758_v45, %v1809_v23  ;;  %v1843_v38 = vmul.f32 0.5, %v1842_v16  ;;  %v4294_v59 = vsub.f32 %v3657_v22, %v3858_v55  ;;  %v1932_v60 = vmul.f32 %v1916_v46, %v4295_v26 }
 0x550   : > { %v1928_v10 = vmul.f32 %v1912_v30, %v1895_v28  ;;  %v2078_v1 = vmul.f32 %v2642_v43, %v1957_v50  ;;  %v2080_v20 = vmul.f32 %v2643_v48, %v1959_v61  ;;  %v2085_v28 = vmul.f32 %v2659_v19, %v4296_v47 }
 0x551   : > { %v1930_v51 = vmul.f32 %v1914_v14, %v4294_v59  ;;  %v1844_v33 = vsub.f32 1.5, %v1843_v38  ;;  %v2655_v24 = vunpack.i.h.bf16 %v2653_v15  ;;  %v1949_v19 = vadd.f32 %v3884_v62, %v1932_v60 }
 0x552   : > { %v1945_v54 = vadd.f32 %v3884_v62, %v1928_v10  ;;  %v2094_v58 = vsel %vm751_vm4, %v2078_v1, 0.0  ;;  %v2663_v52 = vpop.permute.xlu1 %2662  ;;  %v2103_v56 = vsel %vm751_vm4, %v2080_v20, 0.0  ;;  %v2120_v14 = vsel %vm751_vm4, %v2083_v5, 0.0 }
 0x553   : > { %v1947_v37 = vadd.f32 %v3884_v62, %v1930_v51  ;;  %v1845_v22 = vmul.f32 %v2731_v39, %v1844_v33  ;;  %v2095_v63 = vadd.f32 %v2094_v58, %v3999_v57  ;;  %v2104_v8 = vadd.f32 %v2103_v56, %v4002_v34 }
 0x554   : > { %v1961_v55 = vmax.f32 %v1945_v54, 0.0  ;;  %v2664_v30 = vunpack.i.l.bf16 %v2663_v52  ;;  %v1965_v32 = vmax.f32 %v1949_v19, 0.0  ;;  %v2111_v7 = vsel %vm751_vm4, %v2081_v44, 0.0 }
 0x555   : > { %v1963_v42 = vmax.f32 %v1947_v37, 0.0  ;;  %v2096_v18 = vrot.slane %v2095_v63, 4  ;;  %v1849_v16 = vsel %vm1848_vm0, %v2731_v39, %v1845_v22  ;;  %v2105_v9 = vrot.slane %v2104_v8, 4 }
 0x556   : > { %v2082_v12 = vmul.f32 %v2654_v11, %v1961_v55  ;;  %v1918_v57 = vmul.f32 %v3758_v45, %v1849_v16  ;;  %v4297_v39 = vsub.f32 %v3676_v27, %v3933_v4  ;;  %v4298_v10 = vmax.f32 %v3992_v29, 0.0 }
 0x557   : > { %v2084_v23 = vmul.f32 %v2655_v24, %v1963_v42  ;;  %v2097_v48 = vadd.f32 %v2096_v18, %v2095_v63  ;;  %v2106_v50 = vadd.f32 %v2105_v9, %v2104_v8  ;;  %v2086_v51 = vmul.f32 %v2664_v30, %v1965_v32 }
 0x558   : > { %v2112_v15 = vsel %vm751_vm4, %v2082_v12, 0.0  ;;  %v1934_v38 = vmul.f32 %v1918_v57, %v4297_v39  ;;  %v2087_v61 = vmul.f32 %v2660_v31, %v4298_v10  ;;  %v2129_v5 = vsel %vm751_vm4, %v2085_v28, 0.0 }
 0x559   : > { %v2113_v43 = vadd.f32 %v2112_v15, %v2111_v7  ;;  %v2121_v34 = vsel %vm751_vm4, %v2084_v23, 0.0  ;;  %v2098_v59 = vrot.slane %v2097_v48, 2  ;;  %v2107_v1 = vrot.slane %v2106_v50, 2 }
 0x55a   : > { %v2122_v46 = vadd.f32 %v2121_v34, %v2120_v14  ;;  %v1951_v33 = vadd.f32 %v3884_v62, %v1934_v38  ;;  %v2665_v26 = vunpack.i.h.bf16 %v2663_v52  ;;  %v2130_v60 = vsel %vm751_vm4, %v2086_v51, 0.0 }
 0x55b   : > { %v2114_v44 = vrot.slane %v2113_v43, 4  ;;  %v2099_v20 = vadd.f32 %v2098_v59, %v2097_v48  ;;  %v2108_v27 = vadd.f32 %v2107_v1, %v2106_v50  ;;  %v2131_v11 = vadd.f32 %v2130_v60, %v2129_v5 }
 0x55c   : > { %v2123_v54 = vrot.slane %v2122_v46, 4  ;;  %v1967_v4 = vmax.f32 %v1951_v33, 0.0  ;;  %v1694_v29 = vsub.f32 %v3928_v13, %v3907_v17  ;;  %v1664_v31 = vmul.f32 0.03125, %v3770_v49 }
 0x55d   : > { %v2115_v47 = vadd.f32 %v2114_v44, %v2113_v43  ;;  %v2100_v28 = vrot.slane %v2099_v20, 1  ;;  %v2109_v22 = vrot.slane %v2108_v27, 1  ;;  %v2132_v63 = vrot.slane %v2131_v11, 4 }
 0x55e   : > { %v2124_v37 = vadd.f32 %v2123_v54, %v2122_v46  ;;  %v2088_v55 = vmul.f32 %v2665_v26, %v1967_v4  ;;  %v2138_v56 = vsel %vm751_vm4, %v2087_v61, 0.0  ;;  %v1696_v17 = vsub.f32 %v1664_v31, %v3911_v41 }
 0x55f   : > { %v2116_v58 = vrot.slane %v2115_v47, 2  ;;  %v2101_v24 = vadd.f32 %v2100_v28, %v2099_v20  ;;  %v2110_v8 = vadd.f32 %v2109_v22, %v2108_v27  ;;  %v2133_v12 = vadd.f32 %v2132_v63, %v2131_v11 }
 0x560   : > { %v2125_v52 = vrot.slane %v2124_v37, 2  ;;  %v2139_v19 = vsel %vm751_vm4, %v2088_v55, 0.0  ;;  %v1710_v57 = vmax.f32 %v1694_v29, 0.0  ;;  %v1712_v7 = vmax.f32 %v1696_v17, 0.0 }
 0x561   : > { %v2117_v42 = vadd.f32 %v2116_v58, %v2115_v47  ;;  %v2140_v49 = vadd.f32 %v2139_v19, %v2138_v56  ;;  %v2174_v16 = vsel %vm2173_vm1, %v2110_v8, %v2101_v24  ;;  %v2134_v30 = vrot.slane %v2133_v12, 2 }
 0x562   : > { %v2126_v13 = vadd.f32 %v2125_v52, %v2124_v37  ;;  %v1726_v39 = vadd.f32 1e-05, %v1710_v57  ;;  %v1728_v10 = vadd.f32 1e-05, %v1712_v7  ;;  %v4107_v20 = vmul.f32 0.03125, %v3847_v6 }
 0x563   : > { %v2118_v18 = vrot.slane %v2117_v42, 1  ;;  %v2141_v9 = vrot.slane %v2140_v49, 4  ;;  %v2135_v14 = vadd.f32 %v2134_v30, %v2133_v12  ;;  %v4110_v26 = vmul.f32 0.03125, %v3804_v53 }
 0x564   : > { %v2127_v23 = vrot.slane %v2126_v13, 1  ;;  %2732 = vrsqrt.f32 %v1726_v39  ;;  %v1681_v4 = vmul.f32 %v4107_v20, %v4107_v20  ;;  %vm1856_vm9 = vweird.f32 %v1726_v39 }
 0x565   : > { %v2119_v32 = vadd.f32 %v2118_v18, %v2117_v42  ;;  %v2142_v48 = vadd.f32 %v2141_v9, %v2140_v49  ;;  %v2136_v34 = vrot.slane %v2135_v14, 1  ;;  %2734 = vrsqrt.f32 %v1728_v10 }
 0x566   : > { %v2128_v15 = vadd.f32 %v2127_v23, %v2126_v13  ;;  %v1679_v31 = vmul.f32 %v4110_v26, %v4110_v26  ;;  %vm1876_vm11 = vweird.f32 %v1728_v10 }
 0x567   : > { %v2176_v43 = vsel %vm2175_vm2, %v2119_v32, %v2174_v16  ;;  %v2143_v50 = vrot.slane %v2142_v48, 2  ;;  %v2137_v38 = vadd.f32 %v2136_v34, %v2135_v14  ;;  %v1902_v32 = vsub.f32 %v3608_v35, %v3838_v0 }
 0x568   : > { %v2178_v41 = vsel %vm2177_vm3, %v2128_v15, %v2176_v43  ;;  %v1904_v14 = vsub.f32 %v3622_v25, %v3871_v21  ;;  %v1905_v35 = vsub.f32 %v3692_v40, %v4107_v20  ;;  %vm2183_vm3 = vcmask 1046534  }
 0x569   : > { %v2144_v61 = vadd.f32 %v2143_v50, %v2142_v48  ;;  %v2180_v46 = vsel %vm2179_vm5, %v2137_v38, %v2178_v41  ;;  %vm2185_vm5 = vcmask 1047559  }
 0x56a   : > { %v2733_v44 = vpop.eup %2732 }
 0x56b   : > { %v2145_v59 = vrot.slane %v2144_v61, 1  ;;  %v2735_v1 = vpop.eup %2734  ;;  %v1851_v33 = vmul.f32 %v2733_v44, %v1726_v39  ;;  %vm1857_vm7 = vweird.f32 %v2733_v44 }
 0x56c   : > { %v1871_v54 = vmul.f32 %v2735_v1, %v1728_v10  ;;  %vm1877_vm8 = vweird.f32 %v2735_v1  ;;  %vm1858_vm10 = vmor %vm1856_vm9, %vm1857_vm7 }
 0x56d   : > { %v2146_v51 = vadd.f32 %v2145_v59, %v2144_v61  ;;  %v1852_v60 = vmul.f32 %v2733_v44, %v1851_v33  ;;  %vm1878_vm12 = vmor %vm1876_vm11, %vm1877_vm8  ;;  %v1903_v61 = vsub.f32 %v3674_v36, %v4110_v26 }
 0x56e   : > { %v1872_v47 = vmul.f32 %v2735_v1, %v1871_v54 }
 0x56f   : > { %v4104_v5 = vsel %vm2181_vm6, %v2146_v51, %v2180_v46  ;;  %v1853_v58 = vmul.f32 0.5, %v1852_v60 }
 0x570   : > { %v1873_v22 = vmul.f32 0.5, %v1872_v47 }
 0x571   : > { %v1854_v56 = vsub.f32 1.5, %v1853_v58 }
 0x572   : > { %v1874_v52 = vsub.f32 1.5, %v1873_v22 }
 0x573   : > { %v1855_v42 = vmul.f32 %v2733_v44, %v1854_v56 }
 0x574   : > { %v1875_v8 = vmul.f32 %v2735_v1, %v1874_v52 }
 0x575   : > { %v1859_v17 = vsel %vm1858_vm10, %v2733_v44, %v1855_v42 }
 0x576   : > { %v1879_v13 = vsel %vm1878_vm12, %v2735_v1, %v1875_v8  ;;  %v1919_v30 = vmul.f32 %v3758_v45, %v1859_v17  ;;  %v1972_v17 = vld [vmem:[#allocation2] sm:$0xff] }
 0x577   : > { %v1921_v23 = vmul.f32 %v3758_v45, %v1879_v13 }
 0x578   : > { %v1935_v48 = vmul.f32 %v1919_v30, %v1902_v32 }
 0x579   : > { %v1937_v43 = vmul.f32 %v1921_v23, %v1904_v14 }
 0x57a   : > { %v1633_v27 = vpop.xlane.xlu2 %1632  ;;  %v1952_v21 = vadd.f32 %v3884_v62, %v1935_v48 }
 0x57b   : > { %v1665_v11 = vmul.f32 0.03125, %v1633_v27  ;;  %v1954_v25 = vadd.f32 %v3884_v62, %v1937_v43 }
 0x57c   : > { %v1968_v20 = vmax.f32 %v1952_v21, 0.0 }
 0x57d   : > { %v1627_v29 = vpop.xlane.xlu1 %1626  ;;  %v1697_v37 = vsub.f32 %v1665_v11, %v1681_v4  ;;  %v1970_v1 = vmax.f32 %v1954_v25, 0.0 }
 0x57e   : > { %v1663_v28 = vmul.f32 0.03125, %v1627_v29 }
 0x57f   : > { %v1713_v6 = vmax.f32 %v1697_v37, 0.0 }
 0x580   : > { %v1695_v55 = vsub.f32 %v1663_v28, %v1679_v31 }
 0x581   : > { %v1729_v63 = vadd.f32 1e-05, %v1713_v6 }
 0x582   : > { %v1711_v53 = vmax.f32 %v1695_v55, 0.0  ;;  %v2668_v39 = vpop.permute.xlu2 %2667 }
 0x583   : > { %2736 = vrsqrt.f32 %v1729_v63  ;;  %vm1886_vm14 = vweird.f32 %v1729_v63  ;;  %v2670_v46 = vunpack.i.h.bf16 %v2668_v39  ;;  %v2669_v33 = vunpack.i.l.bf16 %v2668_v39 }
 0x584   : > { %v1727_v24 = vadd.f32 1e-05, %v1711_v53 }
 0x585   : > { %v2091_v60 = vmul.f32 %v2670_v46, %v1970_v1  ;;  %v2089_v11 = vmul.f32 %v2669_v33, %v1968_v20 }
 0x586   : > { %2738 = vrsqrt.f32 %v1727_v24  ;;  %vm1866_vm1 = vweird.f32 %v1727_v24 }
 0x587   : > { %v2156_v26 = vsel %vm751_vm4, %v2091_v60, 0.0  ;;  %v2147_v58 = vsel %vm751_vm4, %v2089_v11, 0.0 }
 0x589   : > { %v2737_v19 = vpop.eup %2736 }
 0x58a   : > { %v1881_v12 = vmul.f32 %v2737_v19, %v1729_v63  ;;  %vm1887_vm13 = vweird.f32 %v2737_v19 }
 0x58b   : > { %vm1888_vm0 = vmor %vm1886_vm14, %vm1887_vm13 }
 0x58c   : > { %v2739_v49 = vpop.eup %2738  ;;  %v1882_v18 = vmul.f32 %v2737_v19, %v1881_v12 }
 0x58d   : > { %v1861_v16 = vmul.f32 %v2739_v49, %v1727_v24  ;;  %vm1867_vm15 = vweird.f32 %v2739_v49 }
 0x58e   : > { %v1883_v9 = vmul.f32 0.5, %v1882_v18  ;;  %vm1868_vm2 = vmor %vm1866_vm1, %vm1867_vm15 }
 0x58f   : > { %v1862_v57 = vmul.f32 %v2739_v49, %v1861_v16 }
 0x590   : > { %v1884_v7 = vsub.f32 1.5, %v1883_v9 }
 0x591   : > { %v1863_v15 = vmul.f32 0.5, %v1862_v57 }
 0x592   : > { %v1885_v34 = vmul.f32 %v2737_v19, %v1884_v7 }
 0x593   : > { %v1864_v50 = vsub.f32 1.5, %v1863_v15 }
 0x594   : > { %v1889_v38 = vsel %vm1888_vm0, %v2737_v19, %v1885_v34 }
 0x595   : > { %v1865_v41 = vmul.f32 %v2739_v49, %v1864_v50  ;;  %v1922_v0 = vmul.f32 %v3758_v45, %v1889_v38  ;;  %v2673_v44 = vpop.permute.xlu1 %2672 }
 0x596   : > { %v2675_v47 = vunpack.i.h.bf16 %v2673_v44  ;;  %v2674_v29 = vunpack.i.l.bf16 %v2673_v44 }
 0x597   : > { %v1869_v10 = vsel %vm1868_vm2, %v2739_v49, %v1865_v41  ;;  %v1938_v51 = vmul.f32 %v1922_v0, %v1905_v35 }
 0x598   : > { %v1920_v59 = vmul.f32 %v3758_v45, %v1869_v10 }
 0x599   : > { %v1955_v40 = vadd.f32 %v3884_v62, %v1938_v51 }
 0x59a   : > { %v1936_v54 = vmul.f32 %v1920_v59, %v1903_v61 }
 0x59b   : > { %v1971_v4 = vmax.f32 %v1955_v40, 0.0 }
 0x59c   : > { %v1953_v27 = vadd.f32 %v3884_v62, %v1936_v54 }
 0x59d   : > { %v2092_v36 = vmul.f32 %v2675_v47, %v1971_v4 }
 0x59e   : > { %v1969_v31 = vmax.f32 %v1953_v27, 0.0 }
 0x59f   : > { %v2157_v37 = vsel %vm751_vm4, %v2092_v36, 0.0 }
 0x5a0   : > { %v2090_v45 = vmul.f32 %v2674_v29, %v1969_v31  ;;  %v2158_v28 = vadd.f32 %v2157_v37, %v2156_v26 }
 0x5a2   : > { %v2148_v22 = vsel %vm751_vm4, %v2090_v45, 0.0  ;;  %v2159_v55 = vrot.slane %v2158_v28, 4 }
 0x5a3   : > { %v2149_v6 = vadd.f32 %v2148_v22, %v2147_v58 }
 0x5a4   : > { %v2160_v53 = vadd.f32 %v2159_v55, %v2158_v28 }
 0x5a5   : > { %v2150_v63 = vrot.slane %v2149_v6, 4 }
 0x5a6   : > { %v2161_v56 = vrot.slane %v2160_v53, 2 }
 0x5a7   : > { %v2151_v62 = vadd.f32 %v2150_v63, %v2149_v6 }
 0x5a8   : > { %v2162_v24 = vadd.f32 %v2161_v56, %v2160_v53 }
 0x5a9   : > { %v2152_v52 = vrot.slane %v2151_v62, 2 }
 0x5aa   : > { %v2163_v8 = vrot.slane %v2162_v24, 1 }
 0x5ab   : > { %v2153_v42 = vadd.f32 %v2152_v52, %v2151_v62 }
 0x5ac   : > { %v2164_v13 = vadd.f32 %v2163_v8, %v2162_v24 }
 0x5ad   : > { %v2154_v19 = vrot.slane %v2153_v42, 1 }
 0x5af   : > { %v2155_v12 = vadd.f32 %v2154_v19, %v2153_v42 }
 0x5b1   : > { %v2184_v49 = vsel %vm2183_vm3, %v2155_v12, %v4104_v5 }
 0x5b2   : > { %v2186_v18 = vsel %vm2185_vm5, %v2164_v13, %v2184_v49 }
 0x5b3   : > { %v2188_v16 = vadd.f32 %v2186_v18, %v1972_v17 }
 0x5b5   : > { %2189 = vst.msk [vmem:[#allocation2] sm:$0xff] %vm751_vm4, %v2188_v16 }
 0x5b6 PF: > { %p2526_p4 = scmp.ne.s32.totalorder %s2836_s15, 1 }
 0x5b8   : > { %2193 = sbr.rel (%p2526_p4) target bundleno = 2059 (0x80b), region = 80 }
 0x5bd   : > { %v2201_v30 = vld [vmem:[%s4247_s10 + $0x38] sm:$0xff]  ;;  %v2200_v5 = vld [vmem:[%s4247_s10 + $0x30] sm:$0xff]  ;;  %v2199_v57 = vld [vmem:[%s4247_s10 + $0x28] sm:$0xff]  ;;  %vm2207_vm4 = vcmask 261120   ;;  %v2278_v47 = vperm.slane %v3024_v2, 2  ;;  %v2281_v31 = vperm.slane %v3024_v2, 3 }
 0x5be   : > { %v2197_v23 = vld [vmem:[%s4247_s10 + $0x18] sm:$0xff]  ;;  %2223 = vmatpush.msra.mxu0 %v2201_v30  ;;  %v2196_v9 = vld [vmem:[%s4247_s10 + $0x10] sm:$0xff]  ;;  %v2195_v32 = vld [vmem:[%s4247_s10 + $0x8] sm:$0xff]  ;;  %v2331_v13 = vperm.slane %v3024_v2, 4  ;;  %v2334_v30 = vperm.slane %v3024_v2, 5 }
 0x5bf   : > { %2246 = vmatpush.msra.mxu1 %v2197_v23  ;;  %v2198_v14 = vld [vmem:[%s4247_s10 + $0x20] sm:$0xff]  ;;  %v2205_v35 = vld [vmem:[%s4247_s10 + $0x58] sm:$0xff]  ;;  %v2204_v25 = vld [vmem:[%s4247_s10 + $0x50] sm:$0xff] }
 0x5c0   : > { %2224 = vmatpush.msra.mxu0 %v2200_v5  ;;  %v2194_v7 = vld [vmem:[%s4247_s10] sm:$0xff]  ;;  %2299 = vmatpush.msra.mxu2 %v2205_v35  ;;  %v2203_v0 = vld [vmem:[%s4247_s10 + $0x48] sm:$0xff] }
 0x5c1   : > { %2247 = vmatpush.msra.mxu1 %v2196_v9  ;;  %v2206_v15 = vld [vmem:[#allocation2] sm:$0xff] }
 0x5c2   : > { %2225 = vmatpush.msra.mxu0 %v2199_v57  ;;  %2300 = vmatpush.msra.mxu2 %v2204_v25  ;;  %v2202_v21 = vld [vmem:[%s4247_s10 + $0x40] sm:$0xff] }
 0x5c3   : > { %2248 = vmatpush.msra.mxu1 %v2195_v32 }
 0x5c4   : > { %2226 = vmatpush.msra.mxu0 %v2198_v14  ;;  %2301 = vmatpush.msra.mxu2 %v2203_v0 }
 0x5c5   : > { %2249 = vmatpush.msra.mxu1 %v2194_v7  ;;  %2527 = vmatmul.msk.f32.vlgmr.msra.gmra.mxu0 %vm2207_vm4, %v2206_v15 }
 0x5c6   : > { %2528 = vmatmul.msk.f32.vlgmr.msra.gmra.mxu1 %vm2207_vm4, %v3034_v3  ;;  %2302 = vmatpush.msra.mxu2 %v2202_v21 }
 0x642   : > { %v2228_v48 = vpop.f32.mrf.mxu0 }
 0x643   : > { %v2251_v43 = vpop.f32.mrf.mxu1 }
 0x644   : > { %v2252_v34 = vadd.f32 %v2251_v43, %v2228_v48 }
 0x646   : > { %v2254_v50 = vsel %vm2207_vm4, %v2252_v34, 0.0  ;;  %v2257_v41 = vmul.f32 %v2252_v34, %v2252_v34 }
 0x647   : > { %2255 = vadd.xlane.f32.xlu0 %v2254_v50 }
 0x648   : > { %v2258_v39 = vsel %vm2207_vm4, %v2257_v41, 0.0 }
 0x64f   : > { %2259 = vadd.xlane.f32.xlu0 %v2258_v39 }
 0x6ba   : > { %v2256_v38 = vpop.xlane.xlu0 %2255 }
 0x6bb   : > { %v2261_v10 = vmul.f32 0.03125, %v2256_v38 }
 0x6bd   : > { %v2263_v46 = vmul.f32 %v2261_v10, %v2261_v10  ;;  %v2277_v11 = vsub.f32 %v2252_v34, %v2261_v10 }
 0x6c2   : > { %v2260_v61 = vpop.xlane.xlu0 %2259 }
 0x6c3   : > { %v2262_v59 = vmul.f32 0.03125, %v2260_v61 }
 0x6c5   : > { %v2264_v51 = vsub.f32 %v2262_v59, %v2263_v46 }
 0x6c7   : > { %v2265_v44 = vmax.f32 %v2264_v51, 0.0 }
 0x6c9   : > { %v2266_v1 = vadd.f32 1e-05, %v2265_v44 }
 0x6cb   : > { %2740 = vrsqrt.f32 %v2266_v1  ;;  %vm2273_vm7 = vweird.f32 %v2266_v1 }
 0x6d1   : > { %v2741_v33 = vpop.eup %2740 }
 0x6d2   : > { %v2268_v54 = vmul.f32 %v2741_v33, %v2266_v1  ;;  %vm2274_vm6 = vweird.f32 %v2741_v33 }
 0x6d3   : > { %vm2275_vm8 = vmor %vm2273_vm7, %vm2274_vm6 }
 0x6d4   : > { %v2269_v40 = vmul.f32 %v2741_v33, %v2268_v54 }
 0x6d6   : > { %v2270_v20 = vmul.f32 0.5, %v2269_v40 }
 0x6d8   : > { %v2271_v60 = vsub.f32 1.5, %v2270_v20 }
 0x6da   : > { %v2272_v27 = vmul.f32 %v2741_v33, %v2271_v60 }
 0x6dc   : > { %v2276_v4 = vsel %vm2275_vm8, %v2741_v33, %v2272_v27 }
 0x6dd   : > { %v2279_v29 = vmul.f32 %v2278_v47, %v2276_v4 }
 0x6df   : > { %v2280_v36 = vmul.f32 %v2279_v29, %v2277_v11 }
 0x6e1   : > { %v2282_v26 = vadd.f32 %v2281_v31, %v2280_v36 }
 0x6e3   : > { %v2283_v45 = vmax.f32 %v2282_v26, 0.0 }
 0x6e5   : > { %2529 = vmatmul.msk.f32.vlgmr.msra.gmra.mxu2 %vm2207_vm4, %v2283_v45 }
 0x768   : > { %v2304_v37 = vpop.f32.mrf.mxu2 }
 0x769   : > { %v2307_v28 = vsel %vm2207_vm4, %v2304_v37, 0.0  ;;  %v2310_v58 = vmul.f32 %v2304_v37, %v2304_v37 }
 0x76a   : > { %2308 = vadd.xlane.f32.xlu1 %v2307_v28 }
 0x76b   : > { %v2311_v22 = vsel %vm2207_vm4, %v2310_v58, 0.0 }
 0x772   : > { %2312 = vadd.xlane.f32.xlu1 %v2311_v22 }
 0x7dd   : > { %v2309_v6 = vpop.xlane.xlu1 %2308 }
 0x7de   : > { %v2314_v55 = vmul.f32 0.03125, %v2309_v6 }
 0x7e0   : > { %v2316_v53 = vmul.f32 %v2314_v55, %v2314_v55  ;;  %v2330_v16 = vsub.f32 %v2304_v37, %v2314_v55 }
 0x7e5   : > { %v2313_v63 = vpop.xlane.xlu1 %2312 }
 0x7e6   : > { %v2315_v62 = vmul.f32 0.03125, %v2313_v63 }
 0x7e8   : > { %v2317_v56 = vsub.f32 %v2315_v62, %v2316_v53 }
 0x7ea   : > { %v2318_v52 = vmax.f32 %v2317_v56, 0.0 }
 0x7ec   : > { %v2319_v24 = vadd.f32 1e-05, %v2318_v52 }
 0x7ee   : > { %2742 = vrsqrt.f32 %v2319_v24  ;;  %vm2326_vm10 = vweird.f32 %v2319_v24 }
 0x7f4   : > { %v2743_v42 = vpop.eup %2742 }
 0x7f5   : > { %v2321_v8 = vmul.f32 %v2743_v42, %v2319_v24  ;;  %vm2327_vm9 = vweird.f32 %v2743_v42 }
 0x7f6   : > { %vm2328_vm11 = vmor %vm2326_vm10, %vm2327_vm9 }
 0x7f7   : > { %v2322_v19 = vmul.f32 %v2743_v42, %v2321_v8 }
 0x7f9   : > { %v2323_v12 = vmul.f32 0.5, %v2322_v19 }
 0x7fb   : > { %v2324_v17 = vsub.f32 1.5, %v2323_v12 }
 0x7fd   : > { %v2325_v49 = vmul.f32 %v2743_v42, %v2324_v17 }
 0x7ff   : > { %v2329_v18 = vsel %vm2328_vm11, %v2743_v42, %v2325_v49 }
 0x800   : > { %v2332_v23 = vmul.f32 %v2331_v13, %v2329_v18 }
 0x802   : > { %v2333_v5 = vmul.f32 %v2332_v23, %v2330_v16 }
 0x804   : > { %v2335_v9 = vadd.f32 %v2334_v30, %v2333_v5 }
 0x806   : > { %v2336_v57 = vadd.f32 %v2335_v9, %v3034_v3 }
 0x808   : > { %v2337_v32 = vmax.f32 %v2336_v57, 0.0 }
 0x80a   : > { %2338 = vst.msk [vmem:[%s483_s26] sm:$0xff] %vm2207_vm4, %v2337_v32 }
 0x80b PF: > { %s2531_s15 = sshll.u32 %s2840_s16, 3  ;;  %s2352_s1 = sshll.u32 %s483_s26, 4  ;;  %s2353_s1 = int_to_ptr.vmem [resolvable:$true] %s2352_s1 }
 0x80c   : > { %s2350_s17 = scalar_lea.hbm %s4250_s13, %s2531_s15  ;;  %s4299_s24 = sand.u32 1, %s2828_s30  }
 0x80d   : > { %s2354_s14 = sshll.u32 %s2350_s17, 4  ;;  %s2340_s0 = scalar_lea.sflag [#allocation8], %s4299_s24  ;;  %s2355_s14 = int_to_ptr.hbm [resolvable:$true] %s2354_s14 }
 0x80e   : > { %s2770_s12 = sshra.s32 %s2355_s14, 4  ;;  %s2776_s6 = scalar_lea.hbm %s4250_s13, 16  ;;  %s2771_s12 = int_to_ptr.hbm [resolvable:$true] %s2770_s12 }
 0x80f   : > { %s2772_s27 = scalar_lea.hbm %s2771_s12, 8  ;;  %p2777_p8 = scmp.lt.s32.totalorder %s2771_s12, %s4250_s13 }
 0x810   : > { %p2773_p5 = scmp.ne.s32.totalorder %s2771_s12, %s2772_s27  ;;  %p2778_p10 = scmp.lt.s32.totalorder %s2776_s6, %s2772_s27 }
 0x812   : > { %p2774_p6 = pnand %p2773_p5, %p2984_p3  ;;  %p2779_p11 = por %p2778_p10, %p2777_p8 }
 0x814   : > { %p2775_p7 = pneg %p2774_p6 }
 0x816   : > { %p2780_p12 = pnand %p2779_p11, %p2775_p7 }
 0x818   : > { %2783 = shalt.err (!%p2780_p12)
}
 0x819   : > { %2542 = dma.vmem_to_hbm [thread:$0]  (%p2984_p3), %s2353_s1, 128, %s2355_s14, %s2340_s0  }
 0x81a PF: > { %s4300_s25 = sld [smem:[#allocation11_spill]]  ;;  %p2548_p13 = scmp.ge.s32.totalorder %s2852_s18, 2 }
 0x81c   : > { %p2545_p0 = pnand %p2548_p13, %p2994_p9 }
 0x81e   : > { %p2546_p1 = pneg %p2545_p0 }
 0x820   : > { %s2366_s28 = sand.u32 1, %s4300_s25  }
 0x821   : > { %s2367_s20 = scalar_lea.sflag [#allocation8], %s2366_s28 }
 0x822   : > { %2819 = dma.done.wait (%p2546_p1), %s2367_s20, 128  }
 0x823   : > { %2821 = vsyncadd (%p2546_p1), %s2367_s20, 4294967168  ;;  %s34_s18 = sadd.s32 1, %s2852_s18   ;;  %s4302_s15 = sld [smem:[#allocation12_spill]] }
 0x824   : > { %p31_p2 = scmp.ge.s32.totalorder %s34_s18, 6   ;;  %s4303_s14 = sld [smem:[#allocation18_spill]] }
 0x825   : > { %s4304_s23 = sld [smem:[#allocation13_spill]]  ;;  %s4308_s29 = smov %s2828_s30 }
 0x826   : > { %s4305_s16 = sld [smem:[#allocation14_spill]] }
 0x827   : > { %s4306_s17 = sld [smem:[#allocation15_spill]]  ;;  %33 = sbr.rel (!%p31_p2) target bundleno = 14 (0xe), region = 127 }
 0x828   : > { %s4307_s0 = sld [smem:[#allocation16_spill]] }
 0x829   : > { %s4309_s30 = smov %s4302_s15 }
 0x82b   : > { %s4310_s15 = smov %s4304_s23 }
 0x82c   :  { %2373 = vsyncpa [#allocation8], 1 }
 0x82d   :  { %2375 = vsyncpa [#allocation8 + $0x1], 1 }

</bundles_post_ra>
